<compile_context>
chip_gen: v6e
topology: v6e:2x2x1
jax: 0.10.0
libtpu: 0.0.40
codegen_flags: <defaults>
</compile_context>

<pallas_src>
import functools
import numpy as np
import jax
import jax.numpy as jnp
from jax import lax
from jax.experimental import pallas as pl
from jax.experimental.pallas import tpu as pltpu

_NEG_BIG = -1e30   # plain Python float (NOT a jnp scalar) -> no captured-constant error


def pn_decoder_kernel(T, c_explore, cdt,
                      inputsT_ref, dec_in_ref, hidden_ref, ctxT_ref, mask_ref,
                      wih_ref, whh_ref, bih_ref, bhh_ref,
                      wq_ref, bq_ref, v_ref,
                      alpha_ref, prob_ref, ptr_ref, hid_ref):
    """Full greedy pointer-net decode for one batch tile.

    Per-tile shapes (tb = batch tile, Lp = padded seq len):
      inputsT/ctxT : (tb, H, Lp)   mask : (tb, Lp)   dec_in/hidden : (tb, H)
      outputs      : alpha (tb, T, Lp), prob/ptr (tb, T), hid (tb, H)
    """
    tb, H, Lp = ctxT_ref.shape

    # Only the small carried state lives in values; big tiles / weights are read from
    # their refs at point of use so live ranges stay short.
    x = dec_in_ref[...]                                   # (tb, H) f32
    h = hidden_ref[...]                                   # (tb, H) f32
    mask = mask_ref[...]                                  # (tb, Lp) f32
    runner = lax.broadcasted_iota(jnp.int32, (tb, Lp), 1)

    def dotf(a, b):   # bf16 (or f32) operands, f32 accumulation on the MXU
        return jnp.dot(a.astype(cdt), b, preferred_element_type=jnp.float32)

    probs, ptrs = [], []
    for t in range(T):                                    # small static trip count -> unrolled
        # ---- GRUCell: fused (H, 3H) gate GEMMs (PyTorch nn.GRUCell semantics) ----
        gi = dotf(x, wih_ref[...]) + bih_ref[...]         # (tb, 3H)
        gh = dotf(h, whh_ref[...]) + bhh_ref[...]
        r = jax.nn.sigmoid(gi[:, :H] + gh[:, :H])
        z = jax.nn.sigmoid(gi[:, H:2 * H] + gh[:, H:2 * H])
        n = jnp.tanh(gi[:, 2 * H:] + r * gh[:, 2 * H:])
        h = (1.0 - z) * n + z * h

        # ---- pointer attention, lane-dense (Lp-last):  u = c * tanh(v . tanh(Wq h + Wr c)) ----
        q = dotf(h, wq_ref[...]) + bq_ref[...]                            # (tb, H) f32
        tanned = jnp.tanh(q.astype(cdt)[:, :, None] + ctxT_ref[...])      # (tb, H, Lp) in cdt
        u = jnp.sum(tanned.astype(jnp.float32) * v_ref[...][None, :, :],
                    axis=1)                                               # (tb, Lp) f32
        scores = jnp.where(mask > 0.0, c_explore * jnp.tanh(u), _NEG_BIG)
        s = scores - jnp.max(scores, axis=-1, keepdims=True)
        e = jnp.exp(s)                                                    # max(e) == 1 exactly
        inv = pl.reciprocal(jnp.sum(e, axis=-1, keepdims=True), approx=True)
        alpha_ref[:, t, :] = e * inv                                      # attention probs

        # ---- greedy selection: max(alpha) == inv, first-max tie-break, mask update ----
        idx = jnp.min(jnp.where(s >= 0.0, runner, Lp), axis=-1, keepdims=True)   # (tb, 1)
        one_hot = (runner == idx).astype(jnp.float32)                            # (tb, Lp)
        mask = mask * (1.0 - one_hot)                                             # never re-select
        x = jnp.sum(inputsT_ref[...].astype(jnp.float32) * one_hot[:, None, :],
                    axis=2)                                                       # (tb, H)

        probs.append(inv)
        ptrs.append(idx.astype(jnp.int32))

    # One lane-contiguous store per output instead of T one-column masked stores.
    prob_ref[...] = jnp.concatenate(probs, axis=1)
    ptr_ref[...] = jnp.concatenate(ptrs, axis=1)
    hid_ref[...] = h


def _round_up(x, m):
    return ((x + m - 1) // m) * m


def _auto_batch_tile(B, Lp, H, T, itemsize, vmem_budget=36 << 20):
    """Largest batch tile (multiple of 8, <=256) whose working set fits the VMEM budget."""
    per_row = (2 * (2 * Lp * H * itemsize)        # double-buffered inputs^T + ctx_proj^T
               + 2 * (T * Lp + 2 * T + H) * 4     # double-buffered alpha/prob/ptr/hid outputs
               + 16 * H * 4)                      # in-kernel f32 state / temporaries
    tb = vmem_budget // max(per_row, 1)
    return int(max(8, min(256, (tb // 8) * 8)))


def pn_decoder_forward(inputs, decoder_input, hidden, context, docs_lens, params,
                       max_dec_len=3, explorate_rate=10.0, batch_tile=None,
                       compute_dtype=jnp.bfloat16):
    B, L, H = context.shape
    T = min(max_dec_len, int(min(docs_lens)))
    cdt = compute_dtype

    Lp = _round_up(L, 128)                         # lane-dense padded sequence length
    if batch_tile is None:
        batch_tile = _auto_batch_tile(B, Lp, H, T, jnp.dtype(cdt).itemsize)
    tb = max(8, (min(batch_tile, _round_up(B, 8)) // 8) * 8)
    Bp = _round_up(B, tb)
    # v7x megacore: ensure the "parallel" grid axis has >= 2 tiles when the padding allows.
    if Bp // tb == 1 and Bp >= 16 and (Bp // 2) % 8 == 0:
        tb = Bp // 2

    inputs_p = jnp.pad(inputs, ((0, Bp - B), (0, Lp - L), (0, 0)))
    context_p = jnp.pad(context, ((0, Bp - B), (0, Lp - L), (0, 0)))
    dec_in_p = jnp.pad(decoder_input, ((0, Bp - B), (0, 0))).astype(jnp.float32)
    hidden_p = jnp.pad(hidden, ((0, Bp - B), (0, 0))).astype(jnp.float32)

    lens = np.zeros((Bp,), np.int32)
    lens[:B] = np.asarray(docs_lens, np.int32)
    mask0 = (lax.broadcasted_iota(jnp.int32, (Bp, Lp), 1)
             < jnp.asarray(lens)[:, None]).astype(jnp.float32)

    # Context projection (Attention's Conv1d(k=1)) hoisted out of the kernel: one GEMM by XLA.
    ctx_proj = (jnp.einsum('blh,hk->blk', context_p, params['wr_t'],
                           preferred_element_type=jnp.float32)
                + params['br'][None, :, :])
    # Lane-dense (Lp-last) layouts + compute-dtype cast at the pallas_call boundary.
    ctx_projT = jnp.transpose(ctx_proj.astype(cdt), (0, 2, 1))        # (Bp, H, Lp)
    inputs_T = jnp.transpose(inputs_p.astype(cdt), (0, 2, 1))         # (Bp, H, Lp)
    wih = params['wih_t'].astype(cdt)                                 # (H, 3H) fused gates
    whh = params['whh_t'].astype(cdt)
    wq = params['wq_t'].astype(cdt)
    bih, bhh, bq = params['bih'], params['bhh'], params['bq']         # small f32 biases
    v_col = jnp.transpose(params['v'], (1, 0))                        # (H, 1) f32

    batch3 = lambda i: (i, 0, 0)
    batch2 = lambda i: (i, 0)
    whole = lambda i: (0, 0)

    in_specs = [
        pl.BlockSpec((tb, H, Lp), batch3),     # inputs^T
        pl.BlockSpec((tb, H), batch2),         # decoder_input
        pl.BlockSpec((tb, H), batch2),         # hidden
        pl.BlockSpec((tb, H, Lp), batch3),     # ctx_proj^T
        pl.BlockSpec((tb, Lp), batch2),        # mask
        pl.BlockSpec((H, 3 * H), whole),       # GRU weight_ih^T (fused gates)
        pl.BlockSpec((H, 3 * H), whole),       # GRU weight_hh^T
        pl.BlockSpec((1, 3 * H), whole),       # GRU bias_ih
        pl.BlockSpec((1, 3 * H), whole),       # GRU bias_hh
        pl.BlockSpec((H, H), whole),           # attention W_q^T
        pl.BlockSpec((1, H), whole),           # attention b_q
        pl.BlockSpec((H, 1), whole),           # attention v (column)
    ]
    out_specs = (
        pl.BlockSpec((tb, T, Lp), batch3),     # alpha, already in (B, T, L) order
        pl.BlockSpec((tb, T), batch2),         # selected prob
        pl.BlockSpec((tb, T), batch2),         # pointer
        pl.BlockSpec((tb, H), batch2),         # final hidden
    )
    out_shape = (
        jax.ShapeDtypeStruct((Bp, T, Lp), jnp.float32),
        jax.ShapeDtypeStruct((Bp, T), jnp.float32),
        jax.ShapeDtypeStruct((Bp, T), jnp.int32),
        jax.ShapeDtypeStruct((Bp, H), jnp.float32),
    )

    kernel = functools.partial(pn_decoder_kernel, T, float(explorate_rate), cdt)
    alphas, probs, ptrs, h = pl.pallas_call(
        kernel,
        grid=(Bp // tb,),                              # independent batch tiles
        out_shape=out_shape,
        in_specs=in_specs,
        out_specs=out_specs,
        compiler_params=pltpu.CompilerParams(
            dimension_semantics=("parallel",),         # megacore-shard batch tiles on v7x
            # Safe under v7x's 64 MiB/TC; raise toward ~96 MB (with a bigger batch tile)
            # on v5e/v6e's 128 MiB VMEM.
            vmem_limit_bytes=48 * 1024 * 1024),
    )(inputs_T, dec_in_p, hidden_p, ctx_projT, mask0,
      wih, whh, bih, bhh, wq, bq, v_col)

    return alphas[:B, :, :L], probs[:B], ptrs[:B], h[:B]


def pn_decoder_reference(T, H, c_explore, inputs, x, h, context, mask, params,
                         compute_dtype=jnp.bfloat16):
    """Pure-JAX reference at un-padded shapes, mirroring the kernel's precision choices."""
    cdt = compute_dtype
    wih = params['wih_t'].astype(cdt)
    whh = params['whh_t'].astype(cdt)
    wq = params['wq_t'].astype(cdt)
    bih, bhh, bq = params['bih'], params['bhh'], params['bq']
    v = params['v']                                    # (1, H)
    inputs = inputs.astype(cdt).astype(jnp.float32)
    ctx_proj = (jnp.einsum('blh,hk->blk', context, params['wr_t'],
                           preferred_element_type=jnp.float32)
                + params['br'][None, :, :]).astype(cdt)      # (B, L, H)
    B, L, _ = context.shape
    runner = lax.broadcasted_iota(jnp.int32, (B, L), 1)

    def dotf(a, b):
        return jnp.dot(a.astype(cdt), b, preferred_element_type=jnp.float32)

    alphas, probs, ptrs = [], [], []
    for _ in range(T):
        gi = dotf(x, wih) + bih
        gh = dotf(h, whh) + bhh
        r = jax.nn.sigmoid(gi[:, :H] + gh[:, :H])
        z = jax.nn.sigmoid(gi[:, H:2 * H] + gh[:, H:2 * H])
        n = jnp.tanh(gi[:, 2 * H:] + r * gh[:, 2 * H:])
        h = (1.0 - z) * n + z * h
        q = dotf(h, wq) + bq
        tanned = jnp.tanh(q.astype(cdt)[:, None, :] + ctx_proj)          # (B, L, H)
        u = jnp.sum(tanned.astype(jnp.float32) * v[None, :, :], axis=-1)
        scores = jnp.where(mask > 0.0, c_explore * jnp.tanh(u), -1e30)
        alpha = jax.nn.softmax(scores, axis=-1)
        idx = jnp.argmax(scores, axis=-1).astype(jnp.int32)
        one_hot = (runner == idx[:, None]).astype(jnp.float32)
        mask = mask * (1.0 - one_hot)
        x = jnp.sum(inputs * one_hot[:, :, None], axis=1)
        alphas.append(alpha)
        probs.append(jnp.max(alpha, axis=-1))
        ptrs.append(idx)
    return (jnp.stack(alphas, 1), jnp.stack(probs, 1), jnp.stack(ptrs, 1), h)


def init_params(key, H):
    k = 1.0 / np.sqrt(H)
    keys = jax.random.split(key, 9)
    u = lambda kk, shape, lim=k: jax.random.uniform(kk, shape, jnp.float32, -lim, lim)
    return dict(
        wih_t=u(keys[0], (H, 3 * H)),    # GRUCell weight_ih^T
        whh_t=u(keys[1], (H, 3 * H)),    # GRUCell weight_hh^T
        bih=u(keys[2], (1, 3 * H)),
        bhh=u(keys[3], (1, 3 * H)),
        wq_t=u(keys[4], (H, H)),         # attention input_linear^T
        bq=u(keys[5], (1, H)),
        wr_t=u(keys[6], (H, H)),         # attention context Conv1d(k=1) as matmul
        br=u(keys[7], (1, H)),
        v=u(keys[8], (1, H), 1.0),       # attention scoring vector V ~ U(-1, 1)
    )


if __name__ == "__main__":
    B, L, H = 2, 8, 32
    max_dec_len = 3
    explorate_rate = 10.0
    docs_lens = [8, 6]

    key = jax.random.PRNGKey(0)
    k_in, k_hid, k_ctx, k_par = jax.random.split(key, 4)
    inputs = jax.random.normal(k_in, (B, L, H), jnp.float32)
    decoder_input = jnp.zeros((B, H), jnp.float32)        # initial decoder input is 0
    hidden = jax.random.normal(k_hid, (B, H), jnp.float32)
    context = jax.random.normal(k_ctx, (B, L, H), jnp.float32)
    params = init_params(k_par, H)

    T = min(max_dec_len, int(min(docs_lens)))
    lens = jnp.asarray(docs_lens, jnp.int32)[:, None]
    mask0 = (lax.broadcasted_iota(jnp.int32, (B, L), 1) < lens).astype(jnp.float32)

    # ---- strict check: f32 compute path vs matching-precision pure-JAX reference ----
    o32, p32, i32, h32 = jax.block_until_ready(
        pn_decoder_forward(inputs, decoder_input, hidden, context, docs_lens, params,
                           max_dec_len=max_dec_len, explorate_rate=explorate_rate,
                           compute_dtype=jnp.float32))
    r_out, r_prob, r_ptr, r_h = pn_decoder_reference(
        T, H, explorate_rate, inputs, decoder_input, hidden, context, mask0, params,
        compute_dtype=jnp.float32)
    np.testing.assert_allclose(np.asarray(o32), np.asarray(r_out), rtol=2e-2, atol=2e-2)
    np.testing.assert_allclose(np.asarray(p32), np.asarray(r_prob), rtol=2e-2, atol=2e-2)
    np.testing.assert_allclose(np.asarray(h32), np.asarray(r_h), rtol=2e-2, atol=2e-2)
    assert np.array_equal(np.asarray(i32), np.asarray(r_ptr))

    # ---- default fast path (bf16 boundary + bf16 tanh): shapes, step-0 accuracy,
    #      and pointer/argmax self-consistency (later steps cascade through argmax ties
    #      so they are only checked for consistency, not bitwise vs the f32 reference). ----
    outputs, selected_probs, pointers, h_final = jax.block_until_ready(
        pn_decoder_forward(inputs, decoder_input, hidden, context, docs_lens, params,
                           max_dec_len=max_dec_len, explorate_rate=explorate_rate))
    rb_out, rb_prob, _, _ = pn_decoder_reference(
        T, H, explorate_rate, inputs, decoder_input, hidden, context, mask0, params,
        compute_dtype=jnp.bfloat16)
    assert outputs.shape == (B, T, L)
    assert selected_probs.shape == (B, T)
    assert pointers.shape == (B, T)
    assert h_final.shape == (B, H)
    np.testing.assert_allclose(np.asarray(outputs[:, 0, :]), np.asarray(rb_out[:, 0, :]),
                               rtol=5e-2, atol=5e-2)
    np.testing.assert_allclose(np.asarray(selected_probs[:, 0]), np.asarray(rb_prob[:, 0]),
                               rtol=5e-2, atol=5e-2)
    assert np.array_equal(np.asarray(pointers), np.argmax(np.asarray(outputs), axis=-1))

    print("KERNEL_OK")
</pallas_src>

<mosaic_0001>
module attributes {stable_mosaic.version = 11 : i64} {
  func.func @pn_decoder_kernel(%arg0: i32, %arg1: memref<8x32x128xf32, #tpu.memory_space<vmem>>, %arg2: memref<8x32xf32, #tpu.memory_space<vmem>>, %arg3: memref<8x32xf32, #tpu.memory_space<vmem>>, %arg4: memref<8x32x128xf32, #tpu.memory_space<vmem>>, %arg5: memref<8x128xf32, #tpu.memory_space<vmem>>, %arg6: memref<32x96xf32, #tpu.memory_space<vmem>>, %arg7: memref<32x96xf32, #tpu.memory_space<vmem>>, %arg8: memref<1x96xf32, #tpu.memory_space<vmem>>, %arg9: memref<1x96xf32, #tpu.memory_space<vmem>>, %arg10: memref<32x32xf32, #tpu.memory_space<vmem>>, %arg11: memref<1x32xf32, #tpu.memory_space<vmem>>, %arg12: memref<32x1xf32, #tpu.memory_space<vmem>>, %arg13: memref<8x3x128xf32, #tpu.memory_space<vmem>>, %arg14: memref<8x3xf32, #tpu.memory_space<vmem>>, %arg15: memref<8x3xi32, #tpu.memory_space<vmem>>, %arg16: memref<8x32xf32, #tpu.memory_space<vmem>>) attributes {dimension_semantics = [#tpu.dimension_semantics<parallel>], iteration_bounds = array<i64: 1>, scalar_prefetch = 0 : i64, scratch_operands = 0 : i64, tpu.core_type = #tpu.core_type<tc>, window_params = [{transform_indices = @transform_0, window_bounds = array<i64: 8, 32, 128>}, {transform_indices = @transform_1, window_bounds = array<i64: 8, 32>}, {transform_indices = @transform_2, window_bounds = array<i64: 8, 32>}, {transform_indices = @transform_3, window_bounds = array<i64: 8, 32, 128>}, {transform_indices = @transform_4, window_bounds = array<i64: 8, 128>}, {pipeline_mode = #tpu.pipeline_mode<synchronous>, transform_indices = @transform_5, window_bounds = array<i64: 32, 96>}, {pipeline_mode = #tpu.pipeline_mode<synchronous>, transform_indices = @transform_6, window_bounds = array<i64: 32, 96>}, {pipeline_mode = #tpu.pipeline_mode<synchronous>, transform_indices = @transform_7, window_bounds = array<i64: 1, 96>}, {pipeline_mode = #tpu.pipeline_mode<synchronous>, transform_indices = @transform_8, window_bounds = array<i64: 1, 96>}, {pipeline_mode = #tpu.pipeline_mode<synchronous>, transform_indices = @transform_9, window_bounds = array<i64: 32, 32>}, {pipeline_mode = #tpu.pipeline_mode<synchronous>, transform_indices = @transform_10, window_bounds = array<i64: 1, 32>}, {pipeline_mode = #tpu.pipeline_mode<synchronous>, transform_indices = @transform_11, window_bounds = array<i64: 32, 1>}, {transform_indices = @transform_12, window_bounds = array<i64: 8, 3, 128>}, {transform_indices = @transform_13, window_bounds = array<i64: 8, 3>}, {transform_indices = @transform_14, window_bounds = array<i64: 8, 3>}, {transform_indices = @transform_15, window_bounds = array<i64: 8, 32>}]} {
    %c0 = arith.constant 0 : index
    %c0_0 = arith.constant 0 : index
    %0 = vector.load %arg2[%c0, %c0_0] : memref<8x32xf32, #tpu.memory_space<vmem>>, vector<8x32xf32>
    %c0_1 = arith.constant 0 : index
    %c0_2 = arith.constant 0 : index
    %1 = vector.load %arg3[%c0_1, %c0_2] : memref<8x32xf32, #tpu.memory_space<vmem>>, vector<8x32xf32>
    %c0_3 = arith.constant 0 : index
    %c0_4 = arith.constant 0 : index
    %2 = vector.load %arg5[%c0_3, %c0_4] : memref<8x128xf32, #tpu.memory_space<vmem>>, vector<8x128xf32>
    %3 = tpu.iota {dimensions = array<i32: 1>} : vector<8x128xi32>
    %c0_5 = arith.constant 0 : index
    %c0_6 = arith.constant 0 : index
    %4 = vector.load %arg6[%c0_5, %c0_6] : memref<32x96xf32, #tpu.memory_space<vmem>>, vector<32x96xf32>
    %cst = arith.constant dense<0.000000e+00> : vector<8x96xf32>
    %5 = tpu.matmul %0, %4, %cst {dimension_numbers = #tpu.dot_dimension_numbers<[1], [0], [0], [1], [0, 0, 1, 1], [], []>} : vector<8x32xf32>, vector<32x96xf32>, vector<8x96xf32> -> vector<8x96xf32>
    %c0_7 = arith.constant 0 : index
    %c0_8 = arith.constant 0 : index
    %6 = vector.load %arg8[%c0_7, %c0_8] : memref<1x96xf32, #tpu.memory_space<vmem>>, vector<1x96xf32>
    %7 = vector.broadcast %6 : vector<1x96xf32> to vector<8x96xf32>
    %8 = arith.addf %5, %7 : vector<8x96xf32>
    %c0_9 = arith.constant 0 : index
    %c0_10 = arith.constant 0 : index
    %9 = vector.load %arg7[%c0_9, %c0_10] : memref<32x96xf32, #tpu.memory_space<vmem>>, vector<32x96xf32>
    %cst_11 = arith.constant dense<0.000000e+00> : vector<8x96xf32>
    %10 = tpu.matmul %1, %9, %cst_11 {dimension_numbers = #tpu.dot_dimension_numbers<[1], [0], [0], [1], [0, 0, 1, 1], [], []>} : vector<8x32xf32>, vector<32x96xf32>, vector<8x96xf32> -> vector<8x96xf32>
    %c0_12 = arith.constant 0 : index
    %c0_13 = arith.constant 0 : index
    %11 = vector.load %arg9[%c0_12, %c0_13] : memref<1x96xf32, #tpu.memory_space<vmem>>, vector<1x96xf32>
    %12 = vector.broadcast %11 : vector<1x96xf32> to vector<8x96xf32>
    %13 = arith.addf %10, %12 : vector<8x96xf32>
    %14 = vector.extract_strided_slice %8 {offsets = [0, 0], sizes = [8, 32], strides = [1, 1]} : vector<8x96xf32> to vector<8x32xf32>
    %15 = vector.extract_strided_slice %13 {offsets = [0, 0], sizes = [8, 32], strides = [1, 1]} : vector<8x96xf32> to vector<8x32xf32>
    %16 = arith.addf %14, %15 : vector<8x32xf32>
    %17 = arith.negf %16 : vector<8x32xf32>
    %18 = math.exp %17 : vector<8x32xf32>
    %cst_14 = arith.constant 1.000000e+00 : f32
    %19 = vector.broadcast %cst_14 : f32 to vector<8x32xf32>
    %20 = arith.addf %19, %18 : vector<8x32xf32>
    %21 = arith.divf %19, %20 : vector<8x32xf32>
    %22 = vector.extract_strided_slice %8 {offsets = [0, 32], sizes = [8, 32], strides = [1, 1]} : vector<8x96xf32> to vector<8x32xf32>
    %23 = vector.extract_strided_slice %13 {offsets = [0, 32], sizes = [8, 32], strides = [1, 1]} : vector<8x96xf32> to vector<8x32xf32>
    %24 = arith.addf %22, %23 : vector<8x32xf32>
    %25 = arith.negf %24 : vector<8x32xf32>
    %26 = math.exp %25 : vector<8x32xf32>
    %cst_15 = arith.constant 1.000000e+00 : f32
    %27 = vector.broadcast %cst_15 : f32 to vector<8x32xf32>
    %28 = arith.addf %27, %26 : vector<8x32xf32>
    %29 = arith.divf %27, %28 : vector<8x32xf32>
    %30 = vector.extract_strided_slice %8 {offsets = [0, 64], sizes = [8, 32], strides = [1, 1]} : vector<8x96xf32> to vector<8x32xf32>
    %31 = vector.extract_strided_slice %13 {offsets = [0, 64], sizes = [8, 32], strides = [1, 1]} : vector<8x96xf32> to vector<8x32xf32>
    %32 = arith.mulf %21, %31 : vector<8x32xf32>
    %33 = arith.addf %30, %32 : vector<8x32xf32>
    %34 = math.tanh %33 : vector<8x32xf32>
    %cst_16 = arith.constant 1.000000e+00 : f32
    %35 = vector.broadcast %cst_16 : f32 to vector<8x32xf32>
    %36 = arith.subf %35, %29 : vector<8x32xf32>
    %37 = arith.mulf %36, %34 : vector<8x32xf32>
    %38 = arith.mulf %29, %1 : vector<8x32xf32>
    %39 = arith.addf %37, %38 : vector<8x32xf32>
    %c0_17 = arith.constant 0 : index
    %c0_18 = arith.constant 0 : index
    %40 = vector.load %arg10[%c0_17, %c0_18] : memref<32x32xf32, #tpu.memory_space<vmem>>, vector<32x32xf32>
    %cst_19 = arith.constant dense<0.000000e+00> : vector<8x32xf32>
    %41 = tpu.matmul %39, %40, %cst_19 {dimension_numbers = #tpu.dot_dimension_numbers<[1], [0], [0], [1], [0, 0, 1, 1], [], []>} : vector<8x32xf32>, vector<32x32xf32>, vector<8x32xf32> -> vector<8x32xf32>
    %c0_20 = arith.constant 0 : index
    %c0_21 = arith.constant 0 : index
    %42 = vector.load %arg11[%c0_20, %c0_21] : memref<1x32xf32, #tpu.memory_space<vmem>>, vector<1x32xf32>
    %43 = vector.broadcast %42 : vector<1x32xf32> to vector<8x32xf32>
    %44 = arith.addf %41, %43 : vector<8x32xf32>
    %45 = vector.shape_cast %44 : vector<8x32xf32> to vector<8x32x1xf32>
    %c0_22 = arith.constant 0 : index
    %c0_23 = arith.constant 0 : index
    %c0_24 = arith.constant 0 : index
    %46 = vector.load %arg4[%c0_22, %c0_23, %c0_24] : memref<8x32x128xf32, #tpu.memory_space<vmem>>, vector<8x32x128xf32>
    %47 = vector.broadcast %45 : vector<8x32x1xf32> to vector<8x32x128xf32>
    %48 = arith.addf %47, %46 : vector<8x32x128xf32>
    %49 = math.tanh %48 : vector<8x32x128xf32>
    %c0_25 = arith.constant 0 : index
    %c0_26 = arith.constant 0 : index
    %50 = vector.load %arg12[%c0_25, %c0_26] : memref<32x1xf32, #tpu.memory_space<vmem>>, vector<32x1xf32>
    %51 = vector.shape_cast %50 : vector<32x1xf32> to vector<1x32x1xf32>
    %52 = vector.broadcast %51 : vector<1x32x1xf32> to vector<8x32x128xf32>
    %53 = arith.mulf %49, %52 : vector<8x32x128xf32>
    %cst_27 = arith.constant dense<0.000000e+00> : vector<8x128xf32>
    %54 = vector.multi_reduction <add>, %53, %cst_27 [1] : vector<8x32x128xf32> to vector<8x128xf32>
    %cst_28 = arith.constant 0.000000e+00 : f32
    %55 = vector.broadcast %cst_28 : f32 to vector<8x128xf32>
    %56 = arith.cmpf ogt, %2, %55 : vector<8x128xf32>
    %57 = math.tanh %54 : vector<8x128xf32>
    %cst_29 = arith.constant 1.000000e+01 : f32
    %58 = vector.broadcast %cst_29 : f32 to vector<8x128xf32>
    %59 = arith.mulf %58, %57 : vector<8x128xf32>
    %cst_30 = arith.constant -1.000000e+30 : f32
    %60 = vector.broadcast %cst_30 : f32 to vector<8x128xf32>
    %61 = arith.select %56, %59, %60 : vector<8x128xi1>, vector<8x128xf32>
    %cst_31 = arith.constant dense<0xFF800000> : vector<8xf32>
    %62 = vector.multi_reduction <maximumf>, %61, %cst_31 [1] : vector<8x128xf32> to vector<8xf32>
    %63 = vector.shape_cast %62 : vector<8xf32> to vector<8x1xf32>
    %64 = vector.broadcast %63 : vector<8x1xf32> to vector<8x128xf32>
    %65 = arith.subf %61, %64 : vector<8x128xf32>
    %66 = math.exp %65 : vector<8x128xf32>
    %cst_32 = arith.constant dense<0.000000e+00> : vector<8xf32>
    %67 = vector.multi_reduction <add>, %66, %cst_32 [1] : vector<8x128xf32> to vector<8xf32>
    %68 = vector.shape_cast %67 : vector<8xf32> to vector<8x1xf32>
    %69 = tpu.reciprocal %68 {approx = true} : vector<8x1xf32> -> vector<8x1xf32>
    %70 = vector.broadcast %69 : vector<8x1xf32> to vector<8x128xf32>
    %71 = arith.mulf %66, %70 : vector<8x128xf32>
    %c0_33 = arith.constant 0 : index
    %c0_34 = arith.constant 0 : index
    %c0_35 = arith.constant 0 : index
    %72 = vector.load %arg13[%c0_33, %c0_34, %c0_35] : memref<8x3x128xf32, #tpu.memory_space<vmem>>, vector<8x1x128xf32>
    %73 = vector.shape_cast %72 : vector<8x1x128xf32> to vector<8x128xf32>
    %74 = vector.shape_cast %71 : vector<8x128xf32> to vector<8x1x128xf32>
    tpu.vector_store %arg13[%c0_33, %c0_34, %c0_35], %74 {strides = array<i32>} : memref<8x3x128xf32, #tpu.memory_space<vmem>>, vector<8x1x128xf32>,
    %cst_36 = arith.constant 0.000000e+00 : f32
    %75 = vector.broadcast %cst_36 : f32 to vector<8x128xf32>
    %76 = arith.cmpf oge, %65, %75 : vector<8x128xf32>
    %c128_i32 = arith.constant 128 : i32
    %77 = vector.broadcast %c128_i32 : i32 to vector<8x128xi32>
    %78 = arith.select %76, %3, %77 : vector<8x128xi1>, vector<8x128xi32>
    %cst_37 = arith.constant dense<2147483647> : vector<8xi32>
    %79 = vector.multi_reduction <minsi>, %78, %cst_37 [1] : vector<8x128xi32> to vector<8xi32>
    %80 = vector.shape_cast %79 : vector<8xi32> to vector<8x1xi32>
    %81 = vector.broadcast %80 : vector<8x1xi32> to vector<8x128xi32>
    %82 = arith.cmpi eq, %3, %81 : vector<8x128xi32>
    %83 = arith.extui %82 : vector<8x128xi1> to vector<8x128xi32>
    %84 = arith.sitofp %83 : vector<8x128xi32> to vector<8x128xf32>
    %cst_38 = arith.constant 1.000000e+00 : f32
    %85 = vector.broadcast %cst_38 : f32 to vector<8x128xf32>
    %86 = arith.subf %85, %84 : vector<8x128xf32>
    %87 = arith.mulf %2, %86 : vector<8x128xf32>
    %c0_39 = arith.constant 0 : index
    %c0_40 = arith.constant 0 : index
    %c0_41 = arith.constant 0 : index
    %88 = vector.load %arg1[%c0_39, %c0_40, %c0_41] : memref<8x32x128xf32, #tpu.memory_space<vmem>>, vector<8x32x128xf32>
    %89 = vector.shape_cast %84 : vector<8x128xf32> to vector<8x1x128xf32>
    %90 = vector.broadcast %89 : vector<8x1x128xf32> to vector<8x32x128xf32>
    %91 = arith.mulf %88, %90 : vector<8x32x128xf32>
    %cst_42 = arith.constant dense<0.000000e+00> : vector<8x32xf32>
    %92 = vector.multi_reduction <add>, %91, %cst_42 [2] : vector<8x32x128xf32> to vector<8x32xf32>
    %c0_43 = arith.constant 0 : index
    %c0_44 = arith.constant 0 : index
    %93 = vector.load %arg6[%c0_43, %c0_44] : memref<32x96xf32, #tpu.memory_space<vmem>>, vector<32x96xf32>
    %cst_45 = arith.constant dense<0.000000e+00> : vector<8x96xf32>
    %94 = tpu.matmul %92, %93, %cst_45 {dimension_numbers = #tpu.dot_dimension_numbers<[1], [0], [0], [1], [0, 0, 1, 1], [], []>} : vector<8x32xf32>, vector<32x96xf32>, vector<8x96xf32> -> vector<8x96xf32>
    %c0_46 = arith.constant 0 : index
    %c0_47 = arith.constant 0 : index
    %95 = vector.load %arg8[%c0_46, %c0_47] : memref<1x96xf32, #tpu.memory_space<vmem>>, vector<1x96xf32>
    %96 = vector.broadcast %95 : vector<1x96xf32> to vector<8x96xf32>
    %97 = arith.addf %94, %96 : vector<8x96xf32>
    %c0_48 = arith.constant 0 : index
    %c0_49 = arith.constant 0 : index
    %98 = vector.load %arg7[%c0_48, %c0_49] : memref<32x96xf32, #tpu.memory_space<vmem>>, vector<32x96xf32>
    %cst_50 = arith.constant dense<0.000000e+00> : vector<8x96xf32>
    %99 = tpu.matmul %39, %98, %cst_50 {dimension_numbers = #tpu.dot_dimension_numbers<[1], [0], [0], [1], [0, 0, 1, 1], [], []>} : vector<8x32xf32>, vector<32x96xf32>, vector<8x96xf32> -> vector<8x96xf32>
    %c0_51 = arith.constant 0 : index
    %c0_52 = arith.constant 0 : index
    %100 = vector.load %arg9[%c0_51, %c0_52] : memref<1x96xf32, #tpu.memory_space<vmem>>, vector<1x96xf32>
    %101 = vector.broadcast %100 : vector<1x96xf32> to vector<8x96xf32>
    %102 = arith.addf %99, %101 : vector<8x96xf32>
    %103 = vector.extract_strided_slice %97 {offsets = [0, 0], sizes = [8, 32], strides = [1, 1]} : vector<8x96xf32> to vector<8x32xf32>
    %104 = vector.extract_strided_slice %102 {offsets = [0, 0], sizes = [8, 32], strides = [1, 1]} : vector<8x96xf32> to vector<8x32xf32>
    %105 = arith.addf %103, %104 : vector<8x32xf32>
    %106 = arith.negf %105 : vector<8x32xf32>
    %107 = math.exp %106 : vector<8x32xf32>
    %cst_53 = arith.constant 1.000000e+00 : f32
    %108 = vector.broadcast %cst_53 : f32 to vector<8x32xf32>
    %109 = arith.addf %108, %107 : vector<8x32xf32>
    %110 = arith.divf %108, %109 : vector<8x32xf32>
    %111 = vector.extract_strided_slice %97 {offsets = [0, 32], sizes = [8, 32], strides = [1, 1]} : vector<8x96xf32> to vector<8x32xf32>
    %112 = vector.extract_strided_slice %102 {offsets = [0, 32], sizes = [8, 32], strides = [1, 1]} : vector<8x96xf32> to vector<8x32xf32>
    %113 = arith.addf %111, %112 : vector<8x32xf32>
    %114 = arith.negf %113 : vector<8x32xf32>
    %115 = math.exp %114 : vector<8x32xf32>
    %cst_54 = arith.constant 1.000000e+00 : f32
    %116 = vector.broadcast %cst_54 : f32 to vector<8x32xf32>
    %117 = arith.addf %116, %115 : vector<8x32xf32>
    %118 = arith.divf %116, %117 : vector<8x32xf32>
    %119 = vector.extract_strided_slice %97 {offsets = [0, 64], sizes = [8, 32], strides = [1, 1]} : vector<8x96xf32> to vector<8x32xf32>
    %120 = vector.extract_strided_slice %102 {offsets = [0, 64], sizes = [8, 32], strides = [1, 1]} : vector<8x96xf32> to vector<8x32xf32>
    %121 = arith.mulf %110, %120 : vector<8x32xf32>
    %122 = arith.addf %119, %121 : vector<8x32xf32>
    %123 = math.tanh %122 : vector<8x32xf32>
    %cst_55 = arith.constant 1.000000e+00 : f32
    %124 = vector.broadcast %cst_55 : f32 to vector<8x32xf32>
    %125 = arith.subf %124, %118 : vector<8x32xf32>
    %126 = arith.mulf %125, %123 : vector<8x32xf32>
    %127 = arith.mulf %118, %39 : vector<8x32xf32>
    %128 = arith.addf %126, %127 : vector<8x32xf32>
    %c0_56 = arith.constant 0 : index
    %c0_57 = arith.constant 0 : index
    %129 = vector.load %arg10[%c0_56, %c0_57] : memref<32x32xf32, #tpu.memory_space<vmem>>, vector<32x32xf32>
    %cst_58 = arith.constant dense<0.000000e+00> : vector<8x32xf32>
    %130 = tpu.matmul %128, %129, %cst_58 {dimension_numbers = #tpu.dot_dimension_numbers<[1], [0], [0], [1], [0, 0, 1, 1], [], []>} : vector<8x32xf32>, vector<32x32xf32>, vector<8x32xf32> -> vector<8x32xf32>
    %c0_59 = arith.constant 0 : index
    %c0_60 = arith.constant 0 : index
    %131 = vector.load %arg11[%c0_59, %c0_60] : memref<1x32xf32, #tpu.memory_space<vmem>>, vector<1x32xf32>
    %132 = vector.broadcast %131 : vector<1x32xf32> to vector<8x32xf32>
    %133 = arith.addf %130, %132 : vector<8x32xf32>
    %134 = vector.shape_cast %133 : vector<8x32xf32> to vector<8x32x1xf32>
    %c0_61 = arith.constant 0 : index
    %c0_62 = arith.constant 0 : index
    %c0_63 = arith.constant 0 : index
    %135 = vector.load %arg4[%c0_61, %c0_62, %c0_63] : memref<8x32x128xf32, #tpu.memory_space<vmem>>, vector<8x32x128xf32>
    %136 = vector.broadcast %134 : vector<8x32x1xf32> to vector<8x32x128xf32>
    %137 = arith.addf %136, %135 : vector<8x32x128xf32>
    %138 = math.tanh %137 : vector<8x32x128xf32>
    %c0_64 = arith.constant 0 : index
    %c0_65 = arith.constant 0 : index
    %139 = vector.load %arg12[%c0_64, %c0_65] : memref<32x1xf32, #tpu.memory_space<vmem>>, vector<32x1xf32>
    %140 = vector.shape_cast %139 : vector<32x1xf32> to vector<1x32x1xf32>
    %141 = vector.broadcast %140 : vector<1x32x1xf32> to vector<8x32x128xf32>
    %142 = arith.mulf %138, %141 : vector<8x32x128xf32>
    %cst_66 = arith.constant dense<0.000000e+00> : vector<8x128xf32>
    %143 = vector.multi_reduction <add>, %142, %cst_66 [1] : vector<8x32x128xf32> to vector<8x128xf32>
    %cst_67 = arith.constant 0.000000e+00 : f32
    %144 = vector.broadcast %cst_67 : f32 to vector<8x128xf32>
    %145 = arith.cmpf ogt, %87, %144 : vector<8x128xf32>
    %146 = math.tanh %143 : vector<8x128xf32>
    %cst_68 = arith.constant 1.000000e+01 : f32
    %147 = vector.broadcast %cst_68 : f32 to vector<8x128xf32>
    %148 = arith.mulf %147, %146 : vector<8x128xf32>
    %cst_69 = arith.constant -1.000000e+30 : f32
    %149 = vector.broadcast %cst_69 : f32 to vector<8x128xf32>
    %150 = arith.select %145, %148, %149 : vector<8x128xi1>, vector<8x128xf32>
    %cst_70 = arith.constant dense<0xFF800000> : vector<8xf32>
    %151 = vector.multi_reduction <maximumf>, %150, %cst_70 [1] : vector<8x128xf32> to vector<8xf32>
    %152 = vector.shape_cast %151 : vector<8xf32> to vector<8x1xf32>
    %153 = vector.broadcast %152 : vector<8x1xf32> to vector<8x128xf32>
    %154 = arith.subf %150, %153 : vector<8x128xf32>
    %155 = math.exp %154 : vector<8x128xf32>
    %cst_71 = arith.constant dense<0.000000e+00> : vector<8xf32>
    %156 = vector.multi_reduction <add>, %155, %cst_71 [1] : vector<8x128xf32> to vector<8xf32>
    %157 = vector.shape_cast %156 : vector<8xf32> to vector<8x1xf32>
    %158 = tpu.reciprocal %157 {approx = true} : vector<8x1xf32> -> vector<8x1xf32>
    %159 = vector.broadcast %158 : vector<8x1xf32> to vector<8x128xf32>
    %160 = arith.mulf %155, %159 : vector<8x128xf32>
    %c0_72 = arith.constant 0 : index
    %c1 = arith.constant 1 : index
    %c0_73 = arith.constant 0 : index
    %161 = vector.load %arg13[%c0_72, %c1, %c0_73] : memref<8x3x128xf32, #tpu.memory_space<vmem>>, vector<8x1x128xf32>
    %162 = vector.shape_cast %161 : vector<8x1x128xf32> to vector<8x128xf32>
    %163 = vector.shape_cast %160 : vector<8x128xf32> to vector<8x1x128xf32>
    tpu.vector_store %arg13[%c0_72, %c1, %c0_73], %163 {strides = array<i32>} : memref<8x3x128xf32, #tpu.memory_space<vmem>>, vector<8x1x128xf32>,
    %cst_74 = arith.constant 0.000000e+00 : f32
    %164 = vector.broadcast %cst_74 : f32 to vector<8x128xf32>
    %165 = arith.cmpf oge, %154, %164 : vector<8x128xf32>
    %c128_i32_75 = arith.constant 128 : i32
    %166 = vector.broadcast %c128_i32_75 : i32 to vector<8x128xi32>
    %167 = arith.select %165, %3, %166 : vector<8x128xi1>, vector<8x128xi32>
    %cst_76 = arith.constant dense<2147483647> : vector<8xi32>
    %168 = vector.multi_reduction <minsi>, %167, %cst_76 [1] : vector<8x128xi32> to vector<8xi32>
    %169 = vector.shape_cast %168 : vector<8xi32> to vector<8x1xi32>
    %170 = vector.broadcast %169 : vector<8x1xi32> to vector<8x128xi32>
    %171 = arith.cmpi eq, %3, %170 : vector<8x128xi32>
    %172 = arith.extui %171 : vector<8x128xi1> to vector<8x128xi32>
    %173 = arith.sitofp %172 : vector<8x128xi32> to vector<8x128xf32>
    %cst_77 = arith.constant 1.000000e+00 : f32
    %174 = vector.broadcast %cst_77 : f32 to vector<8x128xf32>
    %175 = arith.subf %174, %173 : vector<8x128xf32>
    %176 = arith.mulf %87, %175 : vector<8x128xf32>
    %c0_78 = arith.constant 0 : index
    %c0_79 = arith.constant 0 : index
    %c0_80 = arith.constant 0 : index
    %177 = vector.load %arg1[%c0_78, %c0_79, %c0_80] : memref<8x32x128xf32, #tpu.memory_space<vmem>>, vector<8x32x128xf32>
    %178 = vector.shape_cast %173 : vector<8x128xf32> to vector<8x1x128xf32>
    %179 = vector.broadcast %178 : vector<8x1x128xf32> to vector<8x32x128xf32>
    %180 = arith.mulf %177, %179 : vector<8x32x128xf32>
    %cst_81 = arith.constant dense<0.000000e+00> : vector<8x32xf32>
    %181 = vector.multi_reduction <add>, %180, %cst_81 [2] : vector<8x32x128xf32> to vector<8x32xf32>
    %c0_82 = arith.constant 0 : index
    %c0_83 = arith.constant 0 : index
    %182 = vector.load %arg6[%c0_82, %c0_83] : memref<32x96xf32, #tpu.memory_space<vmem>>, vector<32x96xf32>
    %cst_84 = arith.constant dense<0.000000e+00> : vector<8x96xf32>
    %183 = tpu.matmul %181, %182, %cst_84 {dimension_numbers = #tpu.dot_dimension_numbers<[1], [0], [0], [1], [0, 0, 1, 1], [], []>} : vector<8x32xf32>, vector<32x96xf32>, vector<8x96xf32> -> vector<8x96xf32>
    %c0_85 = arith.constant 0 : index
    %c0_86 = arith.constant 0 : index
    %184 = vector.load %arg8[%c0_85, %c0_86] : memref<1x96xf32, #tpu.memory_space<vmem>>, vector<1x96xf32>
    %185 = vector.broadcast %184 : vector<1x96xf32> to vector<8x96xf32>
    %186 = arith.addf %183, %185 : vector<8x96xf32>
    %c0_87 = arith.constant 0 : index
    %c0_88 = arith.constant 0 : index
    %187 = vector.load %arg7[%c0_87, %c0_88] : memref<32x96xf32, #tpu.memory_space<vmem>>, vector<32x96xf32>
    %cst_89 = arith.constant dense<0.000000e+00> : vector<8x96xf32>
    %188 = tpu.matmul %128, %187, %cst_89 {dimension_numbers = #tpu.dot_dimension_numbers<[1], [0], [0], [1], [0, 0, 1, 1], [], []>} : vector<8x32xf32>, vector<32x96xf32>, vector<8x96xf32> -> vector<8x96xf32>
    %c0_90 = arith.constant 0 : index
    %c0_91 = arith.constant 0 : index
    %189 = vector.load %arg9[%c0_90, %c0_91] : memref<1x96xf32, #tpu.memory_space<vmem>>, vector<1x96xf32>
    %190 = vector.broadcast %189 : vector<1x96xf32> to vector<8x96xf32>
    %191 = arith.addf %188, %190 : vector<8x96xf32>
    %192 = vector.extract_strided_slice %186 {offsets = [0, 0], sizes = [8, 32], strides = [1, 1]} : vector<8x96xf32> to vector<8x32xf32>
    %193 = vector.extract_strided_slice %191 {offsets = [0, 0], sizes = [8, 32], strides = [1, 1]} : vector<8x96xf32> to vector<8x32xf32>
    %194 = arith.addf %192, %193 : vector<8x32xf32>
    %195 = arith.negf %194 : vector<8x32xf32>
    %196 = math.exp %195 : vector<8x32xf32>
    %cst_92 = arith.constant 1.000000e+00 : f32
    %197 = vector.broadcast %cst_92 : f32 to vector<8x32xf32>
    %198 = arith.addf %197, %196 : vector<8x32xf32>
    %199 = arith.divf %197, %198 : vector<8x32xf32>
    %200 = vector.extract_strided_slice %186 {offsets = [0, 32], sizes = [8, 32], strides = [1, 1]} : vector<8x96xf32> to vector<8x32xf32>
    %201 = vector.extract_strided_slice %191 {offsets = [0, 32], sizes = [8, 32], strides = [1, 1]} : vector<8x96xf32> to vector<8x32xf32>
    %202 = arith.addf %200, %201 : vector<8x32xf32>
    %203 = arith.negf %202 : vector<8x32xf32>
    %204 = math.exp %203 : vector<8x32xf32>
    %cst_93 = arith.constant 1.000000e+00 : f32
    %205 = vector.broadcast %cst_93 : f32 to vector<8x32xf32>
    %206 = arith.addf %205, %204 : vector<8x32xf32>
    %207 = arith.divf %205, %206 : vector<8x32xf32>
    %208 = vector.extract_strided_slice %186 {offsets = [0, 64], sizes = [8, 32], strides = [1, 1]} : vector<8x96xf32> to vector<8x32xf32>
    %209 = vector.extract_strided_slice %191 {offsets = [0, 64], sizes = [8, 32], strides = [1, 1]} : vector<8x96xf32> to vector<8x32xf32>
    %210 = arith.mulf %199, %209 : vector<8x32xf32>
    %211 = arith.addf %208, %210 : vector<8x32xf32>
    %212 = math.tanh %211 : vector<8x32xf32>
    %cst_94 = arith.constant 1.000000e+00 : f32
    %213 = vector.broadcast %cst_94 : f32 to vector<8x32xf32>
    %214 = arith.subf %213, %207 : vector<8x32xf32>
    %215 = arith.mulf %214, %212 : vector<8x32xf32>
    %216 = arith.mulf %207, %128 : vector<8x32xf32>
    %217 = arith.addf %215, %216 : vector<8x32xf32>
    %c0_95 = arith.constant 0 : index
    %c0_96 = arith.constant 0 : index
    %218 = vector.load %arg10[%c0_95, %c0_96] : memref<32x32xf32, #tpu.memory_space<vmem>>, vector<32x32xf32>
    %cst_97 = arith.constant dense<0.000000e+00> : vector<8x32xf32>
    %219 = tpu.matmul %217, %218, %cst_97 {dimension_numbers = #tpu.dot_dimension_numbers<[1], [0], [0], [1], [0, 0, 1, 1], [], []>} : vector<8x32xf32>, vector<32x32xf32>, vector<8x32xf32> -> vector<8x32xf32>
    %c0_98 = arith.constant 0 : index
    %c0_99 = arith.constant 0 : index
    %220 = vector.load %arg11[%c0_98, %c0_99] : memref<1x32xf32, #tpu.memory_space<vmem>>, vector<1x32xf32>
    %221 = vector.broadcast %220 : vector<1x32xf32> to vector<8x32xf32>
    %222 = arith.addf %219, %221 : vector<8x32xf32>
    %223 = vector.shape_cast %222 : vector<8x32xf32> to vector<8x32x1xf32>
    %c0_100 = arith.constant 0 : index
    %c0_101 = arith.constant 0 : index
    %c0_102 = arith.constant 0 : index
    %224 = vector.load %arg4[%c0_100, %c0_101, %c0_102] : memref<8x32x128xf32, #tpu.memory_space<vmem>>, vector<8x32x128xf32>
    %225 = vector.broadcast %223 : vector<8x32x1xf32> to vector<8x32x128xf32>
    %226 = arith.addf %225, %224 : vector<8x32x128xf32>
    %227 = math.tanh %226 : vector<8x32x128xf32>
    %c0_103 = arith.constant 0 : index
    %c0_104 = arith.constant 0 : index
    %228 = vector.load %arg12[%c0_103, %c0_104] : memref<32x1xf32, #tpu.memory_space<vmem>>, vector<32x1xf32>
    %229 = vector.shape_cast %228 : vector<32x1xf32> to vector<1x32x1xf32>
    %230 = vector.broadcast %229 : vector<1x32x1xf32> to vector<8x32x128xf32>
    %231 = arith.mulf %227, %230 : vector<8x32x128xf32>
    %cst_105 = arith.constant dense<0.000000e+00> : vector<8x128xf32>
    %232 = vector.multi_reduction <add>, %231, %cst_105 [1] : vector<8x32x128xf32> to vector<8x128xf32>
    %cst_106 = arith.constant 0.000000e+00 : f32
    %233 = vector.broadcast %cst_106 : f32 to vector<8x128xf32>
    %234 = arith.cmpf ogt, %176, %233 : vector<8x128xf32>
    %235 = math.tanh %232 : vector<8x128xf32>
    %cst_107 = arith.constant 1.000000e+01 : f32
    %236 = vector.broadcast %cst_107 : f32 to vector<8x128xf32>
    %237 = arith.mulf %236, %235 : vector<8x128xf32>
    %cst_108 = arith.constant -1.000000e+30 : f32
    %238 = vector.broadcast %cst_108 : f32 to vector<8x128xf32>
    %239 = arith.select %234, %237, %238 : vector<8x128xi1>, vector<8x128xf32>
    %cst_109 = arith.constant dense<0xFF800000> : vector<8xf32>
    %240 = vector.multi_reduction <maximumf>, %239, %cst_109 [1] : vector<8x128xf32> to vector<8xf32>
    %241 = vector.shape_cast %240 : vector<8xf32> to vector<8x1xf32>
    %242 = vector.broadcast %241 : vector<8x1xf32> to vector<8x128xf32>
    %243 = arith.subf %239, %242 : vector<8x128xf32>
    %244 = math.exp %243 : vector<8x128xf32>
    %cst_110 = arith.constant dense<0.000000e+00> : vector<8xf32>
    %245 = vector.multi_reduction <add>, %244, %cst_110 [1] : vector<8x128xf32> to vector<8xf32>
    %246 = vector.shape_cast %245 : vector<8xf32> to vector<8x1xf32>
    %247 = tpu.reciprocal %246 {approx = true} : vector<8x1xf32> -> vector<8x1xf32>
    %248 = vector.broadcast %247 : vector<8x1xf32> to vector<8x128xf32>
    %249 = arith.mulf %244, %248 : vector<8x128xf32>
    %c0_111 = arith.constant 0 : index
    %c2 = arith.constant 2 : index
    %c0_112 = arith.constant 0 : index
    %250 = vector.load %arg13[%c0_111, %c2, %c0_112] : memref<8x3x128xf32, #tpu.memory_space<vmem>>, vector<8x1x128xf32>
    %251 = vector.shape_cast %250 : vector<8x1x128xf32> to vector<8x128xf32>
    %252 = vector.shape_cast %249 : vector<8x128xf32> to vector<8x1x128xf32>
    tpu.vector_store %arg13[%c0_111, %c2, %c0_112], %252 {strides = array<i32>} : memref<8x3x128xf32, #tpu.memory_space<vmem>>, vector<8x1x128xf32>,
    %cst_113 = arith.constant 0.000000e+00 : f32
    %253 = vector.broadcast %cst_113 : f32 to vector<8x128xf32>
    %254 = arith.cmpf oge, %243, %253 : vector<8x128xf32>
    %c128_i32_114 = arith.constant 128 : i32
    %255 = vector.broadcast %c128_i32_114 : i32 to vector<8x128xi32>
    %256 = arith.select %254, %3, %255 : vector<8x128xi1>, vector<8x128xi32>
    %cst_115 = arith.constant dense<2147483647> : vector<8xi32>
    %257 = vector.multi_reduction <minsi>, %256, %cst_115 [1] : vector<8x128xi32> to vector<8xi32>
    %258 = vector.shape_cast %257 : vector<8xi32> to vector<8x1xi32>
    %259 = tpu.concatenate %69, %158, %247 in 1 : vector<8x1xf32>, vector<8x1xf32>, vector<8x1xf32> -> vector<8x3xf32>
    %c0_116 = arith.constant 0 : index
    %c0_117 = arith.constant 0 : index
    %260 = vector.load %arg14[%c0_116, %c0_117] : memref<8x3xf32, #tpu.memory_space<vmem>>, vector<8x3xf32>
    tpu.vector_store %arg14[%c0_116, %c0_117], %259 {strides = array<i32>} : memref<8x3xf32, #tpu.memory_space<vmem>>, vector<8x3xf32>,
    %261 = tpu.concatenate %80, %169, %258 in 1 : vector<8x1xi32>, vector<8x1xi32>, vector<8x1xi32> -> vector<8x3xi32>
    %c0_118 = arith.constant 0 : index
    %c0_119 = arith.constant 0 : index
    %262 = vector.load %arg15[%c0_118, %c0_119] : memref<8x3xi32, #tpu.memory_space<vmem>>, vector<8x3xi32>
    tpu.vector_store %arg15[%c0_118, %c0_119], %261 {strides = array<i32>} : memref<8x3xi32, #tpu.memory_space<vmem>>, vector<8x3xi32>,
    %c0_120 = arith.constant 0 : index
    %c0_121 = arith.constant 0 : index
    %263 = vector.load %arg16[%c0_120, %c0_121] : memref<8x32xf32, #tpu.memory_space<vmem>>, vector<8x32xf32>
    tpu.vector_store %arg16[%c0_120, %c0_121], %217 {strides = array<i32>} : memref<8x32xf32, #tpu.memory_space<vmem>>, vector<8x32xf32>,
    return
  }
  func.func @transform_0(%arg0: i32) -> (i32, i32, i32) {
    %c0_i32 = arith.constant 0 : i32
    %c0_i32_0 = arith.constant 0 : i32
    %c0_i32_1 = arith.constant 0 : i32
    return %arg0, %c0_i32, %c0_i32_0 : i32, i32, i32
  }
  func.func @transform_1(%arg0: i32) -> (i32, i32) {
    %c0_i32 = arith.constant 0 : i32
    %c0_i32_0 = arith.constant 0 : i32
    return %arg0, %c0_i32 : i32, i32
  }
  func.func @transform_2(%arg0: i32) -> (i32, i32) {
    %c0_i32 = arith.constant 0 : i32
    %c0_i32_0 = arith.constant 0 : i32
    return %arg0, %c0_i32 : i32, i32
  }
  func.func @transform_3(%arg0: i32) -> (i32, i32, i32) {
    %c0_i32 = arith.constant 0 : i32
    %c0_i32_0 = arith.constant 0 : i32
    %c0_i32_1 = arith.constant 0 : i32
    return %arg0, %c0_i32, %c0_i32_0 : i32, i32, i32
  }
  func.func @transform_4(%arg0: i32) -> (i32, i32) {
    %c0_i32 = arith.constant 0 : i32
    %c0_i32_0 = arith.constant 0 : i32
    return %arg0, %c0_i32 : i32, i32
  }
  func.func @transform_5(%arg0: i32) -> (i32, i32) {
    %c0_i32 = arith.constant 0 : i32
    %c0_i32_0 = arith.constant 0 : i32
    %c0_i32_1 = arith.constant 0 : i32
    return %c0_i32, %c0_i32_0 : i32, i32
  }
  func.func @transform_6(%arg0: i32) -> (i32, i32) {
    %c0_i32 = arith.constant 0 : i32
    %c0_i32_0 = arith.constant 0 : i32
    %c0_i32_1 = arith.constant 0 : i32
    return %c0_i32, %c0_i32_0 : i32, i32
  }
  func.func @transform_7(%arg0: i32) -> (i32, i32) {
    %c0_i32 = arith.constant 0 : i32
    %c0_i32_0 = arith.constant 0 : i32
    %c0_i32_1 = arith.constant 0 : i32
    return %c0_i32, %c0_i32_0 : i32, i32
  }
  func.func @transform_8(%arg0: i32) -> (i32, i32) {
    %c0_i32 = arith.constant 0 : i32
    %c0_i32_0 = arith.constant 0 : i32
    %c0_i32_1 = arith.constant 0 : i32
    return %c0_i32, %c0_i32_0 : i32, i32
  }
  func.func @transform_9(%arg0: i32) -> (i32, i32) {
    %c0_i32 = arith.constant 0 : i32
    %c0_i32_0 = arith.constant 0 : i32
    %c0_i32_1 = arith.constant 0 : i32
    return %c0_i32, %c0_i32_0 : i32, i32
  }
  func.func @transform_10(%arg0: i32) -> (i32, i32) {
    %c0_i32 = arith.constant 0 : i32
    %c0_i32_0 = arith.constant 0 : i32
    %c0_i32_1 = arith.constant 0 : i32
    return %c0_i32, %c0_i32_0 : i32, i32
  }
  func.func @transform_11(%arg0: i32) -> (i32, i32) {
    %c0_i32 = arith.constant 0 : i32
    %c0_i32_0 = arith.constant 0 : i32
    %c0_i32_1 = arith.constant 0 : i32
    return %c0_i32, %c0_i32_0 : i32, i32
  }
  func.func @transform_12(%arg0: i32) -> (i32, i32, i32) {
    %c0_i32 = arith.constant 0 : i32
    %c0_i32_0 = arith.constant 0 : i32
    %c0_i32_1 = arith.constant 0 : i32
    return %arg0, %c0_i32, %c0_i32_0 : i32, i32, i32
  }
  func.func @transform_13(%arg0: i32) -> (i32, i32) {
    %c0_i32 = arith.constant 0 : i32
    %c0_i32_0 = arith.constant 0 : i32
    return %arg0, %c0_i32 : i32, i32
  }
  func.func @transform_14(%arg0: i32) -> (i32, i32) {
    %c0_i32 = arith.constant 0 : i32
    %c0_i32_0 = arith.constant 0 : i32
    return %arg0, %c0_i32 : i32, i32
  }
  func.func @transform_15(%arg0: i32) -> (i32, i32) {
    %c0_i32 = arith.constant 0 : i32
    %c0_i32_0 = arith.constant 0 : i32
    return %arg0, %c0_i32 : i32, i32
  }
}

</mosaic_0001>

<bundles_post_ra>
// kernel: tpu_custom_call.1
= control target key start
LH: loop header
LB: loop body
LE: loop exit
PB: predicated region body
PF: predicated region fallthrough
CT: control target
= control target key end

     0   :  { %21 = vsyncpa [#allocation3], 0  ;;  %s4836_s0 = inlined_call_operand.hbm [shape: f32[8,32,128], index: 0, kind: input, shape index: {}]   ;;  %s4837_s1 = inlined_call_operand.vmem [shape: f32[8,32], index: 1, kind: input, shape index: {}]   ;;  %s4838_s2 = inlined_call_operand.hbm [shape: f32[8,32], index: 2, kind: input, shape index: {}]   ;;  %s4839_s3 = inlined_call_operand.hbm [shape: f32[8,32,128], index: 3, kind: input, shape index: {}]   ;;  %s4840_s4 = inlined_call_operand.hbm [shape: f32[8,128], index: 4, kind: input, shape index: {}]   ;;  %s4841_s5 = inlined_call_operand.vmem [shape: f32[32,96], index: 5, kind: input, shape index: {}]   ;;  %s4842_s6 = inlined_call_operand.hbm [shape: f32[32,96], index: 6, kind: input, shape index: {}]   ;;  %s4843_s7 = inlined_call_operand.vmem [shape: f32[1,96], index: 7, kind: input, shape index: {}]   ;;  %s4844_s8 = inlined_call_operand.vmem [shape: f32[1,96], index: 8, kind: input, shape index: {}]   ;;  %s4845_s9 = inlined_call_operand.hbm [shape: f32[32,32], index: 9, kind: input, shape index: {}]   ;;  %s4846_s10 = inlined_call_operand.vmem [shape: f32[1,32], index: 10, kind: input, shape index: {}]   ;;  %s4847_s11 = inlined_call_operand.vmem [shape: f32[32,1], index: 11, kind: input, shape index: {}]   ;;  %s4848_s12 = inlined_call_operand.vmem [shape: f32[8,3,128], index: 12, kind: output, shape index: {0}]   ;;  %s4849_s13 = inlined_call_operand.vmem [shape: f32[8,3], index: 13, kind: output, shape index: {1}]   ;;  %s4850_s14 = inlined_call_operand.vmem [shape: s32[8,3], index: 14, kind: output, shape index: {2}]   ;;  %s4851_s15 = inlined_call_operand.hbm [shape: f32[8,32], index: 15, kind: output, shape index: {3}]  }
   0x1   :  { %22 = vsyncpa [#allocation6], 0 }
   0x2   :  { %23 = vsyncpa [#allocation9], 0 }
   0x3   :  { %24 = vsyncpa [#allocation12], 0 }
   0x4   :  { %25 = vsyncpa [#allocation4], 0  ;;  %s3969_s18 = smov [#allocation5]   ;;  %s3970_s20 = smov [#allocation8]  }
   0x5   :  { %s46_s19 = sshll.u32 %s3969_s18, 4  ;;  %s68_s21 = sshll.u32 %s3970_s20, 4  ;;  %s47_s19 = int_to_ptr.vmem [resolvable:$true] %s46_s19  ;;  %s69_s21 = int_to_ptr.vmem [resolvable:$true] %s68_s21 }
   0x6   :  { %s3827_s22 = scalar_lea.vmem %s47_s19, 128  ;;  %p3832_p1 = scmp.lt.s32.totalorder %s47_s19, %s47_s19 }
   0x7   :  { %p3828_p0 = scmp.ne.s32.totalorder %s47_s19, %s3827_s22  ;;  %p3833_p2 = scmp.lt.s32.totalorder %s3827_s22, %s3827_s22 }
   0x9   :  { %p3834_p3 = por %p3833_p2, %p3832_p1 }
   0xb   :  { %p3835_p4 = pnand %p3834_p3, %p3828_p0 }
   0xd   :  { %3838 = shalt.err (!%p3835_p4)
}
   0xe   :  { %49 = dma.hbm_to_vmem [thread:$0]  %s4838_s2, 128, %s47_s19, [#allocation6]  }
   0xf   :  { %s3847_s25 = scalar_lea.vmem %s69_s21, 128  ;;  %p3852_p6 = scmp.lt.s32.totalorder %s69_s21, %s69_s21 }
  0x10   :  { %p3848_p5 = scmp.ne.s32.totalorder %s69_s21, %s3847_s25  ;;  %p3853_p7 = scmp.lt.s32.totalorder %s3847_s25, %s3847_s25 }
  0x12   :  { %p3854_p8 = por %p3853_p7, %p3852_p6 }
  0x14   :  { %p3855_p9 = pnand %p3854_p8, %p3848_p5 }
  0x16   :  { %3858 = shalt.err (!%p3855_p9)
}
  0x17   :  { %71 = dma.hbm_to_vmem [thread:$0]  %s4840_s4, 128, %s69_s21, [#allocation9]  }
  0x18   :  { %s3971_s28 = smov [#allocation2]  }
  0x19   :  { %s31_s29 = sshll.u32 %s3971_s28, 4  ;;  %s32_s29 = int_to_ptr.vmem [resolvable:$true] %s31_s29 }
  0x1a   :  { %s3867_s30 = scalar_lea.vmem %s32_s29, 4096  ;;  %p3872_p11 = scmp.lt.s32.totalorder %s32_s29, %s32_s29 }
  0x1b   :  { %p3868_p10 = scmp.ne.s32.totalorder %s32_s29, %s3867_s30  ;;  %p3873_p12 = scmp.lt.s32.totalorder %s3867_s30, %s3867_s30 }
  0x1d   :  { %p3874_p13 = por %p3873_p12, %p3872_p11 }
  0x1f   :  { %p3875_p0 = pnand %p3874_p13, %p3868_p10 }
  0x21   :  { %3878 = shalt.err (!%p3875_p0)
}
  0x22   :  { %s3972_s2 = smov 128   ;;  %s3973_s16 = smov 8  }
  0x23   :  { %37 = dma.hbm_to_vmem [thread:$0]  %s4836_s0, 4096, %s32_s29, [#allocation3], %s3972_s2, %s3972_s2, %s3973_s16  }
  0x24   :  { %s3974_s4 = smov [#allocation7]   ;;  %s3975_s20 = smov [#allocation10]  }
  0x25   :  { %s55_s19 = sshll.u32 %s3974_s4, 4  ;;  %s79_s21 = sshll.u32 %s3975_s20, 4  ;;  %s56_s19 = int_to_ptr.vmem [resolvable:$true] %s55_s19  ;;  %s80_s21 = int_to_ptr.vmem [resolvable:$true] %s79_s21 }
  0x26   :  { %s3887_s22 = scalar_lea.vmem %s56_s19, 4096  ;;  %p3892_p2 = scmp.lt.s32.totalorder %s56_s19, %s56_s19 }
  0x27   :  { %p3888_p1 = scmp.ne.s32.totalorder %s56_s19, %s3887_s22  ;;  %p3893_p3 = scmp.lt.s32.totalorder %s3887_s22, %s3887_s22 }
  0x29   :  { %p3894_p4 = por %p3893_p3, %p3892_p2 }
  0x2b   :  { %p3895_p5 = pnand %p3894_p4, %p3888_p1 }
  0x2d   :  { %3898 = shalt.err (!%p3895_p5)
}
  0x2e   :  { %61 = dma.hbm_to_vmem [thread:$0]  %s4839_s3, 4096, %s56_s19, [#allocation6], %s3972_s2, %s3972_s2, %s3973_s16  }
  0x2f   :  { %s3907_s0 = scalar_lea.vmem %s80_s21, 512  ;;  %p3912_p7 = scmp.lt.s32.totalorder %s80_s21, %s80_s21 }
  0x30   :  { %p3908_p6 = scmp.ne.s32.totalorder %s80_s21, %s3907_s0  ;;  %p3913_p8 = scmp.lt.s32.totalorder %s3907_s0, %s3907_s0 }
  0x32   :  { %p3914_p9 = por %p3913_p8, %p3912_p7 }
  0x34   :  { %p3915_p10 = pnand %p3914_p9, %p3908_p6 }
  0x36   :  { %3918 = shalt.err (!%p3915_p10)
}
  0x37   :  { %85 = dma.hbm_to_vmem [thread:$0]  %s4842_s6, 512, %s80_s21, [#allocation9], %s3972_s2, %s3972_s2, %s3973_s16  }
  0x38   :  { %s3976_s27 = smov [#allocation11]  }
  0x39   :  { %s95_s28 = sshll.u32 %s3976_s27, 4  ;;  %s96_s28 = int_to_ptr.vmem [resolvable:$true] %s95_s28 }
  0x3a   :  { %s3927_s29 = scalar_lea.vmem %s96_s28, 512  ;;  %p3932_p12 = scmp.lt.s32.totalorder %s96_s28, %s96_s28 }
  0x3b   :  { %p3928_p11 = scmp.ne.s32.totalorder %s96_s28, %s3927_s29  ;;  %p3933_p13 = scmp.lt.s32.totalorder %s3927_s29, %s3927_s29 }
  0x3d   :  { %p3934_p0 = por %p3933_p13, %p3932_p12 }
  0x3f   :  { %p3935_p1 = pnand %p3934_p0, %p3928_p11 }
  0x41   :  { %3938 = shalt.err (!%p3935_p1)
}
  0x42   :  { %101 = dma.hbm_to_vmem [thread:$0]  %s4845_s9, 512, %s96_s28, [#allocation12], %s3972_s2, %s3972_s2, %s3973_s16  }
  0x43   :  { %3959 = dma.done.wait [#allocation3], 4096  }
  0x44   :  { %3960 = vsyncadd [#allocation3], 4294963200 }
  0x45   :  { %3961 = dma.done.wait [#allocation6], 4224  }
  0x46   :  { %3962 = vsyncadd [#allocation6], 4294963072 }
  0x47   :  { %3963 = dma.done.wait [#allocation9], 640  }
  0x48   :  { %3964 = vsyncadd [#allocation9], 4294966656 }
  0x49   :  { %3965 = dma.done.wait [#allocation12], 512  }
  0x4a   :  { %3966 = vsyncadd [#allocation12], 4294966784  ;;  %v4852_v0 = vmov 0.0   ;;  %vm3978_vm0 = vmmov 0   ;;  %v132_v1 = vld [vmem:[%s4841_s5 + $0x18] sm:$0xff]  ;;  %v4104_v2 = vld [vmem:[#allocation10 + $0x18] sm:$0xff]  ;;  %v127_v42 = vlaneseq }
  0x4b   :  { %3430 = vmatprep.subr.mxu0 %v4852_v0  ;;  %3441 = vmatprep.subr.mxu1 %v4852_v0  ;;  %v131_v3 = vld [vmem:[%s4841_s5 + $0x10] sm:$0xff]  ;;  %v4110_v4 = vld [vmem:[#allocation10 + $0x10] sm:$0xff]  ;;  %v130_v5 = vld [vmem:[%s4841_s5 + $0x8] sm:$0xff]  ;;  %vm140_vm1 = vcmask 261120   ;;  %s3979_s23 = smov 64   ;;  %s3980_s25 = smov 96  }
  0x4c   :  { %3438 = vmatprep.mubr.msk.f32.mxu0 %vm3978_vm0, %v4852_v0  ;;  %3449 = vmatprep.mubr.msk.f32.mxu1 %vm3978_vm0, %v4852_v0  ;;  %v4117_v6 = vld [vmem:[#allocation10 + $0x8] sm:$0xff]  ;;  %v129_v7 = vld [vmem:[%s4841_s5] sm:$0xff]  ;;  %v4125_v8 = vld [vmem:[#allocation10] sm:$0xff]  ;;  %s3981_s26 = smov 32   ;;  %v3982_v39 = vmov 0   ;;  %v4177_v43 = vshrl.u32 %v127_v42, 7 }
  0x4d   :  { %3431 = vmatpush3.msra.mxu0 %v132_v1  ;;  %3442 = vmatpush3.msra.mxu1 %v4104_v2  ;;  %v124_v9 = vld [vmem:[%s4837_s1] sm:$0xff]  ;;  %v330_v28 = vld [vmem:[#allocation11 + $0x18] sm:$0xff]  ;;  %v328_v30 = vld [vmem:[#allocation11 + $0x8] sm:$0xff]  ;;  %vm814_vm2 = vcmask 1041409   ;;  %vm816_vm3 = vcmask 1042434   ;;  %vm818_vm4 = vcmask 1043459  }
  0x4e   :  { %3432 = vmatprep.subr.mxu0 %v4852_v0  ;;  %3443 = vmatprep.subr.mxu1 %v4852_v0  ;;  %v125_v10 = vld [vmem:[#allocation5] sm:$0xff]  ;;  %v327_v32 = vld [vmem:[#allocation11] sm:$0xff]  ;;  %v4183_v45 = vsub.s32 0, %v4177_v43  ;;  %v4187_v50 = vsub.s32 1, %v4177_v43  ;;  %v4191_v52 = vsub.s32 2, %v4177_v43  ;;  %v4197_v56 = vsub.s32 3, %v4177_v43 }
  0x4f   :  { %3433 = vmatpush3.msra.mxu0 %v131_v3  ;;  %3444 = vmatpush3.msra.mxu1 %v4110_v4  ;;  %v3352_v11 = vld [vmem:[%s4844_s8] ss:$0 sm:$0xff]  ;;  %v4201_v58 = vsub.s32 4, %v4177_v43  ;;  %v4205_v60 = vsub.s32 5, %v4177_v43  ;;  %v4209_v62 = vsub.s32 6, %v4177_v43  ;;  %v4213_v1 = vsub.s32 7, %v4177_v43 }
  0x50   :  { %3434 = vmatprep.subr.mxu0 %v4852_v0  ;;  %3445 = vmatprep.subr.mxu1 %v4852_v0  ;;  %v3350_v17 = vld [vmem:[%s4843_s7] ss:$0 sm:$0xff]  ;;  %v662_v3 = vld [vmem:[%s4847_s11 + $0x8] sm:$0xff]  ;;  %vm820_vm5 = vcmask 1044484   ;;  %vm822_vm6 = vcmask 1045509   ;;  %vm824_vm7 = vcmask 1046534  }
  0x51   :  { %3435 = vmatpush3.msra.mxu0 %v130_v5  ;;  %3446 = vmatpush3.msra.mxu1 %v4117_v6  ;;  %v329_v29 = vld [vmem:[#allocation11 + $0x10] sm:$0xff]  ;;  %v664_v5 = vld [vmem:[%s4847_s11 + $0x18] sm:$0xff]  ;;  %vm826_vm8 = vcmask 1047559   ;;  %vm1196_vm13 = vcmask 130112   ;;  %vm1203_vm14 = vcmask 195712   ;;  %vm1210_vm15 = vcmask 261312  }
  0x52   :  { %3436 = vmatprep.subr.mxu0 %v4852_v0  ;;  %3447 = vmatprep.subr.mxu1 %v4852_v0  ;;  %v661_v36 = vld [vmem:[%s4847_s11] sm:$0xff]  ;;  %s3984_s19 = smov [#allocation13]  }
  0x53   :  { %3437 = vmatpush3.msra.mxu0 %v129_v7  ;;  %3448 = vmatpush3.msra.mxu1 %v4125_v8  ;;  %v3355_v44 = vld [vmem:[%s4846_s10] ss:$0 sm:$0xff]  ;;  %s3332_s20 = sshll.u32 %s3984_s19, 4  ;;  %s3333_s20 = int_to_ptr.vmem [resolvable:$true] %s3332_s20 }
  0x54   :  { %3439 = vmatmul.mubr.msk.f32.vlgmr.msra.gmra.mxu0 %vm140_vm1, %v124_v9  ;;  %3450 = vmatmul.mubr.msk.f32.vlgmr.msra.gmra.mxu1 %vm140_vm1, %v125_v10  ;;  %s3939_s21 = scalar_lea.vmem %s3333_s20, 128  ;;  %p3944_p3 = scmp.lt.s32.totalorder %s3333_s20, %s3333_s20 }
  0x55   :  { %3452 = vmatprep.subr.mxu0 %v4852_v0  ;;  %3460 = vmatprep.mubr.msk.f32.mxu0 %vm3978_vm0, %v4852_v0  ;;  %p3940_p2 = scmp.ne.s32.totalorder %s3333_s20, %s3939_s21  ;;  %p3945_p4 = scmp.lt.s32.totalorder %s3939_s21, %s3939_s21 }
  0x56   :  { %3463 = vmatprep.subr.mxu1 %v4852_v0  ;;  %3471 = vmatprep.mubr.msk.f32.mxu1 %vm3978_vm0, %v4852_v0 }
  0x57   :  { %3453 = vmatpush3.msra.mxu0 %v330_v28  ;;  %3545 = vset.pattern.permute.xlu1 %v3982_v39  ;;  %p3946_p5 = por %p3945_p4, %p3944_p3 }
  0x58   :  { %3454 = vmatprep.subr.mxu0 %v4852_v0  ;;  %3546 = vset.pattern.permute.xlu0 %v3982_v39  ;;  %v567_v39 = vld [vmem:[#allocation7 + $0x10] sm:$0xff] }
  0x59   :  { %3455 = vmatpush3.msra.mxu0 %v329_v29  ;;  %v569_v29 = vld [vmem:[#allocation7 + $0x20] sm:$0xff]  ;;  %p3947_p6 = pnand %p3946_p5, %p3940_p2 }
  0x5a   :  { %3456 = vmatprep.subr.mxu0 %v4852_v0 }
  0x5b   :  { %3457 = vmatpush3.msra.mxu0 %v328_v30 }
  0x5c   :  { %3458 = vmatprep.subr.mxu0 %v4852_v0 }
  0x5d   :  { %3459 = vmatpush3.msra.mxu0 %v327_v32 }
  0x5e   :  { %3474 = vmatprep.subr.mxu0 %v4852_v0 }
 0x114   :  { %v210_v12 = vpop.f32.mrf.mxu0  ;;  %v294_v13 = vpop.f32.mrf.mxu1 }
 0x115   :  { %v295_v14 = vadd.f32 %v3352_v11, %v294_v13  ;;  %v211_v18 = vadd.f32 %v3350_v17, %v210_v12 }
 0x116   :  { %v3451_v15 = vpop.f32.mrf.mxu1  ;;  %v3440_v16 = vpop.f32.mrf.mxu0 }
 0x117   :  { %306 = vrot.lane.b32.xlu0 %v295_v14, %s3979_s23  ;;  %v298_v19 = vadd.f32 %v295_v14, %v211_v18 }
 0x119   :  { %v3354_v20 = vmul.f32 -1.442695, %v298_v19 }
 0x11b   :  { %3547 = vpow2.f32 %v3354_v20 }
 0x128   :  { %v3548_v21 = vpop.eup %3547 }
 0x129   :  { %v302_v22 = vadd.f32 1.0, %v3548_v21 }
 0x12b   :  { %3549 = vrcp.f32 %v302_v22 }
 0x138   :  { %v3550_v23 = vpop.eup %3549 }
 0x139   :  { %v316_v34 = vsub.f32 1.0, %v3550_v23 }
 0x189   :  { %v307_v24 = vpop.permute.xlu0 %306 }
 0x18a   :  { %v309_v25 = vmul.f32 %v3550_v23, %v307_v24  ;;  %v565_v24 = vld [vmem:[#allocation7] sm:$0xff] }
 0x18c   :  { %311 = vrot.lane.b32.xlu0 %v309_v25, %s3979_s23  ;;  %v570_v25 = vld [vmem:[#allocation7 + $0x28] sm:$0xff] }
 0x1fe   :  { %v312_v26 = vpop.permute.xlu0 %311 }
 0x1ff   :  { %v314_v27 = vadd.f32 %v312_v26, %v211_v18 }
 0x201   :  { %3551 = vtanh.f32 %v314_v27 }
 0x20e   :  { %v3552_v31 = vpop.eup %3551 }
 0x20f   :  { %318 = vrot.lane.b32.xlu1 %v3552_v31, %s3980_s25  ;;  %v574_v31 = vld [vmem:[#allocation7 + $0x48] sm:$0xff] }
 0x213   :  { %322 = vrot.lane.b32.xlu1 %v125_v10, %s3981_s26 }
 0x217   :  { %667 = vperm.xlu1 %3545, %v661_v36  }
 0x281   :  { %v319_v33 = vpop.permute.xlu1 %318 }
 0x282   :  { %v321_v37 = vmul.f32 %v319_v33, %v316_v34  ;;  %v573_v33 = vld [vmem:[#allocation7 + $0x40] sm:$0xff] }
 0x285   :  { %v323_v35 = vpop.permute.xlu1 %322 }
 0x286   :  { %v325_v38 = vmul.f32 %v3550_v23, %v323_v35  ;;  %v566_v23 = vld [vmem:[#allocation7 + $0x8] sm:$0xff]  ;;  %v571_v35 = vld [vmem:[#allocation7 + $0x30] sm:$0xff] }
 0x288   :  { %v4158_v40 = vadd.f32 %v325_v38, %v321_v37 }
 0x28a   :  { %339 = vrot.lane.b32.xlu0 %v4158_v40, %s3980_s25 }
 0x2fc   :  { %v340_v41 = vpop.permute.xlu0 %339 }
 0x2fd   :  { %3461 = vmatmul.mubr.msk.f32.vlgmr.msra.gmra.mxu0 %vm140_vm1, %v340_v41 }
 0x2fe   :  { %3475 = vmatpush3.msra.mxu0 %v4104_v2  ;;  %3482 = vmatprep.mubr.msk.f32.mxu0 %vm3978_vm0, %v4852_v0 }
 0x2ff   :  { %3476 = vmatprep.subr.mxu0 %v4852_v0 }
 0x300   :  { %3477 = vmatpush3.msra.mxu0 %v4110_v4  ;;  %v663_v4 = vld [vmem:[%s4847_s11 + $0x10] sm:$0xff] }
 0x301   :  { %3478 = vmatprep.subr.mxu0 %v4852_v0 }
 0x302   :  { %3479 = vmatpush3.msra.mxu0 %v4117_v6  ;;  %v4225_v6 = vpop.permute.xlu1 %667 }
 0x303   :  { %3480 = vmatprep.subr.mxu0 %v4852_v0 }
 0x304   :  { %3481 = vmatpush3.msra.mxu0 %v4125_v8 }
 0x305   :  { %3483 = vmatmul.mubr.msk.f32.vlgmr.msra.gmra.mxu0 %vm140_vm1, %v340_v41  ;;  %3496 = vmatprep.subr.mxu0 %v4852_v0 }
 0x306   :  { %3504 = vmatprep.mubr.msk.f32.mxu0 %vm3978_vm0, %v4852_v0 }
 0x3bd   :  { %v409_v46 = vpop.f32.mrf.mxu0 }
 0x3be   :  { %v410_v47 = vadd.f32 %v3355_v44, %v409_v46  ;;  %v578_v44 = vld [vmem:[#allocation7 + $0x68] sm:$0xff] }
 0x3bf   :  { %v3462_v48 = vpop.f32.mrf.mxu0 }
 0x3c0   :  { %v416_v49 = vrot.slane %v410_v47, %v4183_v45  ;;  %v435_v51 = vrot.slane %v410_v47, %v4187_v50  ;;  %v454_v55 = vrot.slane %v410_v47, %v4191_v52  ;;  %v473_v57 = vrot.slane %v410_v47, %v4197_v56 }
 0x3c1   :  { %v492_v59 = vrot.slane %v410_v47, %v4201_v58  ;;  %v511_v61 = vrot.slane %v410_v47, %v4205_v60  ;;  %v530_v63 = vrot.slane %v410_v47, %v4209_v62  ;;  %v549_v2 = vrot.slane %v410_v47, %v4213_v1  ;;  %v577_v47 = vld [vmem:[#allocation7 + $0x60] sm:$0xff] }
 0x3c2   :  { %422 = vbcast.lane.b32.xlu0 %v416_v49, 264  ;;  %418 = vbcast.lane.b32.xlu1 %v416_v49, 256 }
 0x3c5   :  { %v4193_v53 = vpop.f32.mrf.mxu0 }
 0x3c6   :  { %441 = vbcast.lane.b32.xlu0 %v435_v51, 264  ;;  %437 = vbcast.lane.b32.xlu1 %v435_v51, 256 }
 0x3c7   :  { %v3484_v54 = vpop.f32.mrf.mxu0 }
 0x3ca   :  { %460 = vbcast.lane.b32.xlu0 %v454_v55, 264  ;;  %456 = vbcast.lane.b32.xlu1 %v454_v55, 256 }
 0x3ce   :  { %445 = vbcast.lane.b32.xlu0 %v435_v51, 272  ;;  %426 = vbcast.lane.b32.xlu1 %v416_v49, 272 }
 0x3d2   :  { %479 = vbcast.lane.b32.xlu0 %v473_v57, 264  ;;  %475 = vbcast.lane.b32.xlu1 %v473_v57, 256 }
 0x3d6   :  { %494 = vbcast.lane.b32.xlu0 %v492_v59, 256  ;;  %464 = vbcast.lane.b32.xlu1 %v454_v55, 272 }
 0x3da   :  { %430 = vbcast.lane.b32.xlu0 %v416_v49, 280  ;;  %498 = vbcast.lane.b32.xlu1 %v492_v59, 264  ;;  %v581_v49 = vld [vmem:[#allocation7 + $0x80] sm:$0xff] }
 0x3de   :  { %483 = vbcast.lane.b32.xlu0 %v473_v57, 272  ;;  %449 = vbcast.lane.b32.xlu1 %v435_v51, 280 }
 0x3e2   :  { %517 = vbcast.lane.b32.xlu0 %v511_v61, 264  ;;  %513 = vbcast.lane.b32.xlu1 %v511_v61, 256 }
 0x3e6   :  { %502 = vbcast.lane.b32.xlu0 %v492_v59, 272  ;;  %468 = vbcast.lane.b32.xlu1 %v454_v55, 280 }
 0x3ea   :  { %536 = vbcast.lane.b32.xlu0 %v530_v63, 264  ;;  %532 = vbcast.lane.b32.xlu1 %v530_v63, 256 }
 0x3ee   :  { %521 = vbcast.lane.b32.xlu0 %v511_v61, 272  ;;  %487 = vbcast.lane.b32.xlu1 %v473_v57, 280  ;;  %v575_v57 = vld [vmem:[#allocation7 + $0x50] sm:$0xff] }
 0x3f2   :  { %555 = vbcast.lane.b32.xlu0 %v549_v2, 264  ;;  %551 = vbcast.lane.b32.xlu1 %v549_v2, 256 }
 0x3f6   :  { %540 = vbcast.lane.b32.xlu0 %v530_v63, 272  ;;  %506 = vbcast.lane.b32.xlu1 %v492_v59, 280 }
 0x3fa   :  { %559 = vbcast.lane.b32.xlu0 %v549_v2, 272  ;;  %525 = vbcast.lane.b32.xlu1 %v511_v61, 280  ;;  %v568_v61 = vld [vmem:[#allocation7 + $0x18] sm:$0xff] }
 0x3fe   :  { %563 = vbcast.lane.b32.xlu0 %v549_v2, 280  ;;  %544 = vbcast.lane.b32.xlu1 %v530_v63, 280  ;;  %v582_v2 = vld [vmem:[#allocation7 + $0x88] sm:$0xff] }
 0x402   :  { %672 = vperm.xlu0 %3546, %v662_v3   ;;  %677 = vperm.xlu1 %3545, %v663_v4   ;;  %v579_v4 = vld [vmem:[#allocation7 + $0x70] sm:$0xff] }
 0x406   :  { %682 = vperm.xlu1 %3545, %v664_v5  }
 0x434   :  { %v423_v7 = vpop.permute.xlu0 %422  ;;  %v419_v8 = vpop.permute.xlu1 %418 }
 0x435   :  { %v598_v28 = vadd.f32 %v566_v23, %v423_v7  ;;  %v597_v30 = vadd.f32 %v565_v24, %v419_v8  ;;  %v589_v23 = vld [vmem:[#allocation7 + $0xc0] sm:$0xff] }
 0x437   :  { %3553 = vtanh.f32 %v598_v28 }
 0x438   :  { %v442_v9 = vpop.permute.xlu0 %441  ;;  %v438_v10 = vpop.permute.xlu1 %437  ;;  %3555 = vtanh.f32 %v597_v30 }
 0x439   :  { %v602_v32 = vadd.f32 %v570_v25, %v442_v9  ;;  %v601_v34 = vadd.f32 %v569_v29, %v438_v10  ;;  %v572_v9 = vld [vmem:[#allocation7 + $0x38] sm:$0xff]  ;;  %v593_v25 = vld [vmem:[#allocation7 + $0xe0] sm:$0xff] }
 0x43b   :  { %3557 = vtanh.f32 %v602_v32 }
 0x43c   :  { %v461_v11 = vpop.permute.xlu0 %460  ;;  %v457_v12 = vpop.permute.xlu1 %456  ;;  %3559 = vtanh.f32 %v601_v34 }
 0x43d   :  { %v606_v38 = vadd.f32 %v574_v31, %v461_v11  ;;  %v605_v41 = vadd.f32 %v573_v33, %v457_v12  ;;  %v586_v11 = vld [vmem:[#allocation7 + $0xa8] sm:$0xff] }
 0x43f   :  { %3561 = vtanh.f32 %v606_v38  ;;  %v580_v38 = vld [vmem:[#allocation7 + $0x78] sm:$0xff] }
 0x440   :  { %v446_v13 = vpop.permute.xlu0 %445  ;;  %v427_v14 = vpop.permute.xlu1 %426  ;;  %3563 = vtanh.f32 %v605_v41  ;;  %v591_v41 = vld [vmem:[#allocation7 + $0xd0] sm:$0xff] }
 0x441   :  { %v603_v46 = vadd.f32 %v571_v35, %v446_v13  ;;  %v599_v48 = vadd.f32 %v567_v39, %v427_v14  ;;  %v585_v13 = vld [vmem:[#allocation7 + $0xa0] sm:$0xff] }
 0x443   :  { %3565 = vtanh.f32 %v603_v46 }
 0x444   :  { %v480_v15 = vpop.permute.xlu0 %479  ;;  %v476_v16 = vpop.permute.xlu1 %475  ;;  %3567 = vtanh.f32 %v599_v48 }
 0x445   :  { %v610_v55 = vadd.f32 %v578_v44, %v480_v15  ;;  %v609_v59 = vadd.f32 %v577_v47, %v476_v16  ;;  %v583_v15 = vld [vmem:[#allocation7 + $0x90] sm:$0xff]  ;;  %v4231_v24 = vpop.eup %3553  ;;  %v584_v47 = vld [vmem:[#allocation7 + $0x98] sm:$0xff] }
 0x446   :  { %v4233_v28 = vpop.eup %3555 }
 0x447   :  { %3569 = vtanh.f32 %v610_v55 }
 0x448   :  { %v495_v17 = vpop.permute.xlu0 %494  ;;  %v465_v18 = vpop.permute.xlu1 %464  ;;  %3571 = vtanh.f32 %v609_v59 }
 0x449   :  { %v613_v63 = vadd.f32 %v581_v49, %v495_v17  ;;  %v607_v3 = vadd.f32 %v575_v57, %v465_v18  ;;  %v4235_v29 = vpop.eup %3557  ;;  %v595_v57 = vld [vmem:[#allocation7 + $0xf0] sm:$0xff] }
 0x44a   :  { %v3560_v33 = vpop.eup %3559 }
 0x44b   :  { %3573 = vtanh.f32 %v613_v63 }
 0x44c   :  { %v431_v19 = vpop.permute.xlu0 %430  ;;  %v499_v20 = vpop.permute.xlu1 %498  ;;  %3575 = vtanh.f32 %v607_v3 }
 0x44d   :  { %v600_v8 = vadd.f32 %v568_v61, %v431_v19  ;;  %v614_v10 = vadd.f32 %v582_v2, %v499_v20  ;;  %v4237_v35 = vpop.eup %3561 }
 0x44e   :  { %v3564_v39 = vpop.eup %3563 }
 0x44f   :  { %3577 = vtanh.f32 %v600_v8  ;;  %v596_v8 = vld [vmem:[#allocation7 + $0xf8] sm:$0xff] }
 0x450   :  { %v484_v21 = vpop.permute.xlu0 %483  ;;  %v450_v22 = vpop.permute.xlu1 %449  ;;  %3579 = vtanh.f32 %v614_v10 }
 0x451   :  { %v611_v12 = vadd.f32 %v579_v4, %v484_v21  ;;  %v604_v14 = vadd.f32 %v572_v9, %v450_v22  ;;  %v576_v21 = vld [vmem:[#allocation7 + $0x58] sm:$0xff]  ;;  %v590_v22 = vld [vmem:[#allocation7 + $0xc8] sm:$0xff]  ;;  %v4240_v44 = vpop.eup %3565 }
 0x453   :  { %3581 = vtanh.f32 %v611_v12 }
 0x454   :  { %v518_v26 = vpop.permute.xlu0 %517  ;;  %v514_v27 = vpop.permute.xlu1 %513  ;;  %3583 = vtanh.f32 %v604_v14 }
 0x455   :  { %v618_v18 = vadd.f32 %v586_v11, %v518_v26  ;;  %v617_v19 = vadd.f32 %v585_v13, %v514_v27  ;;  %v587_v26 = vld [vmem:[#allocation7 + $0xb0] sm:$0xff]  ;;  %v594_v11 = vld [vmem:[#allocation7 + $0xe8] sm:$0xff] }
 0x457   :  { %3585 = vtanh.f32 %v618_v18 }
 0x458   :  { %v503_v36 = vpop.permute.xlu0 %502  ;;  %v4227_v37 = vpop.permute.xlu1 %468  ;;  %3587 = vtanh.f32 %v617_v19 }
 0x459   :  { %v615_v20 = vadd.f32 %v583_v15, %v503_v36  ;;  %v608_v27 = vadd.f32 %v576_v21, %v4227_v37  ;;  %v588_v37 = vld [vmem:[#allocation7 + $0xb8] sm:$0xff] }
 0x45b   :  { %3589 = vtanh.f32 %v615_v20 }
 0x45c   :  { %v537_v51 = vpop.permute.xlu0 %536  ;;  %v533_v54 = vpop.permute.xlu1 %532 }
 0x45d   :  { %v621_v30 = vadd.f32 %v589_v23, %v533_v54  ;;  %v622_v36 = vadd.f32 %v590_v22, %v537_v51  ;;  %v3568_v54 = vpop.eup %3567  ;;  %v592_v51 = vld [vmem:[#allocation7 + $0xd8] sm:$0xff] }
 0x45e   :  { %v3570_v59 = vpop.eup %3569 }
 0x45f   :  { %3591 = vtanh.f32 %v621_v30  ;;  %v3572_v63 = vpop.eup %3571 }
 0x460   :  { %v522_v5 = vpop.permute.xlu0 %521  ;;  %v488_v7 = vpop.permute.xlu1 %487 }
 0x461   :  { %v619_v46 = vadd.f32 %v587_v26, %v522_v5  ;;  %v612_v55 = vadd.f32 %v580_v38, %v488_v7  ;;  %v3574_v3 = vpop.eup %3573  ;;  %v689_v26 = vmul.f32 %v3560_v33, %v4225_v6 }
 0x462   :  { %v3576_v10 = vpop.eup %3575  ;;  %v701_v38 = vmul.f32 %v3574_v3, %v4225_v6 }
 0x463   :  { %v3578_v12 = vpop.eup %3577 }
 0x464   :  { %v4229_v16 = vpop.permute.xlu0 %555  ;;  %v552_v17 = vpop.permute.xlu1 %551 }
 0x465   :  { %v625_v34 = vadd.f32 %v593_v25, %v552_v17  ;;  %v3580_v14 = vpop.eup %3579  ;;  %v626_v18 = vadd.f32 %v594_v11, %v4229_v16  ;;  %v693_v16 = vmul.f32 %v3564_v39, %v4225_v6 }
 0x466   :  { %v3582_v17 = vpop.eup %3581 }
 0x467   :  { %3593 = vtanh.f32 %v625_v34  ;;  %v3584_v23 = vpop.eup %3583  ;;  %v697_v34 = vmul.f32 %v3572_v63, %v4225_v6 }
 0x468   :  { %v541_v31 = vpop.permute.xlu0 %540  ;;  %v507_v32 = vpop.permute.xlu1 %506  ;;  %3595 = vtanh.f32 %v608_v27 }
 0x469   :  { %v623_v61 = vadd.f32 %v591_v41, %v541_v31  ;;  %3597 = vtanh.f32 %v622_v36  ;;  %v616_v2 = vadd.f32 %v584_v47, %v507_v32  ;;  %v3586_v19 = vpop.eup %3585  ;;  %v685_v32 = vmul.f32 %v4233_v28, %v4225_v6 }
 0x46a   :  { %3599 = vtanh.f32 %v619_v46  ;;  %v3588_v25 = vpop.eup %3587 }
 0x46b   :  { %3601 = vtanh.f32 %v612_v55  ;;  %v3590_v20 = vpop.eup %3589  ;;  %v705_v36 = vmul.f32 %v3588_v25, %v4225_v6 }
 0x46c   :  { %v560_v48 = vpop.permute.xlu0 %559  ;;  %v526_v49 = vpop.permute.xlu1 %525  ;;  %3603 = vtanh.f32 %v623_v61 }
 0x46d   :  { %v627_v4 = vadd.f32 %v595_v57, %v560_v48  ;;  %v620_v7 = vadd.f32 %v588_v37, %v526_v49  ;;  %3605 = vtanh.f32 %v616_v2  ;;  %v3592_v21 = vpop.eup %3591 }
 0x46e   :  { %v709_v41 = vmul.f32 %v3592_v21, %v4225_v6 }
 0x46f   :  { %3607 = vtanh.f32 %v627_v4 }
 0x470   :  { %v564_v5 = vpop.permute.xlu0 %563  ;;  %v545_v9 = vpop.permute.xlu1 %544  ;;  %3609 = vtanh.f32 %v620_v7 }
 0x471   :  { %v624_v13 = vadd.f32 %v592_v51, %v545_v9  ;;  %v628_v15 = vadd.f32 %v596_v8, %v564_v5 }
 0x473   :  { %3611 = vtanh.f32 %v624_v13 }
 0x474   :  { %3613 = vtanh.f32 %v628_v15  ;;  %v3594_v22 = vpop.eup %3593 }
 0x475   :  { %3615 = vtanh.f32 %v626_v18  ;;  %v3596_v30 = vpop.eup %3595  ;;  %v713_v46 = vmul.f32 %v3594_v22, %v4225_v6 }
 0x476   :  { %v3598_v31 = vpop.eup %3597 }
 0x477   :  { %v3600_v27 = vpop.eup %3599 }
 0x478   :  { %v3602_v49 = vpop.eup %3601 }
 0x479   :  { %v3604_v57 = vpop.eup %3603 }
 0x47a   :  { %v3606_v51 = vpop.eup %3605 }
 0x47c   :  { %v3608_v5 = vpop.eup %3607 }
 0x47d   :  { %v673_v47 = vpop.permute.xlu0 %672  ;;  %v678_v48 = vpop.permute.xlu1 %677 }
 0x47e   :  { %v686_v28 = vmul.f32 %v4231_v24, %v673_v47  ;;  %v690_v33 = vmul.f32 %v4235_v29, %v673_v47  ;;  %v694_v39 = vmul.f32 %v4237_v35, %v673_v47  ;;  %v698_v55 = vmul.f32 %v3570_v59, %v673_v47  ;;  %v3610_v13 = vpop.eup %3609 }
 0x47f   :  { %v702_v61 = vmul.f32 %v3580_v14, %v673_v47  ;;  %v706_v37 = vmul.f32 %v3586_v19, %v673_v47  ;;  %v687_v63 = vmul.f32 %v3568_v54, %v678_v48  ;;  %v691_v2 = vmul.f32 %v4240_v44, %v678_v48 }
 0x480   :  { %v717_v3 = vadd.f32 %v686_v28, %v685_v32  ;;  %v726_v4 = vadd.f32 %v690_v33, %v689_v26  ;;  %v735_v6 = vadd.f32 %v694_v39, %v693_v16  ;;  %v744_v8 = vadd.f32 %v698_v55, %v697_v34  ;;  %v3612_v18 = vpop.eup %3611 }
 0x481   :  { %v753_v9 = vadd.f32 %v702_v61, %v701_v38  ;;  %v695_v11 = vmul.f32 %v3576_v10, %v678_v48  ;;  %v699_v24 = vmul.f32 %v3582_v17, %v678_v48  ;;  %v703_v7 = vmul.f32 %v3590_v20, %v678_v48  ;;  %v683_v29 = vpop.permute.xlu1 %682  ;;  %v3614_v21 = vpop.eup %3613 }
 0x482   :  { %v718_v35 = vadd.f32 %v717_v3, %v687_v63  ;;  %v727_v59 = vadd.f32 %v726_v4, %v691_v2  ;;  %v688_v15 = vmul.f32 %v3578_v12, %v683_v29  ;;  %v692_v14 = vmul.f32 %v3584_v23, %v683_v29  ;;  %v3616_v34 = vpop.eup %3615 }
 0x483   :  { %v736_v54 = vadd.f32 %v735_v6, %v695_v11  ;;  %v745_v19 = vadd.f32 %v744_v8, %v699_v24  ;;  %v696_v44 = vmul.f32 %v3596_v30, %v683_v29  ;;  %v700_v25 = vmul.f32 %v3602_v49, %v683_v29 }
 0x484   :  { %v704_v22 = vmul.f32 %v3606_v51, %v683_v29  ;;  %v719_v32 = vadd.f32 %v718_v35, %v688_v15  ;;  %v728_v26 = vadd.f32 %v727_v59, %v692_v14  ;;  %v707_v16 = vmul.f32 %v3600_v27, %v678_v48 }
 0x485   :  { %v737_v10 = vadd.f32 %v736_v54, %v696_v44  ;;  %v708_v17 = vmul.f32 %v3610_v13, %v683_v29  ;;  %v710_v20 = vmul.f32 %v3598_v31, %v673_v47  ;;  %v711_v38 = vmul.f32 %v3604_v57, %v678_v48 }
 0x486   :  { %v720_v28 = vrot.slane %v719_v32, 4  ;;  %v729_v33 = vrot.slane %v728_v26, 4  ;;  %v712_v39 = vmul.f32 %v3612_v18, %v683_v29  ;;  %v714_v12 = vmul.f32 %v3616_v34, %v673_v47 }
 0x487   :  { %v715_v23 = vmul.f32 %v3608_v5, %v678_v48  ;;  %v716_v55 = vmul.f32 %v3614_v21, %v683_v29  ;;  %v738_v61 = vrot.slane %v737_v10, 4  ;;  %v746_v63 = vadd.f32 %v745_v19, %v700_v25 }
 0x488   :  { %v721_v30 = vadd.f32 %v720_v28, %v719_v32  ;;  %v730_v49 = vadd.f32 %v729_v33, %v728_v26  ;;  %v754_v2 = vadd.f32 %v753_v9, %v703_v7  ;;  %v762_v51 = vadd.f32 %v706_v37, %v705_v36 }
 0x489   :  { %v739_v3 = vadd.f32 %v738_v61, %v737_v10  ;;  %v747_v4 = vrot.slane %v746_v63, 4  ;;  %v771_v27 = vadd.f32 %v710_v20, %v709_v41  ;;  %v780_v6 = vadd.f32 %v714_v12, %v713_v46 }
 0x48a   :  { %v722_v8 = vrot.slane %v721_v30, 2  ;;  %v731_v11 = vrot.slane %v730_v49, 2  ;;  %v755_v31 = vadd.f32 %v754_v2, %v704_v22  ;;  %v763_v57 = vadd.f32 %v762_v51, %v707_v16 }
 0x48b   :  { %v740_v24 = vrot.slane %v739_v3, 2  ;;  %v748_v13 = vadd.f32 %v747_v4, %v746_v63  ;;  %v772_v35 = vadd.f32 %v771_v27, %v711_v38  ;;  %v781_v47 = vadd.f32 %v780_v6, %v715_v23 }
 0x48c   :  { %v723_v48 = vadd.f32 %v722_v8, %v721_v30  ;;  %v732_v5 = vadd.f32 %v731_v11, %v730_v49  ;;  %v756_v29 = vrot.slane %v755_v31, 4  ;;  %v764_v59 = vadd.f32 %v763_v57, %v708_v17 }
 0x48d   :  { %v741_v15 = vadd.f32 %v740_v24, %v739_v3  ;;  %v749_v14 = vrot.slane %v748_v13, 2  ;;  %v773_v9 = vadd.f32 %v772_v35, %v712_v39  ;;  %v782_v36 = vadd.f32 %v781_v47, %v716_v55 }
 0x48e   :  { %v724_v37 = vrot.slane %v723_v48, 1  ;;  %v733_v7 = vrot.slane %v732_v5, 1  ;;  %v757_v41 = vadd.f32 %v756_v29, %v755_v31  ;;  %v765_v46 = vrot.slane %v764_v59, 4 }
 0x48f   :  { %v742_v18 = vrot.slane %v741_v15, 1  ;;  %v750_v54 = vadd.f32 %v749_v14, %v748_v13  ;;  %v774_v19 = vrot.slane %v773_v9, 4  ;;  %v783_v44 = vrot.slane %v782_v36, 4 }
 0x490   :  { %v725_v25 = vadd.f32 %v724_v37, %v723_v48  ;;  %v734_v21 = vadd.f32 %v733_v7, %v732_v5  ;;  %v758_v22 = vrot.slane %v757_v41, 2  ;;  %v766_v32 = vadd.f32 %v765_v46, %v764_v59  ;;  %v126_v59 = vld [vmem:[#allocation8] sm:$0xff] }
 0x491   :  { %v743_v26 = vadd.f32 %v742_v18, %v741_v15  ;;  %v751_v16 = vrot.slane %v750_v54, 1  ;;  %v775_v34 = vadd.f32 %v774_v19, %v773_v9  ;;  %v784_v10 = vadd.f32 %v783_v44, %v782_v36 }
 0x492   :  { %v759_v17 = vadd.f32 %v758_v22, %v757_v41  ;;  %v767_v20 = vrot.slane %v766_v32, 2  ;;  %3617 = vtanh.f32 %v725_v25  ;;  %vm789_vm9 = vcmp.gt.f32.partialorder %v126_v59, 0.0  ;;  %v935_v59 = vld [vmem:[#allocation2 + $0x48] sm:$0xff] }
 0x493   :  { %v752_v38 = vadd.f32 %v751_v16, %v750_v54  ;;  %v776_v28 = vrot.slane %v775_v34, 2  ;;  %v785_v33 = vrot.slane %v784_v10, 2  ;;  %3619 = vtanh.f32 %v734_v21 }
 0x494   :  { %v760_v39 = vrot.slane %v759_v17, 1  ;;  %v768_v12 = vadd.f32 %v767_v20, %v766_v32  ;;  %3621 = vtanh.f32 %v743_v26  ;;  %v4264_v44 = vand.u32 127, %v127_v42 }
 0x495   :  { %v777_v23 = vadd.f32 %v776_v28, %v775_v34  ;;  %v786_v55 = vadd.f32 %v785_v33, %v784_v10  ;;  %3623 = vtanh.f32 %v752_v38 }
 0x496   :  { %v761_v61 = vadd.f32 %v760_v39, %v759_v17  ;;  %v769_v63 = vrot.slane %v768_v12, 1  ;;  %v3983_v17 = vmov 1966171168  }
 0x497   :  { %v778_v30 = vrot.slane %v777_v23, 1  ;;  %v787_v49 = vrot.slane %v786_v55, 1  ;;  %v842_v20 = vunpack.c.l.s4 %v3983_v17 }
 0x498   :  { %v770_v2 = vadd.f32 %v769_v63, %v768_v12  ;;  %3625 = vtanh.f32 %v761_v61 }
 0x499   :  { %v779_v51 = vadd.f32 %v778_v30, %v777_v23  ;;  %v788_v3 = vadd.f32 %v787_v49, %v786_v55  ;;  %v843_v42 = vunpack.c.0.s8 %v842_v20  ;;  %v927_v49 = vld [vmem:[#allocation2 + $0x8] sm:$0xff]  ;;  %v944_v20 = vld [vmem:[#allocation2 + $0x90] sm:$0xff] }
 0x49a   :  { %3627 = vtanh.f32 %v770_v2  ;;  %v926_v2 = vld [vmem:[#allocation2] sm:$0xff] }
 0x49b   :  { %3629 = vtanh.f32 %v779_v51  ;;  %v4271_v12 = vsub.s32 %v843_v42, %v4177_v43 }
 0x49c   :  { %3631 = vtanh.f32 %v788_v3 }
 0x49f   :  { %v3618_v4 = vpop.eup %3617 }
 0x4a0   :  { %v3620_v27 = vpop.eup %3619  ;;  %v798_v6 = vmul.f32 10.0, %v3618_v4 }
 0x4a1   :  { %v3622_v8 = vpop.eup %3621  ;;  %v799_v11 = vmul.f32 10.0, %v3620_v27 }
 0x4a2   :  { %v3624_v31 = vpop.eup %3623  ;;  %v800_v57 = vmul.f32 10.0, %v3622_v8  ;;  %v928_v8 = vld [vmem:[#allocation2 + $0x10] sm:$0xff] }
 0x4a3   :  { %v801_v24 = vmul.f32 10.0, %v3624_v31  ;;  %v815_v13 = vsel %vm814_vm2, %v799_v11, %v798_v6  ;;  %v931_v11 = vld [vmem:[#allocation2 + $0x28] sm:$0xff] }
 0x4a4   :  { %v817_v35 = vsel %vm816_vm3, %v800_v57, %v815_v13  ;;  %v929_v13 = vld [vmem:[#allocation2 + $0x18] sm:$0xff] }
 0x4a5   :  { %v3626_v47 = vpop.eup %3625  ;;  %v819_v48 = vsel %vm818_vm4, %v801_v24, %v817_v35  ;;  %v932_v35 = vld [vmem:[#allocation2 + $0x30] sm:$0xff] }
 0x4a6   :  { %v802_v5 = vmul.f32 10.0, %v3626_v47 }
 0x4a7   :  { %v3628_v29 = vpop.eup %3627 }
 0x4a8   :  { %v3630_v15 = vpop.eup %3629  ;;  %v803_v14 = vmul.f32 10.0, %v3628_v29  ;;  %v821_v9 = vsel %vm820_vm5, %v802_v5, %v819_v48 }
 0x4a9   :  { %v3632_v36 = vpop.eup %3631  ;;  %v804_v37 = vmul.f32 10.0, %v3630_v15  ;;  %v930_v15 = vld [vmem:[#allocation2 + $0x20] sm:$0xff] }
 0x4aa   :  { %v805_v7 = vmul.f32 10.0, %v3632_v36  ;;  %v823_v41 = vsel %vm822_vm6, %v803_v14, %v821_v9 }
 0x4ab   :  { %v825_v46 = vsel %vm824_vm7, %v804_v37, %v823_v41  ;;  %v933_v37 = vld [vmem:[#allocation2 + $0x38] sm:$0xff] }
 0x4ac   :  { %v827_v18 = vsel %vm826_vm8, %v805_v7, %v825_v46  ;;  %v934_v7 = vld [vmem:[#allocation2 + $0x40] sm:$0xff] }
 0x4ad   :  { %v829_v54 = vsel %vm789_vm9, %v827_v18, -1e+30 }
 0x4ae   :  { %830 = vmax.xlane.f32.xlu0 %v829_v54 }
 0x537   :  { %v831_v19 = vpop.xlane.xlu0 %830 }
 0x538   :  { %v4266_v25 = vsub.f32 %v829_v54, %v831_v19  ;;  %v937_v54 = vld [vmem:[#allocation2 + $0x58] sm:$0xff]  ;;  %v936_v19 = vld [vmem:[#allocation2 + $0x50] sm:$0xff] }
 0x53a   :  { %vm905_vm10 = vcmp.ge.f32.partialorder %v4266_v25, 0.0 }
 0x53b   :  { %v906_v21 = vsel %vm905_vm10, %v4264_v44, 128 }
 0x53c   :  { %v908_v22 = vshra.s32 %v906_v21, 16  ;;  %v907_v26 = vand.u32 65535, %v906_v21 }
 0x53e   :  { %v910_v32 = vcvt.s32.f32 %v908_v22  ;;  %v909_v34 = vcvt.s32.f32 %v907_v26  ;;  %v943_v26 = vld [vmem:[#allocation2 + $0x88] sm:$0xff] }
 0x540   :  { %911 = vmin.xlane.f32.xlu1 %v910_v32 }
 0x5c9   :  { %v912_v16 = vpop.xlane.xlu1 %911 }
 0x5ca   :  { %vm913_vm11 = vcmp.eq.f32.partialorder %v910_v32, %v912_v16  ;;  %v918_v38 = vcvt.f32.s32 %v912_v16  ;;  %v942_v16 = vld [vmem:[#allocation2 + $0x80] sm:$0xff] }
 0x5cb   :  { %v914_v10 = vsel %vm913_vm11, %v909_v34, inf }
 0x5cc   :  { %915 = vmin.xlane.f32.xlu0 %v914_v10  ;;  %v919_v33 = vshll.u32 %v918_v38, 16  ;;  %v945_v38 = vld [vmem:[#allocation2 + $0x98] sm:$0xff] }
 0x655   :  { %v916_v28 = vpop.xlane.xlu0 %915 }
 0x656   :  { %v917_v39 = vcvt.f32.s32 %v916_v28 }
 0x658   :  { %v4273_v23 = vadd.s32 %v919_v33, %v917_v39 }
 0x65a   :  { %4855 = vst [vmem:[#allocation19_spill] sm:$0xff] %v4273_v23  ;;  %vm921_vm12 = vcmp.eq.s32.totalorder %v4264_v44, %v4273_v23 }
 0x65b   :  { %v4278_v55 = vsel %vm921_vm12, 1.0, %v4852_v0 }
 0x65c   :  { %v966_v61 = vrot.slane %v4278_v55, %v4271_v12  ;;  %v959_v47 = vcombine.high %v4278_v55, %v4278_v55 }
 0x65e   :  { %v974_v63 = vcombine.high %v966_v61, %v966_v61  ;;  %v982_v30 = vrot.slane %v966_v61, %v4271_v12  ;;  %v973_v14 = vrot.slane %v959_v47, %v4271_v12  ;;  %v939_v61 = vld [vmem:[#allocation2 + $0x68] sm:$0xff]  ;;  %v950_v47 = vld [vmem:[#allocation2 + $0xc0] sm:$0xff] }
 0x660   :  { %v1011_v51 = vrot.slane %v982_v30, %v4183_v45  ;;  %v996_v3 = vrot.slane %v974_v63, %v4271_v12  ;;  %v1004_v24 = vcombine.high %v982_v30, %v982_v30  ;;  %v989_v18 = vrot.slane %v973_v14, %v4271_v12  ;;  %v938_v63 = vld [vmem:[#allocation2 + $0x60] sm:$0xff] }
 0x661   :  { %v975_v42 = vcombine.high %v973_v14, %v973_v14 }
 0x662   :  { %v1049_v4 = vmul.f32 %v1011_v51, %v927_v49  ;;  %v1048_v27 = vmul.f32 %v1011_v51, %v926_v2  ;;  %v1015_v6 = vrot.slane %v996_v3, %v4183_v45  ;;  %v1050_v31 = vmul.f32 %v1011_v51, %v928_v8 }
 0x663   :  { %v1051_v48 = vmul.f32 %v1011_v51, %v929_v13  ;;  %v1019_v29 = vrot.slane %v1004_v24, %v4183_v45  ;;  %v1027_v32 = vrot.slane %v989_v18, %v4183_v45  ;;  %v1006_v17 = vcombine.high %v996_v3, %v996_v3  ;;  %v940_v51 = vld [vmem:[#allocation2 + $0x70] sm:$0xff] }
 0x664   :  { %1082 = vadd.xlane.f32.xlu1 %v1049_v4  ;;  %1080 = vadd.xlane.f32.xlu0 %v1048_v27  ;;  %v1053_v57 = vmul.f32 %v1015_v6, %v931_v11  ;;  %v1054_v5 = vmul.f32 %v1015_v6, %v932_v35  ;;  %v1052_v36 = vmul.f32 %v1015_v6, %v930_v15  ;;  %v941_v4 = vld [vmem:[#allocation2 + $0x78] sm:$0xff]  ;;  %v947_v11 = vld [vmem:[#allocation2 + $0xa8] sm:$0xff]  ;;  %v948_v35 = vld [vmem:[#allocation2 + $0xb0] sm:$0xff] }
 0x665   :  { %v1057_v9 = vmul.f32 %v1019_v29, %v935_v59  ;;  %v1055_v41 = vmul.f32 %v1015_v6, %v933_v37  ;;  %v1056_v46 = vmul.f32 %v1019_v29, %v934_v7  ;;  %v1059_v21 = vmul.f32 %v1019_v29, %v937_v54  ;;  %v949_v59 = vld [vmem:[#allocation2 + $0xb8] sm:$0xff]  ;;  %v954_v54 = vld [vmem:[#allocation2 + $0xe0] sm:$0xff] }
 0x666   :  { %v1058_v22 = vmul.f32 %v1019_v29, %v936_v19  ;;  %v1065_v34 = vmul.f32 %v1027_v32, %v943_v26  ;;  %v1064_v10 = vmul.f32 %v1027_v32, %v942_v16  ;;  %v1066_v28 = vmul.f32 %v1027_v32, %v944_v20  ;;  %v951_v29 = vld [vmem:[#allocation2 + $0xc8] sm:$0xff]  ;;  %v953_v37 = vld [vmem:[#allocation2 + $0xd8] sm:$0xff]  ;;  %v1144_v20 = vld [vmem:[%s4841_s5] sm:$0xff] }
 0x667   :  { %v1067_v33 = vmul.f32 %v1027_v32, %v945_v38  ;;  %v1023_v39 = vrot.slane %v1006_v17, %v4183_v45  ;;  %v1003_v2 = vrot.slane %v975_v42, %v4271_v12  ;;  %v1005_v8 = vcombine.high %v989_v18, %v989_v18  ;;  %v955_v18 = vld [vmem:[#allocation2 + $0xe8] sm:$0xff]  ;;  %v957_v32 = vld [vmem:[#allocation2 + $0xf8] sm:$0xff]  ;;  %v3817_v38 = vld [vmem:[%s4844_s8] ss:$0 sm:$0xff] }
 0x668   :  { %1084 = vadd.xlane.f32.xlu0 %v1050_v31  ;;  %1090 = vadd.xlane.f32.xlu1 %v1053_v57  ;;  %v946_v31 = vld [vmem:[#allocation2 + $0xa0] sm:$0xff]  ;;  %v1145_v17 = vld [vmem:[%s4841_s5 + $0x8] sm:$0xff]  ;;  %v4317_v42 = vadd.f32 %v3817_v38, %v4193_v53 }
 0x669   :  { %v1061_v30 = vmul.f32 %v1023_v39, %v939_v61  ;;  %v1060_v49 = vmul.f32 %v1023_v39, %v938_v63  ;;  %v1062_v3 = vmul.f32 %v1023_v39, %v940_v51  ;;  %v1063_v27 = vmul.f32 %v1023_v39, %v941_v4 }
 0x66a   :  { %v1031_v6 = vrot.slane %v1003_v2, %v4183_v45  ;;  %v1035_v13 = vrot.slane %v1005_v8, %v4183_v45 }
 0x66c   :  { %1086 = vadd.xlane.f32.xlu0 %v1051_v48  ;;  %1092 = vadd.xlane.f32.xlu1 %v1054_v5  ;;  %v1069_v57 = vmul.f32 %v1031_v6, %v947_v11  ;;  %v1068_v24 = vmul.f32 %v1031_v6, %v946_v31  ;;  %v1070_v48 = vmul.f32 %v1031_v6, %v948_v35  ;;  %v1191_v35 = vadd.s32 4294967288, %v4264_v44 }
 0x66d   :  { %v1072_v5 = vmul.f32 %v1035_v13, %v950_v47  ;;  %v1073_v15 = vmul.f32 %v1035_v13, %v951_v29  ;;  %v1071_v14 = vmul.f32 %v1031_v6, %v949_v59  ;;  %v1198_v47 = vadd.s32 4294967280, %v4264_v44 }
 0x66e   :  { %v4339_v29 = vsub.s32 %v4264_v44, %v4177_v43  ;;  %v1205_v59 = vadd.s32 4294967272, %v4264_v44 }
 0x670   :  { %1098 = vadd.xlane.f32.xlu1 %v1057_v9  ;;  %1088 = vadd.xlane.f32.xlu0 %v1052_v36  ;;  %v1007_v9 = vcombine.high %v1003_v2, %v1003_v2  ;;  %v952_v36 = vld [vmem:[#allocation2 + $0xd0] sm:$0xff] }
 0x671   :  { %v1074_v7 = vmul.f32 %v1035_v13, %v952_v36 }
 0x674   :  { %1094 = vadd.xlane.f32.xlu1 %v1055_v41  ;;  %1096 = vadd.xlane.f32.xlu0 %v1056_v46  ;;  %v1075_v41 = vmul.f32 %v1035_v13, %v953_v37  ;;  %v1039_v46 = vrot.slane %v1007_v9, %v4183_v45 }
 0x676   :  { %v1077_v19 = vmul.f32 %v1039_v46, %v955_v18  ;;  %v1079_v16 = vmul.f32 %v1039_v46, %v957_v32 }
 0x678   :  { %1102 = vadd.xlane.f32.xlu1 %v1059_v21  ;;  %1100 = vadd.xlane.f32.xlu0 %v1058_v22  ;;  %v1076_v21 = vmul.f32 %v1039_v46, %v954_v54  ;;  %v956_v22 = vld [vmem:[#allocation2 + $0xf0] sm:$0xff] }
 0x679   :  { %v1078_v26 = vmul.f32 %v1039_v46, %v956_v22 }
 0x67c   :  { %1114 = vadd.xlane.f32.xlu0 %v1065_v34  ;;  %1112 = vadd.xlane.f32.xlu1 %v1064_v10  ;;  %v1147_v34 = vld [vmem:[%s4841_s5 + $0x18] sm:$0xff]  ;;  %v1146_v10 = vld [vmem:[%s4841_s5 + $0x10] sm:$0xff] }
 0x67d   :  { %3464 = vmatpush3.msra.mxu1 %v1147_v34 }
 0x67e   :  { %3465 = vmatprep.subr.mxu1 %v4852_v0 }
 0x67f   :  { %3466 = vmatpush3.msra.mxu1 %v1146_v10 }
 0x680   :  { %1116 = vadd.xlane.f32.xlu0 %v1066_v28  ;;  %1118 = vadd.xlane.f32.xlu1 %v1067_v33 }
 0x681   :  { %3467 = vmatprep.subr.mxu1 %v4852_v0 }
 0x682   :  { %3468 = vmatpush3.msra.mxu1 %v1145_v17 }
 0x683   :  { %3469 = vmatprep.subr.mxu1 %v4852_v0 }
 0x684   :  { %1106 = vadd.xlane.f32.xlu0 %v1061_v30  ;;  %1104 = vadd.xlane.f32.xlu1 %v1060_v49 }
 0x685   :  { %3470 = vmatpush3.msra.mxu1 %v1144_v20 }
 0x686   :  { %3485 = vmatprep.subr.mxu1 %v4852_v0 }
 0x688   :  { %1108 = vadd.xlane.f32.xlu0 %v1062_v3  ;;  %1110 = vadd.xlane.f32.xlu1 %v1063_v27 }
 0x68c   :  { %1122 = vadd.xlane.f32.xlu0 %v1069_v57  ;;  %1120 = vadd.xlane.f32.xlu1 %v1068_v24 }
 0x690   :  { %1124 = vadd.xlane.f32.xlu0 %v1070_v48  ;;  %1128 = vadd.xlane.f32.xlu1 %v1072_v5 }
 0x694   :  { %1130 = vadd.xlane.f32.xlu0 %v1073_v15  ;;  %1126 = vadd.xlane.f32.xlu1 %v1071_v14  ;;  %v4343_v15 = vsub.s32 %v1191_v35, %v4177_v43  ;;  %v4346_v14 = vsub.s32 %v1198_v47, %v4177_v43 }
 0x698   :  { %1132 = vadd.xlane.f32.xlu0 %v1074_v7  ;;  %1134 = vadd.xlane.f32.xlu1 %v1075_v41  ;;  %v4353_v41 = vsub.s32 %v1205_v59, %v4177_v43 }
 0x69c   :  { %1138 = vadd.xlane.f32.xlu0 %v1077_v19  ;;  %1136 = vadd.xlane.f32.xlu1 %v1076_v21 }
 0x6a0   :  { %1140 = vadd.xlane.f32.xlu0 %v1078_v26  ;;  %1142 = vadd.xlane.f32.xlu1 %v1079_v16 }
 0x6b6   :  { %1513 = vrot.lane.b32.xlu0 %v4317_v42, %s3979_s23 }
 0x6ed   :  { %v1083_v28 = vpop.xlane.xlu1 %1082  ;;  %v1081_v33 = vpop.xlane.xlu0 %1080 }
 0x6ee   :  { %v1195_v18 = vrot.slane %v1083_v28, %v4343_v15  ;;  %v1190_v54 = vrot.slane %v1081_v33, %v4339_v29 }
 0x6f0   :  { %v1197_v33 = vsel %vm1196_vm13, %v1195_v18, %v1190_v54 }
 0x6f1   :  { %v1085_v39 = vpop.xlane.xlu0 %1084  ;;  %v1091_v61 = vpop.xlane.xlu1 %1090 }
 0x6f2   :  { %v1219_v7 = vrot.slane %v1091_v61, %v4343_v15  ;;  %v1202_v21 = vrot.slane %v1085_v39, %v4346_v14 }
 0x6f5   :  { %v4321_v63 = vpop.xlane.xlu0 %1086  ;;  %v1093_v30 = vpop.xlane.xlu1 %1092 }
 0x6f6   :  { %v1224_v43 = vrot.slane %v1093_v30, %v4346_v14  ;;  %v1209_v39 = vrot.slane %v4321_v63, %v4353_v41 }
 0x6f9   :  { %v1099_v49 = vpop.xlane.xlu1 %1098  ;;  %v1089_v2 = vpop.xlane.xlu0 %1088 }
 0x6fa   :  { %v1215_v9 = vrot.slane %v1089_v2, %v4339_v29  ;;  %v1238_v22 = vrot.slane %v1099_v49, %v4343_v15  ;;  %v1204_v49 = vsel %vm1203_vm14, %v1202_v21, %v1197_v33 }
 0x6fc   :  { %v1220_v32 = vsel %vm1196_vm13, %v1219_v7, %v1215_v9 }
 0x6fd   :  { %v1095_v51 = vpop.xlane.xlu1 %1094  ;;  %v1097_v4 = vpop.xlane.xlu0 %1096  ;;  %v1225_v61 = vsel %vm1203_vm14, %v1224_v43, %v1220_v32 }
 0x6fe   :  { %v1234_v46 = vrot.slane %v1097_v4, %v4339_v29  ;;  %v1229_v26 = vrot.slane %v1095_v51, %v4353_v41 }
 0x700   :  { %v1239_v20 = vsel %vm1196_vm13, %v1238_v22, %v1234_v46  ;;  %v1230_v2 = vsel %vm1210_vm15, %v1229_v26, %v1225_v61 }
 0x701   :  { %v1103_v3 = vpop.xlane.xlu1 %1102  ;;  %v1101_v27 = vpop.xlane.xlu0 %1100 }
 0x702   :  { %v1243_v19 = vrot.slane %v1101_v27, %v4346_v14  ;;  %v1248_v38 = vrot.slane %v1103_v3, %v4353_v41 }
 0x704   :  { %v1244_v30 = vsel %vm1203_vm14, %v1243_v19, %v1239_v20 }
 0x705   :  { %v4323_v6 = vpop.xlane.xlu0 %1114  ;;  %v4325_v53 = vpop.xlane.xlu1 %1112 }
 0x706   :  { %v1276_v51 = vrot.slane %v4323_v6, %v4343_v15  ;;  %v1272_v4 = vrot.slane %v4325_v53, %v4339_v29  ;;  %v1211_v6 = vsel %vm1210_vm15, %v1209_v39, %v1204_v49 }
 0x707   :  { %v1345_v9 = vsel %vm814_vm2, %v1230_v2, %v1211_v6 }
 0x708   :  { %v1277_v46 = vsel %vm1196_vm13, %v1276_v51, %v1272_v4 }
 0x709   :  { %v4327_v8 = vpop.xlane.xlu0 %1116  ;;  %v4329_v11 = vpop.xlane.xlu1 %1118 }
 0x70a   :  { %v1286_v22 = vrot.slane %v4329_v11, %v4353_v41 }
 0x70d   :  { %v1107_v31 = vpop.xlane.xlu0 %1106  ;;  %v1105_v57 = vpop.xlane.xlu1 %1104 }
 0x70e   :  { %v1257_v16 = vrot.slane %v1107_v31, %v4343_v15  ;;  %v1253_v34 = vrot.slane %v1105_v57, %v4339_v29  ;;  %v1249_v57 = vsel %vm1210_vm15, %v1248_v38, %v1244_v30 }
 0x70f   :  { %v1346_v18 = vsel %vm816_vm3, %v1249_v57, %v1345_v9 }
 0x710   :  { %v1258_v3 = vsel %vm1196_vm13, %v1257_v16, %v1253_v34 }
 0x711   :  { %v1109_v24 = vpop.xlane.xlu0 %1108  ;;  %v1111_v13 = vpop.xlane.xlu1 %1110 }
 0x712   :  { %v1262_v28 = vrot.slane %v1109_v24, %v4346_v14  ;;  %v1267_v27 = vrot.slane %v1111_v13, %v4353_v41  ;;  %v1281_v24 = vrot.slane %v4327_v8, %v4346_v14 }
 0x714   :  { %v1263_v35 = vsel %vm1203_vm14, %v1262_v28, %v1258_v3 }
 0x715   :  { %v4333_v48 = vpop.xlane.xlu0 %1122  ;;  %v4335_v5 = vpop.xlane.xlu1 %1120  ;;  %v1268_v54 = vsel %vm1210_vm15, %v1267_v27, %v1263_v35  ;;  %v3362_v27 = vld [vmem:[%s4843_s7] ss:$0 sm:$0xff] }
 0x716   :  { %v1295_v53 = vrot.slane %v4333_v48, %v4343_v15  ;;  %v1291_v59 = vrot.slane %v4335_v5, %v4339_v29  ;;  %v1282_v5 = vsel %vm1203_vm14, %v1281_v24, %v1277_v46  ;;  %v1347_v34 = vsel %vm818_vm4, %v1268_v54, %v1346_v18  ;;  %v1534_v46 = vld [vmem:[#allocation11 + $0x18] sm:$0xff]  ;;  %v1533_v18 = vld [vmem:[#allocation11 + $0x10] sm:$0xff]  ;;  %v1532_v54 = vld [vmem:[#allocation11 + $0x8] sm:$0xff] }
 0x717   :  { %v1287_v38 = vsel %vm1210_vm15, %v1286_v22, %v1282_v5 }
 0x718   :  { %v1348_v61 = vsel %vm820_vm5, %v1287_v38, %v1347_v34 }
 0x719   :  { %v4349_v36 = vpop.xlane.xlu0 %1124  ;;  %v1129_v37 = vpop.xlane.xlu1 %1128 }
 0x71a   :  { %v1300_v7 = vrot.slane %v4349_v36, %v4346_v14  ;;  %v1310_v8 = vrot.slane %v1129_v37, %v4339_v29  ;;  %v1296_v37 = vsel %vm1196_vm13, %v1295_v53, %v1291_v59 }
 0x71d   :  { %v1131_v10 = vpop.xlane.xlu0 %1130  ;;  %v1127_v17 = vpop.xlane.xlu1 %1126 }
 0x71e   :  { %v1314_v47 = vrot.slane %v1131_v10, %v4343_v15  ;;  %v1305_v48 = vrot.slane %v1127_v17, %v4353_v41  ;;  %v1301_v10 = vsel %vm1203_vm14, %v1300_v7, %v1296_v37 }
 0x720   :  { %v1315_v32 = vsel %vm1196_vm13, %v1314_v47, %v1310_v8  ;;  %v1306_v17 = vsel %vm1210_vm15, %v1305_v48, %v1301_v10  ;;  %v1531_v48 = vld [vmem:[#allocation11] sm:$0xff] }
 0x721   :  { %v1133_v31 = vpop.xlane.xlu0 %1132  ;;  %v1135_v63 = vpop.xlane.xlu1 %1134  ;;  %v1349_v49 = vsel %vm822_vm6, %v1306_v17, %v1348_v61 }
 0x722   :  { %v1319_v13 = vrot.slane %v1133_v31, %v4346_v14  ;;  %v1324_v36 = vrot.slane %v1135_v63, %v4353_v41 }
 0x724   :  { %v1320_v26 = vsel %vm1203_vm14, %v1319_v13, %v1315_v32 }
 0x725   :  { %v1139_v19 = vpop.xlane.xlu0 %1138  ;;  %v1137_v21 = vpop.xlane.xlu1 %1136  ;;  %v1325_v28 = vsel %vm1210_vm15, %v1324_v36, %v1320_v26  ;;  %v2618_v36 = vld [vmem:[#allocation10 + $0x18] sm:$0xff]  ;;  %v2617_v26 = vld [vmem:[#allocation10 + $0x10] sm:$0xff] }
 0x726   :  { %v1333_v43 = vrot.slane %v1139_v19, %v4343_v15  ;;  %v1329_v16 = vrot.slane %v1137_v21, %v4339_v29  ;;  %v1350_v4 = vsel %vm824_vm7, %v1325_v28, %v1349_v49 }
 0x728   :  { %v1334_v30 = vsel %vm1196_vm13, %v1333_v43, %v1329_v16  ;;  %v2616_v43 = vld [vmem:[#allocation10 + $0x8] sm:$0xff]  ;;  %v3367_v16 = vld [vmem:[%s4846_s10] ss:$0 sm:$0xff] }
 0x729   :  { %v1141_v20 = vpop.xlane.xlu0 %1140  ;;  %v1143_v11 = vpop.xlane.xlu1 %1142 }
 0x72a   :  { %v1338_v33 = vrot.slane %v1141_v20, %v4346_v14  ;;  %v1343_v39 = vrot.slane %v1143_v11, %v4353_v41 }
 0x72c   :  { %v1339_v2 = vsel %vm1203_vm14, %v1338_v33, %v1334_v30 }
 0x72d   :  { %v1344_v51 = vsel %vm1210_vm15, %v1343_v39, %v1339_v2  ;;  %v1514_v59 = vpop.permute.xlu0 %1513 }
 0x72e   :  { %v1351_v3 = vsel %vm826_vm8, %v1344_v51, %v1350_v4  ;;  %v1866_v51 = vld [vmem:[%s4847_s11 + $0x8] sm:$0xff]  ;;  %v1867_v4 = vld [vmem:[%s4847_s11 + $0x10] sm:$0xff] }
 0x72f   :  { %3472 = vmatmul.mubr.msk.f32.vlgmr.msra.gmra.mxu1 %vm140_vm1, %v1351_v3  ;;  %v1868_v3 = vld [vmem:[%s4847_s11 + $0x18] sm:$0xff] }
 0x730   :  { %3493 = vmatprep.mubr.msk.f32.mxu1 %vm3978_vm0, %v4852_v0  ;;  %3486 = vmatpush3.msra.mxu1 %v1534_v46 }
 0x731   :  { %3487 = vmatprep.subr.mxu1 %v4852_v0 }
 0x732   :  { %3488 = vmatpush3.msra.mxu1 %v1533_v18 }
 0x733   :  { %3489 = vmatprep.subr.mxu1 %v4852_v0 }
 0x734   :  { %3490 = vmatpush3.msra.mxu1 %v1532_v54  ;;  %v1770_v54 = vld [vmem:[#allocation7 + $0x8] sm:$0xff] }
 0x735   :  { %3491 = vmatprep.subr.mxu1 %v4852_v0 }
 0x736   :  { %3492 = vmatpush3.msra.mxu1 %v1531_v48  ;;  %v1769_v48 = vld [vmem:[#allocation7] sm:$0xff] }
 0x737   :  { %3507 = vmatprep.subr.mxu1 %v4852_v0 }
 0x7ef   :  { %v1420_v31 = vpop.f32.mrf.mxu1 }
 0x7f0   :  { %v1421_v63 = vadd.f32 %v3362_v27, %v1420_v31 }
 0x7f1   :  { %v3473_v57 = vpop.f32.mrf.mxu1 }
 0x7f2   :  { %v1505_v24 = vadd.f32 %v4317_v42, %v1421_v63  ;;  %v1865_v42 = vld [vmem:[%s4847_s11] sm:$0xff] }
 0x7f4   :  { %v3366_v35 = vmul.f32 -1.442695, %v1505_v24 }
 0x7f6   :  { %3633 = vpow2.f32 %v3366_v35 }
 0x803   :  { %v3634_v47 = vpop.eup %3633 }
 0x804   :  { %v1509_v6 = vadd.f32 1.0, %v3634_v47 }
 0x806   :  { %3635 = vrcp.f32 %v1509_v6 }
 0x813   :  { %v3636_v53 = vpop.eup %3635 }
 0x814   :  { %v1516_v13 = vmul.f32 %v3636_v53, %v1514_v59  ;;  %v1523_v19 = vsub.f32 1.0, %v3636_v53  ;;  %v1529_v5 = vmul.f32 %v3636_v53, %v4158_v40  ;;  %v2615_v40 = vld [vmem:[#allocation10] sm:$0xff] }
 0x816   :  { %1518 = vrot.lane.b32.xlu1 %v1516_v13, %s3979_s23 }
 0x888   :  { %v1519_v9 = vpop.permute.xlu1 %1518 }
 0x889   :  { %v1521_v7 = vadd.f32 %v1519_v9, %v1421_v63 }
 0x88b   :  { %3637 = vtanh.f32 %v1521_v7 }
 0x898   :  { %v3638_v8 = vpop.eup %3637 }
 0x899   :  { %1525 = vrot.lane.b32.xlu1 %v3638_v8, %s3980_s25 }
 0x89d   :  { %1871 = vperm.xlu1 %3545, %v1865_v42  }
 0x90b   :  { %v1526_v21 = vpop.permute.xlu1 %1525 }
 0x90c   :  { %v1528_v22 = vmul.f32 %v1526_v21, %v1523_v19  ;;  %v1774_v19 = vld [vmem:[#allocation7 + $0x28] sm:$0xff] }
 0x90e   :  { %v4441_v32 = vadd.f32 %v1529_v5, %v1528_v22 }
 0x910   :  { %1543 = vrot.lane.b32.xlu0 %v4441_v32, %s3980_s25 }
 0x918   :  { %v4474_v27 = vpop.permute.xlu1 %1871 }
 0x982   :  { %v1544_v37 = vpop.permute.xlu0 %1543 }
 0x983   :  { %3494 = vmatmul.mubr.msk.f32.vlgmr.msra.gmra.mxu1 %vm140_vm1, %v1544_v37 }
 0x984   :  { %3508 = vmatpush3.msra.mxu1 %v2618_v36  ;;  %3515 = vmatprep.mubr.msk.f32.mxu1 %vm3978_vm0, %v4852_v0  ;;  %v1773_v36 = vld [vmem:[#allocation7 + $0x20] sm:$0xff] }
 0x985   :  { %3509 = vmatprep.subr.mxu1 %v4852_v0 }
 0x986   :  { %3510 = vmatpush3.msra.mxu1 %v2617_v26  ;;  %v1778_v26 = vld [vmem:[#allocation7 + $0x48] sm:$0xff] }
 0x987   :  { %3511 = vmatprep.subr.mxu1 %v4852_v0 }
 0x988   :  { %3512 = vmatpush3.msra.mxu1 %v2616_v43 }
 0x989   :  { %3513 = vmatprep.subr.mxu1 %v4852_v0 }
 0x98a   :  { %3514 = vmatpush3.msra.mxu1 %v2615_v40  ;;  %v1777_v40 = vld [vmem:[#allocation7 + $0x40] sm:$0xff] }
 0x98b   :  { %3516 = vmatmul.mubr.msk.f32.vlgmr.msra.gmra.mxu1 %vm140_vm1, %v1544_v37 }
 0xa43   :  { %v1613_v34 = vpop.f32.mrf.mxu1 }
 0xa44   :  { %v1614_v10 = vadd.f32 %v3367_v16, %v1613_v34  ;;  %v1775_v34 = vld [vmem:[#allocation7 + $0x30] sm:$0xff] }
 0xa45   :  { %v3495_v17 = vpop.f32.mrf.mxu1 }
 0xa46   :  { %v1620_v20 = vrot.slane %v1614_v10, %v4183_v45  ;;  %v1639_v11 = vrot.slane %v1614_v10, %v4187_v50  ;;  %v1658_v33 = vrot.slane %v1614_v10, %v4191_v52  ;;  %v1677_v39 = vrot.slane %v1614_v10, %v4197_v56 }
 0xa47   :  { %v1696_v61 = vrot.slane %v1614_v10, %v4201_v58  ;;  %v1715_v30 = vrot.slane %v1614_v10, %v4205_v60  ;;  %v1734_v49 = vrot.slane %v1614_v10, %v4209_v62  ;;  %v1753_v2 = vrot.slane %v1614_v10, %v4213_v1 }
 0xa48   :  { %1626 = vbcast.lane.b32.xlu0 %v1620_v20, 264  ;;  %1622 = vbcast.lane.b32.xlu1 %v1620_v20, 256 }
 0xa4b   :  { %v4457_v38 = vpop.f32.mrf.mxu1 }
 0xa4c   :  { %1645 = vbcast.lane.b32.xlu0 %v1639_v11, 264  ;;  %1641 = vbcast.lane.b32.xlu1 %v1639_v11, 256 }
 0xa4d   :  { %v3517_v28 = vpop.f32.mrf.mxu1 }
 0xa50   :  { %1664 = vbcast.lane.b32.xlu0 %v1658_v33, 264  ;;  %1660 = vbcast.lane.b32.xlu1 %v1658_v33, 256 }
 0xa54   :  { %1649 = vbcast.lane.b32.xlu0 %v1639_v11, 272  ;;  %1630 = vbcast.lane.b32.xlu1 %v1620_v20, 272 }
 0xa58   :  { %1683 = vbcast.lane.b32.xlu0 %v1677_v39, 264  ;;  %1679 = vbcast.lane.b32.xlu1 %v1677_v39, 256 }
 0xa5c   :  { %1698 = vbcast.lane.b32.xlu0 %v1696_v61, 256  ;;  %1668 = vbcast.lane.b32.xlu1 %v1658_v33, 272 }
 0xa60   :  { %1634 = vbcast.lane.b32.xlu0 %v1620_v20, 280  ;;  %1702 = vbcast.lane.b32.xlu1 %v1696_v61, 264 }
 0xa64   :  { %1687 = vbcast.lane.b32.xlu0 %v1677_v39, 272  ;;  %1653 = vbcast.lane.b32.xlu1 %v1639_v11, 280  ;;  %v1771_v11 = vld [vmem:[#allocation7 + $0x10] sm:$0xff] }
 0xa68   :  { %1721 = vbcast.lane.b32.xlu0 %v1715_v30, 264  ;;  %1717 = vbcast.lane.b32.xlu1 %v1715_v30, 256 }
 0xa6c   :  { %1706 = vbcast.lane.b32.xlu0 %v1696_v61, 272  ;;  %1672 = vbcast.lane.b32.xlu1 %v1658_v33, 280  ;;  %v1782_v33 = vld [vmem:[#allocation7 + $0x68] sm:$0xff] }
 0xa70   :  { %1740 = vbcast.lane.b32.xlu0 %v1734_v49, 264  ;;  %1736 = vbcast.lane.b32.xlu1 %v1734_v49, 256 }
 0xa74   :  { %1725 = vbcast.lane.b32.xlu0 %v1715_v30, 272  ;;  %1691 = vbcast.lane.b32.xlu1 %v1677_v39, 280 }
 0xa78   :  { %1759 = vbcast.lane.b32.xlu0 %v1753_v2, 264  ;;  %1755 = vbcast.lane.b32.xlu1 %v1753_v2, 256 }
 0xa7c   :  { %1744 = vbcast.lane.b32.xlu0 %v1734_v49, 272  ;;  %1710 = vbcast.lane.b32.xlu1 %v1696_v61, 280  ;;  %v1781_v61 = vld [vmem:[#allocation7 + $0x60] sm:$0xff] }
 0xa80   :  { %1763 = vbcast.lane.b32.xlu0 %v1753_v2, 272  ;;  %1729 = vbcast.lane.b32.xlu1 %v1715_v30, 280 }
 0xa84   :  { %1767 = vbcast.lane.b32.xlu0 %v1753_v2, 280  ;;  %1748 = vbcast.lane.b32.xlu1 %v1734_v49, 280  ;;  %v1785_v49 = vld [vmem:[#allocation7 + $0x80] sm:$0xff] }
 0xa88   :  { %1876 = vperm.xlu0 %3546, %v1866_v51   ;;  %1881 = vperm.xlu1 %3545, %v1867_v4  }
 0xa8c   :  { %1886 = vperm.xlu0 %3546, %v1868_v3   ;;  %v1779_v3 = vld [vmem:[#allocation7 + $0x50] sm:$0xff] }
 0xaba   :  { %v1627_v31 = vpop.permute.xlu0 %1626  ;;  %v1623_v63 = vpop.permute.xlu1 %1622 }
 0xabb   :  { %v1802_v22 = vadd.f32 %v1770_v54, %v1627_v31  ;;  %v1801_v37 = vadd.f32 %v1769_v48, %v1623_v63  ;;  %v1772_v63 = vld [vmem:[#allocation7 + $0x18] sm:$0xff] }
 0xabd   :  { %3639 = vtanh.f32 %v1802_v22  ;;  %v1790_v22 = vld [vmem:[#allocation7 + $0xa8] sm:$0xff] }
 0xabe   :  { %v1646_v57 = vpop.permute.xlu0 %1645  ;;  %v1642_v24 = vpop.permute.xlu1 %1641  ;;  %3641 = vtanh.f32 %v1801_v37  ;;  %v1787_v37 = vld [vmem:[#allocation7 + $0x90] sm:$0xff] }
 0xabf   :  { %v1806_v43 = vadd.f32 %v1774_v19, %v1646_v57  ;;  %v1805_v16 = vadd.f32 %v1773_v36, %v1642_v24  ;;  %v1786_v24 = vld [vmem:[#allocation7 + $0x88] sm:$0xff]  ;;  %v1789_v36 = vld [vmem:[#allocation7 + $0xa0] sm:$0xff] }
 0xac1   :  { %3643 = vtanh.f32 %v1806_v43 }
 0xac2   :  { %v1665_v35 = vpop.permute.xlu0 %1664  ;;  %v1661_v47 = vpop.permute.xlu1 %1660  ;;  %3645 = vtanh.f32 %v1805_v16 }
 0xac3   :  { %v1810_v20 = vadd.f32 %v1778_v26, %v1665_v35  ;;  %v1809_v28 = vadd.f32 %v1777_v40, %v1661_v47  ;;  %v1783_v47 = vld [vmem:[#allocation7 + $0x70] sm:$0xff] }
 0xac5   :  { %3647 = vtanh.f32 %v1810_v20  ;;  %v1780_v20 = vld [vmem:[#allocation7 + $0x58] sm:$0xff] }
 0xac6   :  { %v1650_v6 = vpop.permute.xlu0 %1649  ;;  %v1631_v53 = vpop.permute.xlu1 %1630  ;;  %3649 = vtanh.f32 %v1809_v28 }
 0xac7   :  { %v1807_v39 = vadd.f32 %v1775_v34, %v1650_v6  ;;  %v1803_v30 = vadd.f32 %v1771_v11, %v1631_v53  ;;  %v1776_v53 = vld [vmem:[#allocation7 + $0x38] sm:$0xff] }
 0xac9   :  { %3651 = vtanh.f32 %v1807_v39 }
 0xaca   :  { %v1684_v59 = vpop.permute.xlu0 %1683  ;;  %v1680_v13 = vpop.permute.xlu1 %1679  ;;  %3653 = vtanh.f32 %v1803_v30 }
 0xacb   :  { %v1814_v4 = vadd.f32 %v1782_v33, %v1684_v59  ;;  %v1813_v31 = vadd.f32 %v1781_v61, %v1680_v13  ;;  %v4478_v40 = vpop.eup %3639 }
 0xacc   :  { %v4480_v34 = vpop.eup %3641 }
 0xacd   :  { %3655 = vtanh.f32 %v1814_v4 }
 0xace   :  { %v1699_v9 = vpop.permute.xlu0 %1698  ;;  %v1669_v7 = vpop.permute.xlu1 %1668  ;;  %3657 = vtanh.f32 %v1813_v31 }
 0xacf   :  { %v1817_v57 = vadd.f32 %v1785_v49, %v1699_v9  ;;  %v1811_v35 = vadd.f32 %v1779_v3, %v1669_v7  ;;  %v1793_v7 = vld [vmem:[#allocation7 + $0xc0] sm:$0xff]  ;;  %v1798_v49 = vld [vmem:[#allocation7 + $0xe8] sm:$0xff]  ;;  %v1784_v3 = vld [vmem:[#allocation7 + $0x78] sm:$0xff] }
 0xad1   :  { %3659 = vtanh.f32 %v1817_v57 }
 0xad2   :  { %v1635_v8 = vpop.permute.xlu0 %1634  ;;  %v1703_v46 = vpop.permute.xlu1 %1702  ;;  %3661 = vtanh.f32 %v1811_v35 }
 0xad3   :  { %v1804_v48 = vadd.f32 %v1772_v63, %v1635_v8  ;;  %v1818_v19 = vadd.f32 %v1786_v24, %v1703_v46  ;;  %v1797_v8 = vld [vmem:[#allocation7 + $0xe0] sm:$0xff]  ;;  %v1799_v63 = vld [vmem:[#allocation7 + $0xf0] sm:$0xff] }
 0xad5   :  { %3663 = vtanh.f32 %v1804_v48  ;;  %v1795_v48 = vld [vmem:[#allocation7 + $0xd0] sm:$0xff] }
 0xad6   :  { %v1688_v18 = vpop.permute.xlu0 %1687  ;;  %v1654_v42 = vpop.permute.xlu1 %1653  ;;  %3665 = vtanh.f32 %v1818_v19  ;;  %v1788_v19 = vld [vmem:[#allocation7 + $0x98] sm:$0xff] }
 0xad7   :  { %v1815_v59 = vadd.f32 %v1783_v47, %v1688_v18  ;;  %v1808_v13 = vadd.f32 %v1776_v53, %v1654_v42  ;;  %v4482_v18 = vpop.eup %3643  ;;  %v1794_v42 = vld [vmem:[#allocation7 + $0xc8] sm:$0xff] }
 0xad8   :  { %v3646_v39 = vpop.eup %3645 }
 0xad9   :  { %3667 = vtanh.f32 %v1815_v59  ;;  %v4484_v30 = vpop.eup %3647  ;;  %v1796_v59 = vld [vmem:[#allocation7 + $0xd8] sm:$0xff] }
 0xada   :  { %v1722_v21 = vpop.permute.xlu0 %1721  ;;  %v1718_v5 = vpop.permute.xlu1 %1717  ;;  %3669 = vtanh.f32 %v1808_v13 }
 0xadb   :  { %v1822_v43 = vadd.f32 %v1790_v22, %v1722_v21  ;;  %v1821_v16 = vadd.f32 %v1789_v36, %v1718_v5  ;;  %v1791_v21 = vld [vmem:[#allocation7 + $0xb0] sm:$0xff]  ;;  %v3650_v4 = vpop.eup %3649 }
 0xadc   :  { %v4487_v31 = vpop.eup %3651 }
 0xadd   :  { %3671 = vtanh.f32 %v1822_v43  ;;  %v4489_v35 = vpop.eup %3653 }
 0xade   :  { %v1707_v10 = vpop.permute.xlu0 %1706  ;;  %v4476_v17 = vpop.permute.xlu1 %1672  ;;  %3673 = vtanh.f32 %v1821_v16 }
 0xadf   :  { %v1819_v46 = vadd.f32 %v1787_v37, %v1707_v10  ;;  %v1812_v5 = vadd.f32 %v1780_v20, %v4476_v17  ;;  %v3656_v53 = vpop.eup %3655 }
 0xae0   :  { %v3658_v22 = vpop.eup %3657 }
 0xae1   :  { %3675 = vtanh.f32 %v1819_v46  ;;  %v3660_v36 = vpop.eup %3659 }
 0xae2   :  { %v1741_v2 = vpop.permute.xlu0 %1740  ;;  %v1737_v51 = vpop.permute.xlu1 %1736 }
 0xae3   :  { %v1825_v11 = vadd.f32 %v1793_v7, %v1737_v51  ;;  %v1826_v10 = vadd.f32 %v1794_v42, %v1741_v2  ;;  %v3662_v43 = vpop.eup %3661 }
 0xae4   :  { %v4491_v16 = vpop.eup %3663 }
 0xae5   :  { %3677 = vtanh.f32 %v1825_v11 }
 0xae6   :  { %v1726_v54 = vpop.permute.xlu0 %1725  ;;  %v1692_v6 = vpop.permute.xlu1 %1691 }
 0xae7   :  { %v1823_v51 = vadd.f32 %v1791_v21, %v1726_v54  ;;  %v1816_v17 = vadd.f32 %v1784_v3, %v1692_v6  ;;  %v1800_v54 = vld [vmem:[#allocation7 + $0xf8] sm:$0xff]  ;;  %v3666_v6 = vpop.eup %3665  ;;  %v1889_v3 = vmul.f32 %v4480_v34, %v4474_v27 }
 0xae8   :  { %v3668_v20 = vpop.eup %3667 }
 0xae9   :  { %v3670_v11 = vpop.eup %3669 }
 0xaea   :  { %v1760_v26 = vpop.permute.xlu0 %1759  ;;  %v1756_v9 = vpop.permute.xlu1 %1755 }
 0xaeb   :  { %v1829_v61 = vadd.f32 %v1797_v8, %v1756_v9  ;;  %v1830_v47 = vadd.f32 %v1798_v49, %v1760_v26  ;;  %v1792_v26 = vld [vmem:[#allocation7 + $0xb8] sm:$0xff] }
 0xaed   :  { %3679 = vtanh.f32 %v1829_v61 }
 0xaee   :  { %v1745_v28 = vpop.permute.xlu0 %1744  ;;  %v1711_v33 = vpop.permute.xlu1 %1710  ;;  %3681 = vtanh.f32 %v1812_v5 }
 0xaef   :  { %3683 = vtanh.f32 %v1826_v10  ;;  %v1827_v13 = vadd.f32 %v1795_v48, %v1745_v28  ;;  %v1820_v7 = vadd.f32 %v1788_v19, %v1711_v33  ;;  %v3672_v28 = vpop.eup %3671 }
 0xaf0   :  { %3685 = vtanh.f32 %v1823_v51  ;;  %v3674_v21 = vpop.eup %3673  ;;  %v1893_v51 = vmul.f32 %v3646_v39, %v4474_v27 }
 0xaf1   :  { %3687 = vtanh.f32 %v1830_v47  ;;  %v3676_v61 = vpop.eup %3675  ;;  %v1905_v47 = vmul.f32 %v3660_v36, %v4474_v27  ;;  %v1909_v48 = vmul.f32 %v3674_v21, %v4474_v27 }
 0xaf2   :  { %v1764_v57 = vpop.permute.xlu0 %1763  ;;  %v1730_v24 = vpop.permute.xlu1 %1729  ;;  %3689 = vtanh.f32 %v1816_v17 }
 0xaf3   :  { %v1831_v2 = vadd.f32 %v1799_v63, %v1764_v57  ;;  %v1824_v42 = vadd.f32 %v1792_v26, %v1730_v24  ;;  %v3678_v33 = vpop.eup %3677  ;;  %v1897_v63 = vmul.f32 %v3650_v4, %v4474_v27  ;;  %v1901_v57 = vmul.f32 %v3658_v22, %v4474_v27 }
 0xaf4   :  { %v1913_v17 = vmul.f32 %v3678_v33, %v4474_v27 }
 0xaf5   :  { %3691 = vtanh.f32 %v1831_v2 }
 0xaf6   :  { %v1768_v37 = vpop.permute.xlu0 %1767  ;;  %v1749_v9 = vpop.permute.xlu1 %1748  ;;  %3693 = vtanh.f32 %v1827_v13 }
 0xaf7   :  { %v1828_v8 = vadd.f32 %v1796_v59, %v1749_v9  ;;  %v1832_v46 = vadd.f32 %v1800_v54, %v1768_v37  ;;  %3695 = vtanh.f32 %v1820_v7 }
 0xaf9   :  { %3697 = vtanh.f32 %v1828_v8 }
 0xafa   :  { %3699 = vtanh.f32 %v1832_v46  ;;  %v3680_v5 = vpop.eup %3679 }
 0xafb   :  { %3701 = vtanh.f32 %v1824_v42  ;;  %v3682_v49 = vpop.eup %3681  ;;  %v1917_v19 = vmul.f32 %v3680_v5, %v4474_v27 }
 0xafc   :  { %v3684_v10 = vpop.eup %3683 }
 0xafd   :  { %v3686_v24 = vpop.eup %3685 }
 0xafe   :  { %v3688_v59 = vpop.eup %3687 }
 0xaff   :  { %v3690_v22 = vpop.eup %3689 }
 0xb02   :  { %v3692_v26 = vpop.eup %3691 }
 0xb03   :  { %v1877_v2 = vpop.permute.xlu0 %1876  ;;  %v1882_v54 = vpop.permute.xlu1 %1881 }
 0xb04   :  { %v1890_v13 = vmul.f32 %v4478_v40, %v1877_v2  ;;  %v1894_v34 = vmul.f32 %v4482_v18, %v1877_v2  ;;  %v1898_v39 = vmul.f32 %v4484_v30, %v1877_v2  ;;  %v1902_v4 = vmul.f32 %v3656_v53, %v1877_v2  ;;  %v3694_v21 = vpop.eup %3693 }
 0xb05   :  { %v1906_v37 = vmul.f32 %v3666_v6, %v1877_v2  ;;  %v1910_v9 = vmul.f32 %v3672_v28, %v1877_v2  ;;  %v1914_v36 = vmul.f32 %v3684_v10, %v1877_v2  ;;  %v1918_v7 = vmul.f32 %v3688_v59, %v1877_v2  ;;  %v3696_v0 = vpop.eup %3695 }
 0xb06   :  { %v1921_v8 = vadd.f32 %v1890_v13, %v1889_v3  ;;  %v1930_v46 = vadd.f32 %v1894_v34, %v1893_v51  ;;  %v1939_v42 = vadd.f32 %v1898_v39, %v1897_v63  ;;  %v1948_v27 = vadd.f32 %v1902_v4, %v1901_v57  ;;  %v3698_v10 = vpop.eup %3697 }
 0xb07   :  { %v1957_v33 = vadd.f32 %v1906_v37, %v1905_v47  ;;  %v1966_v5 = vadd.f32 %v1910_v9, %v1909_v48  ;;  %v1975_v40 = vadd.f32 %v1914_v36, %v1913_v17  ;;  %v1891_v18 = vmul.f32 %v4489_v35, %v1882_v54  ;;  %v1887_v28 = vpop.permute.xlu0 %1886  ;;  %v3700_v63 = vpop.eup %3699 }
 0xb08   :  { %v1895_v30 = vmul.f32 %v4487_v31, %v1882_v54  ;;  %v1899_v53 = vmul.f32 %v3662_v43, %v1882_v54  ;;  %v1903_v23 = vmul.f32 %v3668_v20, %v1882_v54  ;;  %v1907_v6 = vmul.f32 %v3676_v61, %v1882_v54  ;;  %v3702_v17 = vpop.eup %3701 }
 0xb09   :  { %v1911_v2 = vmul.f32 %v3686_v24, %v1882_v54  ;;  %v1915_v59 = vmul.f32 %v3694_v21, %v1882_v54  ;;  %v1919_v3 = vmul.f32 %v3692_v26, %v1882_v54  ;;  %v1922_v51 = vadd.f32 %v1921_v8, %v1891_v18 }
 0xb0a   :  { %v1931_v57 = vadd.f32 %v1930_v46, %v1895_v30  ;;  %v1940_v13 = vadd.f32 %v1939_v42, %v1899_v53  ;;  %v1949_v47 = vadd.f32 %v1948_v27, %v1903_v23  ;;  %v1958_v48 = vadd.f32 %v1957_v33, %v1907_v6 }
 0xb0b   :  { %v1967_v34 = vadd.f32 %v1966_v5, %v1911_v2  ;;  %v1892_v35 = vmul.f32 %v4491_v16, %v1887_v28  ;;  %v1896_v39 = vmul.f32 %v3670_v11, %v1887_v28  ;;  %v1900_v31 = vmul.f32 %v3682_v49, %v1887_v28 }
 0xb0c   :  { %v1904_v43 = vmul.f32 %v3690_v22, %v1887_v28  ;;  %v1908_v20 = vmul.f32 %v3696_v0, %v1887_v28  ;;  %v1912_v61 = vmul.f32 %v3702_v17, %v1887_v28  ;;  %v1916_v4 = vmul.f32 %v3698_v10, %v1887_v28 }
 0xb0d   :  { %v1923_v37 = vadd.f32 %v1922_v51, %v1892_v35  ;;  %v1932_v24 = vadd.f32 %v1931_v57, %v1896_v39  ;;  %v1941_v9 = vadd.f32 %v1940_v13, %v1900_v31  ;;  %v1920_v54 = vmul.f32 %v3700_v63, %v1887_v28 }
 0xb0e   :  { %v1950_v36 = vadd.f32 %v1949_v47, %v1904_v43  ;;  %v1959_v26 = vadd.f32 %v1958_v48, %v1908_v20  ;;  %v1968_v8 = vadd.f32 %v1967_v34, %v1912_v61  ;;  %v1976_v46 = vadd.f32 %v1975_v40, %v1915_v59 }
 0xb0f   :  { %v1924_v23 = vrot.slane %v1923_v37, 4  ;;  %v1933_v42 = vrot.slane %v1932_v24, 4  ;;  %v1942_v27 = vrot.slane %v1941_v9, 4  ;;  %v1984_v21 = vadd.f32 %v1918_v7, %v1917_v19 }
 0xb10   :  { %v1951_v33 = vrot.slane %v1950_v36, 4  ;;  %v1960_v16 = vrot.slane %v1959_v26, 4  ;;  %v1969_v11 = vrot.slane %v1968_v8, 4  ;;  %v1977_v49 = vadd.f32 %v1976_v46, %v1916_v4 }
 0xb11   :  { %v1925_v22 = vadd.f32 %v1924_v23, %v1923_v37  ;;  %v1934_v0 = vadd.f32 %v1933_v42, %v1932_v24  ;;  %v1943_v5 = vadd.f32 %v1942_v27, %v1941_v9  ;;  %v1985_v18 = vadd.f32 %v1984_v21, %v1919_v3 }
 0xb12   :  { %v1952_v30 = vadd.f32 %v1951_v33, %v1950_v36  ;;  %v1961_v53 = vadd.f32 %v1960_v16, %v1959_v26  ;;  %v1970_v6 = vadd.f32 %v1969_v11, %v1968_v8  ;;  %v1978_v28 = vrot.slane %v1977_v49, 4 }
 0xb13   :  { %v1926_v10 = vrot.slane %v1925_v22, 2  ;;  %v1935_v2 = vrot.slane %v1934_v0, 2  ;;  %v1944_v51 = vrot.slane %v1943_v5, 2  ;;  %v1986_v40 = vadd.f32 %v1985_v18, %v1920_v54 }
 0xb14   :  { %v1953_v59 = vrot.slane %v1952_v30, 2  ;;  %v1962_v63 = vrot.slane %v1961_v53, 2  ;;  %v1971_v57 = vrot.slane %v1970_v6, 2  ;;  %v1979_v19 = vadd.f32 %v1978_v28, %v1977_v49 }
 0xb15   :  { %v1927_v7 = vadd.f32 %v1926_v10, %v1925_v22  ;;  %v1936_v13 = vadd.f32 %v1935_v2, %v1934_v0  ;;  %v1945_v47 = vadd.f32 %v1944_v51, %v1943_v5  ;;  %v1987_v48 = vrot.slane %v1986_v40, 4 }
 0xb16   :  { %v1954_v17 = vadd.f32 %v1953_v59, %v1952_v30  ;;  %v1963_v34 = vadd.f32 %v1962_v63, %v1961_v53  ;;  %v1972_v35 = vadd.f32 %v1971_v57, %v1970_v6  ;;  %v1980_v3 = vrot.slane %v1979_v19, 2  ;;  %v3818_v63 = vld [vmem:[#allocation8] sm:$0xff] }
 0xb17   :  { %v1928_v39 = vrot.slane %v1927_v7, 1  ;;  %v1937_v31 = vrot.slane %v1936_v13, 1  ;;  %v1946_v43 = vrot.slane %v1945_v47, 1  ;;  %v1988_v20 = vadd.f32 %v1987_v48, %v1986_v40 }
 0xb18   :  { %v1955_v61 = vrot.slane %v1954_v17, 1  ;;  %v1964_v4 = vrot.slane %v1963_v34, 1  ;;  %v1973_v37 = vrot.slane %v1972_v35, 1  ;;  %v1981_v24 = vadd.f32 %v1980_v3, %v1979_v19 }
 0xb19   :  { %v1929_v9 = vadd.f32 %v1928_v39, %v1927_v7  ;;  %v1938_v54 = vadd.f32 %v1937_v31, %v1936_v13  ;;  %v1947_v36 = vadd.f32 %v1946_v43, %v1945_v47  ;;  %v1989_v26 = vrot.slane %v1988_v20, 2 }
 0xb1a   :  { %v1956_v8 = vadd.f32 %v1955_v61, %v1954_v17  ;;  %v1982_v46 = vrot.slane %v1981_v24, 1  ;;  %v1965_v23 = vadd.f32 %v1964_v4, %v1963_v34  ;;  %v1974_v27 = vadd.f32 %v1973_v37, %v1972_v35 }
 0xb1b   :  { %v1990_v42 = vadd.f32 %v1989_v26, %v1988_v20  ;;  %3703 = vtanh.f32 %v1929_v9  ;;  %v924_v5 = vsub.f32 1.0, %v4278_v55 }
 0xb1c   :  { %3705 = vtanh.f32 %v1938_v54  ;;  %v1983_v21 = vadd.f32 %v1982_v46, %v1981_v24 }
 0xb1d   :  { %v1991_v33 = vrot.slane %v1990_v42, 1  ;;  %3707 = vtanh.f32 %v1947_v36  ;;  %v4511_v57 = vmul.f32 %v3818_v63, %v924_v5 }
 0xb1e   :  { %3709 = vtanh.f32 %v1956_v8 }
 0xb1f   :  { %v1992_v16 = vadd.f32 %v1991_v33, %v1990_v42  ;;  %3711 = vtanh.f32 %v1965_v23  ;;  %vm1993_vm9 = vcmp.gt.f32.partialorder %v4511_v57, 0.0  ;;  %v4856_v23 = vmov 0.0  }
 0xb20   :  { %3713 = vtanh.f32 %v1974_v27 }
 0xb21   :  { %3715 = vtanh.f32 %v1983_v21 }
 0xb22   :  { %3717 = vtanh.f32 %v1992_v16 }
 0xb28   :  { %v3704_v11 = vpop.eup %3703 }
 0xb29   :  { %v3706_v49 = vpop.eup %3705  ;;  %v2002_v22 = vmul.f32 10.0, %v3704_v11  ;;  %v2124_v11 = vld [vmem:[#allocation2 + $0x8] sm:$0xff] }
 0xb2a   :  { %v3708_v0 = vpop.eup %3707  ;;  %v2003_v18 = vmul.f32 10.0, %v3706_v49  ;;  %v2123_v49 = vld [vmem:[#allocation2] sm:$0xff] }
 0xb2b   :  { %v3710_v30 = vpop.eup %3709  ;;  %v2004_v53 = vmul.f32 10.0, %v3708_v0 }
 0xb2c   :  { %v3712_v6 = vpop.eup %3711  ;;  %v2005_v28 = vmul.f32 10.0, %v3710_v30  ;;  %v2018_v10 = vsel %vm814_vm2, %v2003_v18, %v2002_v22  ;;  %v2125_v30 = vld [vmem:[#allocation2 + $0x10] sm:$0xff] }
 0xb2d   :  { %v3714_v2 = vpop.eup %3713  ;;  %v2006_v51 = vmul.f32 10.0, %v3712_v6  ;;  %v2019_v40 = vsel %vm816_vm3, %v2004_v53, %v2018_v10  ;;  %v2128_v53 = vld [vmem:[#allocation2 + $0x28] sm:$0xff] }
 0xb2e   :  { %v3716_v59 = vpop.eup %3715  ;;  %v2007_v19 = vmul.f32 10.0, %v3714_v2  ;;  %v2020_v7 = vsel %vm818_vm4, %v2005_v28, %v2019_v40  ;;  %v2126_v2 = vld [vmem:[#allocation2 + $0x18] sm:$0xff] }
 0xb2f   :  { %v3718_v13 = vpop.eup %3717  ;;  %v2008_v55 = vmul.f32 10.0, %v3716_v59  ;;  %v2021_v47 = vsel %vm820_vm5, %v2006_v51, %v2020_v7  ;;  %v2129_v51 = vld [vmem:[#allocation2 + $0x30] sm:$0xff]  ;;  %v2132_v7 = vld [vmem:[#allocation2 + $0x48] sm:$0xff] }
 0xb30   :  { %v2009_v48 = vmul.f32 10.0, %v3718_v13  ;;  %v2022_v17 = vsel %vm822_vm6, %v2007_v19, %v2021_v47  ;;  %v2127_v13 = vld [vmem:[#allocation2 + $0x20] sm:$0xff] }
 0xb31   :  { %v2023_v34 = vsel %vm824_vm7, %v2008_v55, %v2022_v17  ;;  %v2130_v17 = vld [vmem:[#allocation2 + $0x38] sm:$0xff] }
 0xb32   :  { %v2024_v35 = vsel %vm826_vm8, %v2009_v48, %v2023_v34  ;;  %v2131_v34 = vld [vmem:[#allocation2 + $0x40] sm:$0xff] }
 0xb33   :  { %v2026_v3 = vsel %vm1993_vm9, %v2024_v35, -1e+30 }
 0xb34   :  { %2027 = vmax.xlane.f32.xlu1 %v2026_v3 }
 0xbbd   :  { %v2028_v39 = vpop.xlane.xlu1 %2027 }
 0xbbe   :  { %v4519_v31 = vsub.f32 %v2026_v3, %v2028_v39 }
 0xbc0   :  { %vm2102_vm10 = vcmp.ge.f32.partialorder %v4519_v31, 0.0 }
 0xbc1   :  { %v2103_v43 = vsel %vm2102_vm10, %v4264_v44, 128 }
 0xbc2   :  { %v2105_v20 = vshra.s32 %v2103_v43, 16  ;;  %v2104_v4 = vand.u32 65535, %v2103_v43  ;;  %v2134_v43 = vld [vmem:[#allocation2 + $0x58] sm:$0xff] }
 0xbc4   :  { %v2107_v61 = vcvt.s32.f32 %v2105_v20  ;;  %v2106_v24 = vcvt.s32.f32 %v2104_v4  ;;  %v2133_v20 = vld [vmem:[#allocation2 + $0x50] sm:$0xff] }
 0xbc6   :  { %2108 = vmin.xlane.f32.xlu0 %v2107_v61 }
 0xc4f   :  { %v2109_v37 = vpop.xlane.xlu0 %2108 }
 0xc50   :  { %vm2110_vm11 = vcmp.eq.f32.partialorder %v2107_v61, %v2109_v37  ;;  %v2115_v54 = vcvt.f32.s32 %v2109_v37 }
 0xc51   :  { %v2111_v9 = vsel %vm2110_vm11, %v2106_v24, inf  ;;  %v2140_v24 = vld [vmem:[#allocation2 + $0x88] sm:$0xff] }
 0xc52   :  { %2112 = vmin.xlane.f32.xlu0 %v2111_v9  ;;  %v2116_v26 = vshll.u32 %v2115_v54, 16  ;;  %v2139_v9 = vld [vmem:[#allocation2 + $0x80] sm:$0xff] }
 0xcdb   :  { %v2113_v36 = vpop.xlane.xlu0 %2112 }
 0xcdc   :  { %v2114_v8 = vcvt.f32.s32 %v2113_v36 }
 0xcde   :  { %v4523_v46 = vadd.s32 %v2116_v26, %v2114_v8  ;;  %v2141_v8 = vld [vmem:[#allocation2 + $0x90] sm:$0xff] }
 0xce0   :  { %vm2118_vm12 = vcmp.eq.s32.totalorder %v4264_v44, %v4523_v46 }
 0xce1   :  { %v4528_v42 = vsel %vm2118_vm12, 1.0, %v4856_v23 }
 0xce2   :  { %v2163_v27 = vrot.slane %v4528_v42, %v4271_v12  ;;  %v2156_v40 = vcombine.high %v4528_v42, %v4528_v42 }
 0xce4   :  { %v2171_v21 = vcombine.high %v2163_v27, %v2163_v27  ;;  %v2179_v33 = vrot.slane %v2163_v27, %v4271_v12  ;;  %v2170_v55 = vrot.slane %v2156_v40, %v4271_v12  ;;  %v2142_v27 = vld [vmem:[#allocation2 + $0x98] sm:$0xff]  ;;  %v2143_v40 = vld [vmem:[#allocation2 + $0xa0] sm:$0xff] }
 0xce6   :  { %v2193_v16 = vrot.slane %v2171_v21, %v4271_v12  ;;  %v2208_v22 = vrot.slane %v2179_v33, %v4183_v45  ;;  %v2201_v6 = vcombine.high %v2179_v33, %v2179_v33  ;;  %v2186_v35 = vrot.slane %v2170_v55, %v4271_v12 }
 0xce7   :  { %v2172_v21 = vcombine.high %v2170_v55, %v2170_v55 }
 0xce8   :  { %v2246_v0 = vmul.f32 %v2208_v22, %v2124_v11  ;;  %v2245_v5 = vmul.f32 %v2208_v22, %v2123_v49  ;;  %v2212_v18 = vrot.slane %v2193_v16, %v4183_v45  ;;  %v2247_v28 = vmul.f32 %v2208_v22, %v2125_v30 }
 0xce9   :  { %v2248_v59 = vmul.f32 %v2208_v22, %v2126_v2  ;;  %v2216_v19 = vrot.slane %v2201_v6, %v4183_v45  ;;  %v2224_v37 = vrot.slane %v2186_v35, %v4183_v45  ;;  %v2203_v54 = vcombine.high %v2193_v16, %v2193_v16  ;;  %v2136_v22 = vld [vmem:[#allocation2 + $0x68] sm:$0xff]  ;;  %v2137_v16 = vld [vmem:[#allocation2 + $0x70] sm:$0xff] }
 0xcea   :  { %2279 = vadd.xlane.f32.xlu0 %v2246_v0  ;;  %2277 = vadd.xlane.f32.xlu1 %v2245_v5  ;;  %v2250_v10 = vmul.f32 %v2212_v18, %v2128_v53  ;;  %v2251_v63 = vmul.f32 %v2212_v18, %v2129_v51  ;;  %v2249_v48 = vmul.f32 %v2212_v18, %v2127_v13  ;;  %v2135_v0 = vld [vmem:[#allocation2 + $0x60] sm:$0xff]  ;;  %v2138_v53 = vld [vmem:[#allocation2 + $0x78] sm:$0xff]  ;;  %v2144_v51 = vld [vmem:[#allocation2 + $0xa8] sm:$0xff] }
 0xceb   :  { %v2254_v47 = vmul.f32 %v2216_v19, %v2132_v7  ;;  %v2252_v3 = vmul.f32 %v2212_v18, %v2130_v17  ;;  %v2253_v39 = vmul.f32 %v2216_v19, %v2131_v34  ;;  %v2256_v61 = vmul.f32 %v2216_v19, %v2134_v43  ;;  %v2145_v7 = vld [vmem:[#allocation2 + $0xb0] sm:$0xff]  ;;  %v2147_v13 = vld [vmem:[#allocation2 + $0xc0] sm:$0xff]  ;;  %v2146_v17 = vld [vmem:[#allocation2 + $0xb8] sm:$0xff] }
 0xcec   :  { %v2255_v4 = vmul.f32 %v2216_v19, %v2133_v20  ;;  %v2262_v36 = vmul.f32 %v2224_v37, %v2140_v24  ;;  %v2261_v26 = vmul.f32 %v2224_v37, %v2139_v9  ;;  %v2263_v33 = vmul.f32 %v2224_v37, %v2141_v8  ;;  %v2150_v43 = vld [vmem:[#allocation2 + $0xd8] sm:$0xff]  ;;  %v2151_v24 = vld [vmem:[#allocation2 + $0xe0] sm:$0xff] }
 0xced   :  { %v2264_v11 = vmul.f32 %v2224_v37, %v2142_v27  ;;  %v2220_v49 = vrot.slane %v2203_v54, %v4183_v45  ;;  %v2200_v5 = vrot.slane %v2172_v21, %v4271_v12  ;;  %v2202_v6 = vcombine.high %v2186_v35, %v2186_v35  ;;  %v2152_v37 = vld [vmem:[#allocation2 + $0xe8] sm:$0xff]  ;;  %v2344_v21 = vld [vmem:[%s4841_s5 + $0x18] sm:$0xff] }
 0xcee   :  { %2281 = vadd.xlane.f32.xlu1 %v2247_v28  ;;  %2287 = vadd.xlane.f32.xlu0 %v2250_v10 }
 0xcef   :  { %v2258_v18 = vmul.f32 %v2220_v49, %v2136_v22  ;;  %v2257_v30 = vmul.f32 %v2220_v49, %v2135_v0  ;;  %v2259_v28 = vmul.f32 %v2220_v49, %v2137_v16  ;;  %v2260_v10 = vmul.f32 %v2220_v49, %v2138_v53  ;;  %3497 = vmatpush3.msra.mxu0 %v2344_v21  ;;  %v2342_v49 = vld [vmem:[%s4841_s5 + $0x8] sm:$0xff]  ;;  %v2341_v0 = vld [vmem:[%s4841_s5] sm:$0xff] }
 0xcf0   :  { %v2228_v2 = vrot.slane %v2200_v5, %v4183_v45  ;;  %v2232_v19 = vrot.slane %v2202_v6, %v4183_v45  ;;  %3498 = vmatprep.subr.mxu0 %v4856_v23 }
 0xcf2   :  { %2283 = vadd.xlane.f32.xlu1 %v2248_v59  ;;  %2289 = vadd.xlane.f32.xlu0 %v2251_v63  ;;  %v2266_v59 = vmul.f32 %v2228_v2, %v2144_v51  ;;  %v2265_v63 = vmul.f32 %v2228_v2, %v2143_v40  ;;  %v2267_v55 = vmul.f32 %v2228_v2, %v2145_v7 }
 0xcf3   :  { %v2268_v35 = vmul.f32 %v2228_v2, %v2146_v17 }
 0xcf6   :  { %2295 = vadd.xlane.f32.xlu0 %v2254_v47  ;;  %2285 = vadd.xlane.f32.xlu1 %v2249_v48  ;;  %v2269_v47 = vmul.f32 %v2232_v19, %v2147_v13  ;;  %v2148_v48 = vld [vmem:[#allocation2 + $0xc8] sm:$0xff] }
 0xcf7   :  { %v2270_v34 = vmul.f32 %v2232_v19, %v2148_v48 }
 0xcfa   :  { %2291 = vadd.xlane.f32.xlu0 %v2252_v3  ;;  %2293 = vadd.xlane.f32.xlu1 %v2253_v39  ;;  %v2204_v3 = vcombine.high %v2200_v5, %v2200_v5  ;;  %v2149_v39 = vld [vmem:[#allocation2 + $0xd0] sm:$0xff] }
 0xcfb   :  { %v2271_v20 = vmul.f32 %v2232_v19, %v2149_v39 }
 0xcfe   :  { %2299 = vadd.xlane.f32.xlu0 %v2256_v61  ;;  %2297 = vadd.xlane.f32.xlu1 %v2255_v4  ;;  %v2272_v61 = vmul.f32 %v2232_v19, %v2150_v43  ;;  %v2236_v4 = vrot.slane %v2204_v3, %v4183_v45 }
 0xd00   :  { %v2274_v9 = vmul.f32 %v2236_v4, %v2152_v37  ;;  %v2273_v54 = vmul.f32 %v2236_v4, %v2151_v24 }
 0xd02   :  { %2311 = vadd.xlane.f32.xlu1 %v2262_v36  ;;  %2309 = vadd.xlane.f32.xlu0 %v2261_v26  ;;  %v2153_v36 = vld [vmem:[#allocation2 + $0xf0] sm:$0xff]  ;;  %v2154_v26 = vld [vmem:[#allocation2 + $0xf8] sm:$0xff] }
 0xd03   :  { %v2275_v8 = vmul.f32 %v2236_v4, %v2153_v36  ;;  %v2276_v27 = vmul.f32 %v2236_v4, %v2154_v26 }
 0xd06   :  { %2313 = vadd.xlane.f32.xlu1 %v2263_v33  ;;  %2315 = vadd.xlane.f32.xlu0 %v2264_v11  ;;  %v3376_v33 = vld [vmem:[%s4844_s8] ss:$0 sm:$0xff]  ;;  %v2343_v11 = vld [vmem:[%s4841_s5 + $0x10] sm:$0xff] }
 0xd07   :  { %3499 = vmatpush3.msra.mxu0 %v2343_v11  ;;  %v4561_v22 = vadd.f32 %v3376_v33, %v4457_v38 }
 0xd08   :  { %3500 = vmatprep.subr.mxu0 %v4856_v23 }
 0xd09   :  { %3501 = vmatpush3.msra.mxu0 %v2342_v49 }
 0xd0a   :  { %2303 = vadd.xlane.f32.xlu1 %v2258_v18  ;;  %2301 = vadd.xlane.f32.xlu0 %v2257_v30 }
 0xd0b   :  { %3502 = vmatprep.subr.mxu0 %v4856_v23 }
 0xd0c   :  { %3503 = vmatpush3.msra.mxu0 %v2341_v0 }
 0xd0d   :  { %3518 = vmatprep.subr.mxu0 %v4856_v23 }
 0xd0e   :  { %2305 = vadd.xlane.f32.xlu1 %v2259_v28  ;;  %2307 = vadd.xlane.f32.xlu0 %v2260_v10 }
 0xd12   :  { %2319 = vadd.xlane.f32.xlu1 %v2266_v59  ;;  %2317 = vadd.xlane.f32.xlu0 %v2265_v63 }
 0xd16   :  { %2321 = vadd.xlane.f32.xlu1 %v2267_v55  ;;  %2325 = vadd.xlane.f32.xlu0 %v2269_v47 }
 0xd1a   :  { %2327 = vadd.xlane.f32.xlu1 %v2270_v34  ;;  %2323 = vadd.xlane.f32.xlu0 %v2268_v35 }
 0xd1e   :  { %2329 = vadd.xlane.f32.xlu1 %v2271_v20  ;;  %2331 = vadd.xlane.f32.xlu0 %v2272_v61 }
 0xd22   :  { %2335 = vadd.xlane.f32.xlu1 %v2274_v9  ;;  %2333 = vadd.xlane.f32.xlu0 %v2273_v54 }
 0xd26   :  { %2337 = vadd.xlane.f32.xlu1 %v2275_v8  ;;  %2339 = vadd.xlane.f32.xlu0 %v2276_v27 }
 0xd37   :  { %2704 = vrot.lane.b32.xlu1 %v4561_v22, %s3979_s23 }
 0xd73   :  { %v2280_v5 = vpop.xlane.xlu0 %2279  ;;  %v2278_v18 = vpop.xlane.xlu1 %2277 }
 0xd74   :  { %v2391_v61 = vrot.slane %v2280_v5, %v4343_v15  ;;  %v2387_v4 = vrot.slane %v2278_v18, %v4339_v29 }
 0xd76   :  { %v2392_v5 = vsel %vm1196_vm13, %v2391_v61, %v2387_v4 }
 0xd77   :  { %v2282_v30 = vpop.xlane.xlu1 %2281  ;;  %v2288_v38 = vpop.xlane.xlu0 %2287 }
 0xd78   :  { %v2410_v43 = vrot.slane %v2288_v38, %v4343_v15  ;;  %v2396_v24 = vrot.slane %v2282_v30, %v4346_v14 }
 0xd7b   :  { %v2284_v16 = vpop.xlane.xlu1 %2283  ;;  %v2290_v53 = vpop.xlane.xlu0 %2289 }
 0xd7c   :  { %v2415_v26 = vrot.slane %v2290_v53, %v4346_v14  ;;  %v2401_v18 = vrot.slane %v2284_v16, %v4353_v41  ;;  %v2397_v53 = vsel %vm1203_vm14, %v2396_v24, %v2392_v5 }
 0xd7f   :  { %v2296_v6 = vpop.xlane.xlu0 %2295  ;;  %v2286_v28 = vpop.xlane.xlu1 %2285 }
 0xd80   :  { %v2406_v35 = vrot.slane %v2286_v28, %v4339_v29  ;;  %v2429_v9 = vrot.slane %v2296_v6, %v4343_v15 }
 0xd82   :  { %v2411_v54 = vsel %vm1196_vm13, %v2410_v43, %v2406_v35  ;;  %v2402_v43 = vsel %vm1210_vm15, %v2401_v18, %v2397_v53 }
 0xd83   :  { %v2292_v10 = vpop.xlane.xlu0 %2291  ;;  %v2294_v2 = vpop.xlane.xlu1 %2293  ;;  %v2416_v30 = vsel %vm1203_vm14, %v2415_v26, %v2411_v54 }
 0xd84   :  { %v2425_v20 = vrot.slane %v2294_v2, %v4339_v29  ;;  %v2420_v36 = vrot.slane %v2292_v10, %v4353_v41 }
 0xd86   :  { %v2430_v11 = vsel %vm1196_vm13, %v2429_v9, %v2425_v20  ;;  %v2421_v6 = vsel %vm1210_vm15, %v2420_v36, %v2416_v30 }
 0xd87   :  { %v2300_v51 = vpop.xlane.xlu0 %2299  ;;  %v2298_v40 = vpop.xlane.xlu1 %2297 }
 0xd88   :  { %v2434_v37 = vrot.slane %v2298_v40, %v4346_v14  ;;  %v2439_v49 = vrot.slane %v2300_v51, %v4353_v41 }
 0xd8a   :  { %v2435_v38 = vsel %vm1203_vm14, %v2434_v37, %v2430_v11 }
 0xd8b   :  { %v2312_v59 = vpop.xlane.xlu1 %2311  ;;  %v2310_v63 = vpop.xlane.xlu0 %2309  ;;  %v2440_v16 = vsel %vm1210_vm15, %v2439_v49, %v2435_v38 }
 0xd8c   :  { %v2467_v28 = vrot.slane %v2312_v59, %v4343_v15  ;;  %v2463_v10 = vrot.slane %v2310_v63, %v4339_v29 }
 0xd8f   :  { %v2314_v19 = vpop.xlane.xlu1 %2313  ;;  %v4571_v7 = vpop.xlane.xlu0 %2315 }
 0xd90   :  { %v2477_v36 = vrot.slane %v4571_v7, %v4353_v41 }
 0xd93   :  { %v2304_v13 = vpop.xlane.xlu1 %2303  ;;  %v2302_v55 = vpop.xlane.xlu0 %2301 }
 0xd94   :  { %v2448_v8 = vrot.slane %v2304_v13, %v4343_v15  ;;  %v2444_v27 = vrot.slane %v2302_v55, %v4339_v29  ;;  %v2472_v55 = vrot.slane %v2314_v19, %v4346_v14  ;;  %v2468_v19 = vsel %vm1196_vm13, %v2467_v28, %v2463_v10 }
 0xd96   :  { %v2449_v2 = vsel %vm1196_vm13, %v2448_v8, %v2444_v27 }
 0xd97   :  { %v2306_v47 = vpop.xlane.xlu1 %2305  ;;  %v2308_v48 = vpop.xlane.xlu0 %2307 }
 0xd98   :  { %v2453_v0 = vrot.slane %v2306_v47, %v4346_v14  ;;  %v2458_v51 = vrot.slane %v2308_v48, %v4353_v41  ;;  %v2536_v48 = vsel %vm814_vm2, %v2421_v6, %v2402_v43 }
 0xd99   :  { %v2537_v37 = vsel %vm816_vm3, %v2440_v16, %v2536_v48 }
 0xd9a   :  { %v2454_v47 = vsel %vm1203_vm14, %v2453_v0, %v2449_v2 }
 0xd9b   :  { %v2320_v17 = vpop.xlane.xlu1 %2319  ;;  %v2318_v34 = vpop.xlane.xlu0 %2317  ;;  %v2459_v24 = vsel %vm1210_vm15, %v2458_v51, %v2454_v47 }
 0xd9c   :  { %v2486_v59 = vrot.slane %v2320_v17, %v4343_v15  ;;  %v2482_v63 = vrot.slane %v2318_v34, %v4339_v29  ;;  %v2473_v34 = vsel %vm1203_vm14, %v2472_v55, %v2468_v19  ;;  %v2722_v19 = vld [vmem:[#allocation11] sm:$0xff] }
 0xd9d   :  { %v2478_v5 = vsel %vm1210_vm15, %v2477_v36, %v2473_v34 }
 0xd9f   :  { %v2322_v3 = vpop.xlane.xlu1 %2321  ;;  %v2326_v39 = vpop.xlane.xlu0 %2325 }
 0xda0   :  { %v2491_v61 = vrot.slane %v2322_v3, %v4346_v14  ;;  %v2501_v4 = vrot.slane %v2326_v39, %v4339_v29  ;;  %v2487_v39 = vsel %vm1196_vm13, %v2486_v59, %v2482_v63  ;;  %v3056_v63 = vld [vmem:[%s4847_s11] sm:$0xff] }
 0xda2   :  { %v2492_v11 = vsel %vm1203_vm14, %v2491_v61, %v2487_v39  ;;  %v2725_v61 = vld [vmem:[#allocation11 + $0x18] sm:$0xff] }
 0xda3   :  { %v2328_v21 = vpop.xlane.xlu1 %2327  ;;  %v2324_v33 = vpop.xlane.xlu0 %2323 }
 0xda4   :  { %v2505_v35 = vrot.slane %v2328_v21, %v4343_v15  ;;  %v2496_v9 = vrot.slane %v2324_v33, %v4353_v41  ;;  %v2538_v33 = vsel %vm818_vm4, %v2459_v24, %v2537_v37 }
 0xda6   :  { %v2506_v26 = vsel %vm1196_vm13, %v2505_v35, %v2501_v4  ;;  %v2497_v49 = vsel %vm1210_vm15, %v2496_v9, %v2492_v11  ;;  %v2723_v4 = vld [vmem:[#allocation11 + $0x8] sm:$0xff] }
 0xda7   :  { %v2330_v40 = vpop.xlane.xlu1 %2329  ;;  %v2332_v13 = vpop.xlane.xlu0 %2331 }
 0xda8   :  { %v2510_v20 = vrot.slane %v2330_v40, %v4346_v14  ;;  %v2515_v3 = vrot.slane %v2332_v13, %v4353_v41 }
 0xdaa   :  { %v2511_v8 = vsel %vm1203_vm14, %v2510_v20, %v2506_v26 }
 0xdab   :  { %v2336_v54 = vpop.xlane.xlu1 %2335  ;;  %v2334_v17 = vpop.xlane.xlu0 %2333  ;;  %v2516_v18 = vsel %vm1210_vm15, %v2515_v3, %v2511_v8 }
 0xdac   :  { %v2524_v27 = vrot.slane %v2336_v54, %v4343_v15  ;;  %v2520_v21 = vrot.slane %v2334_v17, %v4339_v29  ;;  %v2539_v15 = vsel %vm820_vm5, %v2478_v5, %v2538_v33 }
 0xdad   :  { %v2540_v53 = vsel %vm822_vm6, %v2497_v49, %v2539_v15 }
 0xdae   :  { %v2525_v29 = vsel %vm1196_vm13, %v2524_v27, %v2520_v21  ;;  %v2541_v28 = vsel %vm824_vm7, %v2516_v18, %v2540_v53 }
 0xdaf   :  { %v2338_v0 = vpop.xlane.xlu1 %2337  ;;  %v2340_v7 = vpop.xlane.xlu0 %2339 }
 0xdb0   :  { %v2529_v30 = vrot.slane %v2338_v0, %v4346_v14  ;;  %v2534_v38 = vrot.slane %v2340_v7, %v4353_v41  ;;  %v3374_v14 = vld [vmem:[%s4843_s7] ss:$0 sm:$0xff] }
 0xdb2   :  { %v2530_v6 = vsel %vm1203_vm14, %v2529_v30, %v2525_v29 }
 0xdb3   :  { %v2535_v10 = vsel %vm1210_vm15, %v2534_v38, %v2530_v6  ;;  %v2705_v43 = vpop.permute.xlu1 %2704 }
 0xdb4   :  { %v2542_v2 = vsel %vm826_vm8, %v2535_v10, %v2541_v28 }
 0xdb5   :  { %3505 = vmatmul.mubr.msk.f32.vlgmr.msra.gmra.mxu0 %vm140_vm1, %v2542_v2 }
 0xdb6   :  { %3526 = vmatprep.mubr.msk.f32.mxu0 %vm3978_vm0, %v4856_v23  ;;  %3519 = vmatpush3.msra.mxu0 %v2725_v61 }
 0xdb7   :  { %3520 = vmatprep.subr.mxu0 %v4856_v23 }
 0xe75   :  { %v2611_v41 = vpop.f32.mrf.mxu0 }
 0xe76   :  { %v2612_v51 = vadd.f32 %v3374_v14, %v2611_v41  ;;  %v2961_v14 = vld [vmem:[#allocation7 + $0x8] sm:$0xff]  ;;  %v2960_v41 = vld [vmem:[#allocation7] sm:$0xff] }
 0xe77   :  { %v3506_v40 = vpop.f32.mrf.mxu0 }
 0xe78   :  { %v2696_v13 = vadd.f32 %v4561_v22, %v2612_v51  ;;  %v2724_v22 = vld [vmem:[#allocation11 + $0x10] sm:$0xff] }
 0xe79   :  { %3521 = vmatpush3.msra.mxu0 %v2724_v22 }
 0xe7a   :  { %v3378_v16 = vmul.f32 -1.442695, %v2696_v13  ;;  %3522 = vmatprep.subr.mxu0 %v4856_v23 }
 0xe7b   :  { %3523 = vmatpush3.msra.mxu0 %v2723_v4  ;;  %v2962_v4 = vld [vmem:[#allocation7 + $0x10] sm:$0xff] }
 0xe7c   :  { %3719 = vpow2.f32 %v3378_v16  ;;  %3524 = vmatprep.subr.mxu0 %v4856_v23  ;;  %v3379_v23 = vld [vmem:[%s4846_s10] ss:$0 sm:$0xff] }
 0xe7d   :  { %3525 = vmatpush3.msra.mxu0 %v2722_v19 }
 0xe89   :  { %v3720_v55 = vpop.eup %3719 }
 0xe8a   :  { %v2700_v47 = vadd.f32 1.0, %v3720_v55  ;;  %v2964_v55 = vld [vmem:[#allocation7 + $0x20] sm:$0xff] }
 0xe8c   :  { %3721 = vrcp.f32 %v2700_v47 }
 0xe99   :  { %v3722_v35 = vpop.eup %3721 }
 0xe9a   :  { %v2707_v59 = vmul.f32 %v3722_v35, %v2705_v43  ;;  %v2714_v24 = vsub.f32 1.0, %v3722_v35  ;;  %v2720_v54 = vmul.f32 %v3722_v35, %v4441_v32  ;;  %v2969_v35 = vld [vmem:[#allocation7 + $0x48] sm:$0xff] }
 0xe9c   :  { %2709 = vrot.lane.b32.xlu0 %v2707_v59, %s3979_s23  ;;  %v2968_v59 = vld [vmem:[#allocation7 + $0x40] sm:$0xff] }
 0xea0   :  { %3062 = vperm.xlu0 %3546, %v3056_v63  }
 0xf0e   :  { %v2710_v20 = vpop.permute.xlu0 %2709 }
 0xf0f   :  { %v2712_v48 = vadd.f32 %v2710_v20, %v2612_v51  ;;  %v2965_v51 = vld [vmem:[#allocation7 + $0x28] sm:$0xff]  ;;  %v2966_v20 = vld [vmem:[#allocation7 + $0x30] sm:$0xff] }
 0xf11   :  { %3723 = vtanh.f32 %v2712_v48 }
 0xf1e   :  { %v3724_v37 = vpop.eup %3723 }
 0xf1f   :  { %2716 = vrot.lane.b32.xlu1 %v3724_v37, %s3980_s25  ;;  %v2973_v37 = vld [vmem:[#allocation7 + $0x68] sm:$0xff] }
 0xf91   :  { %v2717_v9 = vpop.permute.xlu1 %2716 }
 0xf92   :  { %v2719_v17 = vmul.f32 %v2717_v9, %v2714_v24  ;;  %v2972_v9 = vld [vmem:[#allocation7 + $0x60] sm:$0xff] }
 0xf94   :  { %v2721_v34 = vadd.f32 %v2720_v54, %v2719_v17  ;;  %v2976_v17 = vld [vmem:[#allocation7 + $0x80] sm:$0xff] }
 0xf96   :  { %2734 = vrot.lane.b32.xlu1 %v2721_v34, %s3980_s25 }
0x1008   :  { %v2735_v36 = vpop.permute.xlu1 %2734 }
0x1009   :  { %3319 = vst.msk [vmem:[#allocation13] sm:$0xff] %vm140_vm1, %v2735_v36  ;;  %3527 = vmatmul.mubr.msk.f32.vlgmr.msra.gmra.mxu0 %vm140_vm1, %v2735_v36 }
0x10c9   :  { %v2804_v26 = vpop.f32.mrf.mxu0 }
0x10ca   :  { %v2805_v3 = vadd.f32 %v3379_v23, %v2804_v26  ;;  %v2970_v26 = vld [vmem:[#allocation7 + $0x50] sm:$0xff] }
0x10cb   :  { %v3528_v39 = vpop.f32.mrf.mxu0 }
0x10cc   :  { %v2811_v8 = vrot.slane %v2805_v3, %v4183_v45  ;;  %v2830_v32 = vrot.slane %v2805_v3, %v4187_v50  ;;  %v2849_v27 = vrot.slane %v2805_v3, %v4191_v52  ;;  %v2868_v21 = vrot.slane %v2805_v3, %v4197_v56  ;;  %v3057_v56 = vld [vmem:[%s4847_s11 + $0x8] sm:$0xff]  ;;  %v2963_v39 = vld [vmem:[#allocation7 + $0x18] sm:$0xff] }
0x10cd   :  { %v2887_v33 = vrot.slane %v2805_v3, %v4201_v58  ;;  %v2906_v45 = vrot.slane %v2805_v3, %v4205_v60  ;;  %v2925_v50 = vrot.slane %v2805_v3, %v4209_v62  ;;  %v2944_v52 = vrot.slane %v2805_v3, %v4213_v1  ;;  %v3058_v58 = vld [vmem:[%s4847_s11 + $0x10] sm:$0xff]  ;;  %v3059_v60 = vld [vmem:[%s4847_s11 + $0x18] sm:$0xff]  ;;  %v4676_v62 = vpop.permute.xlu0 %3062 }
0x10ce   :  { %2817 = vbcast.lane.b32.xlu1 %v2811_v8, 264  ;;  %2813 = vbcast.lane.b32.xlu0 %v2811_v8, 256 }
0x10d2   :  { %2836 = vbcast.lane.b32.xlu1 %v2830_v32, 264  ;;  %2832 = vbcast.lane.b32.xlu0 %v2830_v32, 256 }
0x10d6   :  { %2855 = vbcast.lane.b32.xlu1 %v2849_v27, 264  ;;  %2851 = vbcast.lane.b32.xlu0 %v2849_v27, 256 }
0x10da   :  { %2840 = vbcast.lane.b32.xlu1 %v2830_v32, 272  ;;  %2821 = vbcast.lane.b32.xlu0 %v2811_v8, 272 }
0x10de   :  { %2874 = vbcast.lane.b32.xlu1 %v2868_v21, 264  ;;  %2870 = vbcast.lane.b32.xlu0 %v2868_v21, 256 }
0x10e2   :  { %2889 = vbcast.lane.b32.xlu1 %v2887_v33, 256  ;;  %2859 = vbcast.lane.b32.xlu0 %v2849_v27, 272 }
0x10e6   :  { %2825 = vbcast.lane.b32.xlu1 %v2811_v8, 280  ;;  %2893 = vbcast.lane.b32.xlu0 %v2887_v33, 264 }
0x10ea   :  { %2878 = vbcast.lane.b32.xlu1 %v2868_v21, 272  ;;  %2844 = vbcast.lane.b32.xlu0 %v2830_v32, 280  ;;  %v2977_v32 = vld [vmem:[#allocation7 + $0x88] sm:$0xff] }
0x10ee   :  { %2912 = vbcast.lane.b32.xlu1 %v2906_v45, 264  ;;  %2908 = vbcast.lane.b32.xlu0 %v2906_v45, 256 }
0x10f2   :  { %2897 = vbcast.lane.b32.xlu1 %v2887_v33, 272  ;;  %2863 = vbcast.lane.b32.xlu0 %v2849_v27, 280 }
0x10f6   :  { %2931 = vbcast.lane.b32.xlu1 %v2925_v50, 264  ;;  %2927 = vbcast.lane.b32.xlu0 %v2925_v50, 256 }
0x10fa   :  { %2916 = vbcast.lane.b32.xlu1 %v2906_v45, 272  ;;  %2882 = vbcast.lane.b32.xlu0 %v2868_v21, 280  ;;  %v2974_v21 = vld [vmem:[#allocation7 + $0x70] sm:$0xff] }
0x10fe   :  { %2950 = vbcast.lane.b32.xlu1 %v2944_v52, 264  ;;  %2946 = vbcast.lane.b32.xlu0 %v2944_v52, 256 }
0x1102   :  { %2935 = vbcast.lane.b32.xlu1 %v2925_v50, 272  ;;  %2901 = vbcast.lane.b32.xlu0 %v2887_v33, 280 }
0x1106   :  { %2954 = vbcast.lane.b32.xlu1 %v2944_v52, 272  ;;  %2920 = vbcast.lane.b32.xlu0 %v2906_v45, 280 }
0x110a   :  { %2958 = vbcast.lane.b32.xlu1 %v2944_v52, 280  ;;  %2939 = vbcast.lane.b32.xlu0 %v2925_v50, 280  ;;  %v2967_v52 = vld [vmem:[#allocation7 + $0x38] sm:$0xff] }
0x110e   :  { %3067 = vperm.xlu1 %3545, %v3057_v56   ;;  %3072 = vperm.xlu0 %3546, %v3058_v58   ;;  %v2981_v58 = vld [vmem:[#allocation7 + $0xa8] sm:$0xff] }
0x1112   :  { %3077 = vperm.xlu1 %3545, %v3059_v60  }
0x1140   :  { %v2818_v1 = vpop.permute.xlu1 %2817  ;;  %v2814_v11 = vpop.permute.xlu0 %2813 }
0x1141   :  { %v2993_v16 = vadd.f32 %v2961_v14, %v2818_v1  ;;  %v2992_v47 = vadd.f32 %v2960_v41, %v2814_v11  ;;  %v2980_v1 = vld [vmem:[#allocation7 + $0xa0] sm:$0xff] }
0x1143   :  { %3725 = vtanh.f32 %v2993_v16 }
0x1144   :  { %v2837_v49 = vpop.permute.xlu1 %2836  ;;  %v2833_v0 = vpop.permute.xlu0 %2832  ;;  %3727 = vtanh.f32 %v2992_v47  ;;  %v2989_v47 = vld [vmem:[#allocation7 + $0xe8] sm:$0xff] }
0x1145   :  { %v2997_v43 = vadd.f32 %v2965_v51, %v2837_v49  ;;  %v2996_v63 = vadd.f32 %v2964_v55, %v2833_v0  ;;  %v2978_v49 = vld [vmem:[#allocation7 + $0x90] sm:$0xff] }
0x1147   :  { %3729 = vtanh.f32 %v2997_v43 }
0x1148   :  { %v2856_v7 = vpop.permute.xlu1 %2855  ;;  %v2852_v5 = vpop.permute.xlu0 %2851  ;;  %3731 = vtanh.f32 %v2996_v63 }
0x1149   :  { %v3001_v22 = vadd.f32 %v2969_v35, %v2856_v7  ;;  %v3000_v19 = vadd.f32 %v2968_v59, %v2852_v5  ;;  %v2975_v59 = vld [vmem:[#allocation7 + $0x78] sm:$0xff] }
0x114b   :  { %3733 = vtanh.f32 %v3001_v22 }
0x114c   :  { %v2841_v18 = vpop.permute.xlu1 %2840  ;;  %v2822_v30 = vpop.permute.xlu0 %2821  ;;  %3735 = vtanh.f32 %v3000_v19 }
0x114d   :  { %v2998_v24 = vadd.f32 %v2966_v20, %v2841_v18  ;;  %v2994_v54 = vadd.f32 %v2962_v4, %v2822_v30  ;;  %v2984_v18 = vld [vmem:[#allocation7 + $0xc0] sm:$0xff] }
0x114f   :  { %3737 = vtanh.f32 %v2998_v24  ;;  %v2986_v24 = vld [vmem:[#allocation7 + $0xd0] sm:$0xff] }
0x1150   :  { %v2875_v38 = vpop.permute.xlu1 %2874  ;;  %v2871_v15 = vpop.permute.xlu0 %2870  ;;  %3739 = vtanh.f32 %v2994_v54  ;;  %v2979_v54 = vld [vmem:[#allocation7 + $0x98] sm:$0xff] }
0x1151   :  { %v3005_v23 = vadd.f32 %v2973_v37, %v2875_v38  ;;  %v3004_v3 = vadd.f32 %v2972_v9, %v2871_v15  ;;  %v4680_v30 = vpop.eup %3725  ;;  %v2988_v15 = vld [vmem:[#allocation7 + $0xe0] sm:$0xff] }
0x1153   :  { %3741 = vtanh.f32 %v3005_v23 }
0x1154   :  { %v2890_v29 = vpop.permute.xlu1 %2889  ;;  %v2860_v53 = vpop.permute.xlu0 %2859  ;;  %3743 = vtanh.f32 %v3004_v3  ;;  %v2991_v3 = vld [vmem:[#allocation7 + $0xf8] sm:$0xff] }
0x1155   :  { %v3008_v8 = vadd.f32 %v2976_v17, %v2890_v29  ;;  %v3002_v27 = vadd.f32 %v2970_v26, %v2860_v53  ;;  %v4682_v29 = vpop.eup %3727 }
0x1157   :  { %3745 = vtanh.f32 %v3008_v8 }
0x1158   :  { %v2826_v6 = vpop.permute.xlu1 %2825  ;;  %v2894_v28 = vpop.permute.xlu0 %2893  ;;  %3747 = vtanh.f32 %v3002_v27 }
0x1159   :  { %v2995_v50 = vadd.f32 %v2963_v39, %v2826_v6  ;;  %v3009_v56 = vadd.f32 %v2977_v32, %v2894_v28  ;;  %v2971_v6 = vld [vmem:[#allocation7 + $0x58] sm:$0xff]  ;;  %v4684_v28 = vpop.eup %3729 }
0x115a   :  { %v3732_v51 = vpop.eup %3731 }
0x115b   :  { %3749 = vtanh.f32 %v2995_v50  ;;  %v4686_v55 = vpop.eup %3733 }
0x115c   :  { %v2879_v10 = vpop.permute.xlu1 %2878  ;;  %v2845_v2 = vpop.permute.xlu0 %2844  ;;  %3751 = vtanh.f32 %v3009_v56 }
0x115d   :  { %v3006_v60 = vadd.f32 %v2974_v21, %v2879_v10  ;;  %v2999_v11 = vadd.f32 %v2967_v52, %v2845_v2  ;;  %v2985_v10 = vld [vmem:[#allocation7 + $0xc8] sm:$0xff]  ;;  %v3736_v35 = vpop.eup %3735  ;;  %v2983_v21 = vld [vmem:[#allocation7 + $0xb8] sm:$0xff] }
0x115e   :  { %v4689_v63 = vpop.eup %3737 }
0x115f   :  { %3753 = vtanh.f32 %v3006_v60  ;;  %v4691_v19 = vpop.eup %3739 }
0x1160   :  { %v2913_v40 = vpop.permute.xlu1 %2912  ;;  %v2909_v13 = vpop.permute.xlu0 %2908  ;;  %3755 = vtanh.f32 %v2999_v11 }
0x1161   :  { %v3013_v5 = vadd.f32 %v2981_v58, %v2913_v40  ;;  %v3012_v38 = vadd.f32 %v2980_v1, %v2909_v13  ;;  %v2982_v40 = vld [vmem:[#allocation7 + $0xb0] sm:$0xff]  ;;  %v3742_v9 = vpop.eup %3741 }
0x1162   :  { %v3744_v17 = vpop.eup %3743 }
0x1163   :  { %3757 = vtanh.f32 %v3013_v5 }
0x1164   :  { %v2898_v48 = vpop.permute.xlu1 %2897  ;;  %v4678_v61 = vpop.permute.xlu0 %2863  ;;  %3759 = vtanh.f32 %v3012_v38  ;;  %v3080_v38 = vmul.f32 %v4682_v29, %v4676_v62 }
0x1165   :  { %v3010_v53 = vadd.f32 %v2978_v49, %v2898_v48  ;;  %v3003_v13 = vadd.f32 %v2971_v6, %v4678_v61  ;;  %v2990_v48 = vld [vmem:[#allocation7 + $0xf0] sm:$0xff]  ;;  %v3746_v23 = vpop.eup %3745  ;;  %v3092_v6 = vmul.f32 %v3744_v17, %v4676_v62 }
0x1166   :  { %v3748_v32 = vpop.eup %3747 }
0x1167   :  { %3761 = vtanh.f32 %v3010_v53  ;;  %v3088_v53 = vmul.f32 %v3736_v35, %v4676_v62 }
0x1168   :  { %v2932_v34 = vpop.permute.xlu1 %2931  ;;  %v2928_v36 = vpop.permute.xlu0 %2927 }
0x1169   :  { %v3016_v2 = vadd.f32 %v2984_v18, %v2928_v36  ;;  %v3017_v43 = vadd.f32 %v2985_v10, %v2932_v34  ;;  %v2987_v36 = vld [vmem:[#allocation7 + $0xd8] sm:$0xff] }
0x116b   :  { %3763 = vtanh.f32 %v3016_v2  ;;  %v3096_v2 = vmul.f32 %v3746_v23, %v4676_v62 }
0x116c   :  { %v2917_v33 = vpop.permute.xlu1 %2916  ;;  %v2883_v45 = vpop.permute.xlu0 %2882 }
0x116d   :  { %v3014_v20 = vadd.f32 %v2982_v40, %v2917_v33  ;;  %v3007_v61 = vadd.f32 %v2975_v59, %v2883_v45  ;;  %v4693_v33 = vpop.eup %3749 }
0x116e   :  { %v3752_v45 = vpop.eup %3751 }
0x116f   :  { %v3754_v56 = vpop.eup %3753 }
0x1170   :  { %v2951_v0 = vpop.permute.xlu1 %2950  ;;  %v2947_v7 = vpop.permute.xlu0 %2946 }
0x1171   :  { %v3020_v16 = vadd.f32 %v2988_v15, %v2947_v7  ;;  %v3021_v37 = vadd.f32 %v2989_v47, %v2951_v0  ;;  %v3756_v60 = vpop.eup %3755  ;;  %v3084_v15 = vmul.f32 %v3732_v51, %v4676_v62 }
0x1172   :  { %v3758_v1 = vpop.eup %3757 }
0x1173   :  { %3765 = vtanh.f32 %v3020_v16  ;;  %v3760_v11 = vpop.eup %3759 }
0x1174   :  { %v2936_v14 = vpop.permute.xlu1 %2935  ;;  %v2902_v41 = vpop.permute.xlu0 %2901  ;;  %3767 = vtanh.f32 %v3003_v13 }
0x1175   :  { %3769 = vtanh.f32 %v3017_v43  ;;  %v3018_v26 = vadd.f32 %v2986_v24, %v2936_v14  ;;  %v3011_v27 = vadd.f32 %v2979_v54, %v2902_v41  ;;  %v3762_v49 = vpop.eup %3761  ;;  %v3100_v14 = vmul.f32 %v3760_v11, %v4676_v62 }
0x1176   :  { %3771 = vtanh.f32 %v3014_v20 }
0x1177   :  { %3773 = vtanh.f32 %v3021_v37 }
0x1178   :  { %v2955_v22 = vpop.permute.xlu1 %2954  ;;  %v2921_v4 = vpop.permute.xlu0 %2920  ;;  %3775 = vtanh.f32 %v3007_v61 }
0x1179   :  { %v3022_v34 = vadd.f32 %v2990_v48, %v2955_v22  ;;  %v3015_v58 = vadd.f32 %v2983_v21, %v2921_v4  ;;  %v3764_v0 = vpop.eup %3763 }
0x117a   :  { %v3104_v41 = vmul.f32 %v3764_v0, %v4676_v62 }
0x117b   :  { %3777 = vtanh.f32 %v3022_v34 }
0x117c   :  { %v2959_v39 = vpop.permute.xlu1 %2958  ;;  %v2940_v8 = vpop.permute.xlu0 %2939  ;;  %3779 = vtanh.f32 %v3018_v26 }
0x117d   :  { %v3019_v50 = vadd.f32 %v2987_v36, %v2940_v8  ;;  %v3023_v52 = vadd.f32 %v2991_v3, %v2959_v39  ;;  %3781 = vtanh.f32 %v3011_v27 }
0x117f   :  { %3783 = vtanh.f32 %v3019_v50 }
0x1180   :  { %3785 = vtanh.f32 %v3023_v52  ;;  %v3766_v7 = vpop.eup %3765 }
0x1181   :  { %3787 = vtanh.f32 %v3015_v58  ;;  %v3768_v5 = vpop.eup %3767  ;;  %v3108_v40 = vmul.f32 %v3766_v7, %v4676_v62 }
0x1182   :  { %v3770_v18 = vpop.eup %3769 }
0x1183   :  { %v3772_v10 = vpop.eup %3771 }
0x1184   :  { %v3774_v13 = vpop.eup %3773 }
0x1185   :  { %v3776_v59 = vpop.eup %3775 }
0x1188   :  { %v3778_v37 = vpop.eup %3777 }
0x1189   :  { %v3068_v16 = vpop.permute.xlu1 %3067  ;;  %v3073_v43 = vpop.permute.xlu0 %3072 }
0x118a   :  { %v3081_v47 = vmul.f32 %v4680_v30, %v3068_v16  ;;  %v3085_v29 = vmul.f32 %v4684_v28, %v3068_v16  ;;  %v3089_v51 = vmul.f32 %v4686_v55, %v3068_v16  ;;  %v3093_v35 = vmul.f32 %v3742_v9, %v3068_v16  ;;  %v3780_v17 = vpop.eup %3779 }
0x118b   :  { %v3097_v20 = vmul.f32 %v3752_v45, %v3068_v16  ;;  %v3101_v48 = vmul.f32 %v3758_v1, %v3068_v16  ;;  %v3105_v22 = vmul.f32 %v3770_v18, %v3068_v16  ;;  %v3109_v4 = vmul.f32 %v3774_v13, %v3068_v16  ;;  %v3782_v23 = vpop.eup %3781 }
0x118c   :  { %v3112_v24 = vadd.f32 %v3081_v47, %v3080_v38  ;;  %v3121_v61 = vadd.f32 %v3085_v29, %v3084_v15  ;;  %v3130_v54 = vadd.f32 %v3089_v51, %v3088_v53  ;;  %v3139_v62 = vadd.f32 %v3093_v35, %v3092_v6  ;;  %v3784_v8 = vpop.eup %3783 }
0x118d   :  { %v3148_v34 = vadd.f32 %v3097_v20, %v3096_v2  ;;  %v3157_v36 = vadd.f32 %v3101_v48, %v3100_v14  ;;  %v3166_v30 = vadd.f32 %v3105_v22, %v3104_v41  ;;  %v3082_v28 = vmul.f32 %v4691_v19, %v3073_v43  ;;  %v3078_v39 = vpop.permute.xlu1 %3077  ;;  %v3786_v52 = vpop.eup %3785 }
0x118e   :  { %v3086_v55 = vmul.f32 %v4689_v63, %v3073_v43  ;;  %v3090_v9 = vmul.f32 %v3748_v32, %v3073_v43  ;;  %v3094_v26 = vmul.f32 %v3754_v56, %v3073_v43  ;;  %v3098_v3 = vmul.f32 %v3762_v49, %v3073_v43  ;;  %v3788_v7 = vpop.eup %3787 }
0x118f   :  { %v3102_v27 = vmul.f32 %v3772_v10, %v3073_v43  ;;  %v3106_v21 = vmul.f32 %v3780_v17, %v3073_v43  ;;  %v3110_v50 = vmul.f32 %v3778_v37, %v3073_v43  ;;  %v3113_v45 = vadd.f32 %v3112_v24, %v3082_v28 }
0x1190   :  { %v3122_v58 = vadd.f32 %v3121_v61, %v3086_v55  ;;  %v3131_v1 = vadd.f32 %v3130_v54, %v3090_v9  ;;  %v3140_v11 = vadd.f32 %v3139_v62, %v3094_v26  ;;  %v3149_v0 = vadd.f32 %v3148_v34, %v3098_v3 }
0x1191   :  { %v3158_v18 = vadd.f32 %v3157_v36, %v3102_v27  ;;  %v3083_v19 = vmul.f32 %v4693_v33, %v3078_v39  ;;  %v3087_v38 = vmul.f32 %v3756_v60, %v3078_v39  ;;  %v3091_v63 = vmul.f32 %v3768_v5, %v3078_v39 }
0x1192   :  { %v3095_v32 = vmul.f32 %v3776_v59, %v3078_v39  ;;  %v3099_v56 = vmul.f32 %v3782_v23, %v3078_v39  ;;  %v3103_v49 = vmul.f32 %v3788_v7, %v3078_v39  ;;  %v3107_v15 = vmul.f32 %v3784_v8, %v3078_v39 }
0x1193   :  { %v3114_v53 = vadd.f32 %v3113_v45, %v3083_v19  ;;  %v3123_v6 = vadd.f32 %v3122_v58, %v3087_v38  ;;  %v3132_v10 = vadd.f32 %v3131_v1, %v3091_v63  ;;  %v3111_v2 = vmul.f32 %v3786_v52, %v3078_v39 }
0x1194   :  { %v3141_v14 = vadd.f32 %v3140_v11, %v3095_v32  ;;  %v3150_v41 = vadd.f32 %v3149_v0, %v3099_v56  ;;  %v3159_v16 = vadd.f32 %v3158_v18, %v3103_v49  ;;  %v3167_v13 = vadd.f32 %v3166_v30, %v3106_v21 }
0x1195   :  { %v3115_v47 = vrot.slane %v3114_v53, 4  ;;  %v3124_v29 = vrot.slane %v3123_v6, 4  ;;  %v3133_v51 = vrot.slane %v3132_v10, 4  ;;  %v3175_v35 = vadd.f32 %v3109_v4, %v3108_v40 }
0x1196   :  { %v3142_v43 = vrot.slane %v3141_v14, 4  ;;  %v3151_v33 = vrot.slane %v3150_v41, 4  ;;  %v3160_v60 = vrot.slane %v3159_v16, 4  ;;  %v3168_v5 = vadd.f32 %v3167_v13, %v3107_v15 }
0x1197   :  { %v3116_v59 = vadd.f32 %v3115_v47, %v3114_v53  ;;  %v3125_v20 = vadd.f32 %v3124_v29, %v3123_v6  ;;  %v3134_v48 = vadd.f32 %v3133_v51, %v3132_v10  ;;  %v3176_v22 = vadd.f32 %v3175_v35, %v3110_v50 }
0x1198   :  { %v3143_v37 = vadd.f32 %v3142_v43, %v3141_v14  ;;  %v3152_v24 = vadd.f32 %v3151_v33, %v3150_v41  ;;  %v3161_v61 = vadd.f32 %v3160_v60, %v3159_v16  ;;  %v3169_v54 = vrot.slane %v3168_v5, 4 }
0x1199   :  { %v3117_v62 = vrot.slane %v3116_v59, 2  ;;  %v3126_v17 = vrot.slane %v3125_v20, 2  ;;  %v3135_v34 = vrot.slane %v3134_v48, 2  ;;  %v3177_v36 = vadd.f32 %v3176_v22, %v3111_v2 }
0x119a   :  { %v3144_v30 = vrot.slane %v3143_v37, 2  ;;  %v3153_v28 = vrot.slane %v3152_v24, 2  ;;  %v3162_v23 = vrot.slane %v3161_v61, 2  ;;  %v3170_v40 = vadd.f32 %v3169_v54, %v3168_v5 }
0x119b   :  { %v3118_v4 = vadd.f32 %v3117_v62, %v3116_v59  ;;  %v3127_v55 = vadd.f32 %v3126_v17, %v3125_v20  ;;  %v3136_v9 = vadd.f32 %v3135_v34, %v3134_v48  ;;  %v3178_v26 = vrot.slane %v3177_v36, 4 }
0x119c   :  { %v3145_v3 = vadd.f32 %v3144_v30, %v3143_v37  ;;  %v3154_v39 = vadd.f32 %v3153_v28, %v3152_v24  ;;  %v3163_v8 = vadd.f32 %v3162_v23, %v3161_v61  ;;  %v3171_v27 = vrot.slane %v3170_v40, 2 }
0x119d   :  { %v3119_v21 = vrot.slane %v3118_v4, 1  ;;  %v3128_v50 = vrot.slane %v3127_v55, 1  ;;  %v3137_v45 = vrot.slane %v3136_v9, 1  ;;  %v3179_v52 = vadd.f32 %v3178_v26, %v3177_v36 }
0x119e   :  { %v3146_v58 = vrot.slane %v3145_v3, 1  ;;  %v3155_v1 = vrot.slane %v3154_v39, 1  ;;  %v3164_v11 = vrot.slane %v3163_v8, 1  ;;  %v3172_v0 = vadd.f32 %v3171_v27, %v3170_v40 }
0x119f   :  { %v3120_v7 = vadd.f32 %v3119_v21, %v3118_v4  ;;  %v3129_v18 = vadd.f32 %v3128_v50, %v3127_v55  ;;  %v3138_v19 = vadd.f32 %v3137_v45, %v3136_v9  ;;  %v3180_v38 = vrot.slane %v3179_v52, 2 }
0x11a0   :  { %v3147_v63 = vadd.f32 %v3146_v58, %v3145_v3  ;;  %v3173_v32 = vrot.slane %v3172_v0, 1  ;;  %v3156_v56 = vadd.f32 %v3155_v1, %v3154_v39  ;;  %v3165_v15 = vadd.f32 %v3164_v11, %v3163_v8 }
0x11a1   :  { %v3181_v49 = vadd.f32 %v3180_v38, %v3179_v52  ;;  %3789 = vtanh.f32 %v3120_v7  ;;  %v833_v2 = vmul.f32 1.442695, %v4266_v25  ;;  %v2030_v47 = vmul.f32 1.442695, %v4519_v31 }
0x11a2   :  { %3791 = vtanh.f32 %v3129_v18  ;;  %v3174_v53 = vadd.f32 %v3173_v32, %v3172_v0  ;;  %v2121_v29 = vsub.f32 1.0, %v4528_v42 }
0x11a3   :  { %v3182_v6 = vrot.slane %v3181_v49, 1  ;;  %3793 = vtanh.f32 %v3138_v19 }
0x11a4   :  { %3795 = vtanh.f32 %v3147_v63  ;;  %v2122_v22 = vmul.f32 %v2121_v29, %v4511_v57 }
0x11a5   :  { %v3183_v10 = vadd.f32 %v3182_v6, %v3181_v49  ;;  %3797 = vtanh.f32 %v3156_v56 }
0x11a6   :  { %3799 = vtanh.f32 %v3165_v15  ;;  %vm3184_vm0 = vcmp.gt.f32.partialorder %v2122_v22, 0.0 }
0x11a7   :  { %3801 = vtanh.f32 %v3174_v53 }
0x11a8   :  { %3803 = vtanh.f32 %v3183_v10 }
0x11a9   :  { %3805 = vpow2.f32 %v833_v2 }
0x11aa   :  { %3807 = vpow2.f32 %v2030_v47 }
0x11ae   :  { %v3790_v14 = vpop.eup %3789 }
0x11af   :  { %v3792_v41 = vpop.eup %3791  ;;  %v3193_v16 = vmul.f32 10.0, %v3790_v14 }
0x11b0   :  { %v3794_v13 = vpop.eup %3793  ;;  %v3194_v51 = vmul.f32 10.0, %v3792_v41 }
0x11b1   :  { %v3796_v35 = vpop.eup %3795  ;;  %v3195_v43 = vmul.f32 10.0, %v3794_v13 }
0x11b2   :  { %v3798_v33 = vpop.eup %3797  ;;  %v3196_v60 = vmul.f32 10.0, %v3796_v35  ;;  %v3209_v5 = vsel %vm814_vm2, %v3194_v51, %v3193_v16  ;;  %vm3309_vm2 = vcmask 7168  }
0x11b3   :  { %v3800_v59 = vpop.eup %3799  ;;  %v3197_v20 = vmul.f32 10.0, %v3798_v33  ;;  %v3210_v25 = vsel %vm816_vm3, %v3195_v43, %v3209_v5 }
0x11b4   :  { %v3802_v48 = vpop.eup %3801  ;;  %v3198_v37 = vmul.f32 10.0, %v3800_v59  ;;  %v3211_v31 = vsel %vm818_vm4, %v3196_v60, %v3210_v25 }
0x11b5   :  { %v3804_v24 = vpop.eup %3803  ;;  %v3199_v42 = vmul.f32 10.0, %v3802_v48  ;;  %v3212_v61 = vsel %vm820_vm5, %v3197_v20, %v3211_v31 }
0x11b6   :  { %v3200_v54 = vmul.f32 10.0, %v3804_v24  ;;  %v3213_v62 = vsel %vm822_vm6, %v3198_v37, %v3212_v61  ;;  %v3806_v30 = vpop.eup %3805 }
0x11b7   :  { %v3214_v17 = vsel %vm824_vm7, %v3199_v42, %v3213_v62  ;;  %v3808_v57 = vpop.eup %3807 }
0x11b8   :  { %v3215_v34 = vsel %vm826_vm8, %v3200_v54, %v3214_v17 }
0x11b9   :  { %v3217_v36 = vsel %vm3184_vm0, %v3215_v34, -1e+30 }
0x11ba   :  { %3218 = vmax.xlane.f32.xlu0 %v3217_v36 }
0x11be   :  { %835 = vadd.xlane.f32.xlu0 %v3806_v30 }
0x11c2   :  { %2032 = vadd.xlane.f32.xlu0 %v3808_v57 }
0x1243   :  { %v3219_v28 = vpop.xlane.xlu0 %3218 }
0x1244   :  { %v3220_v23 = vsub.f32 %v3217_v36, %v3219_v28 }
0x1246   :  { %v3221_v40 = vmul.f32 1.442695, %v3220_v23  ;;  %vm3293_vm1 = vcmp.ge.f32.partialorder %v3220_v23, 0.0 }
0x1247   :  { %v3294_v4 = vsel %vm3293_vm1, %v4264_v44, 128  ;;  %v836_v55 = vpop.xlane.xlu0 %835 }
0x1248   :  { %3809 = vpow2.f32 %v3221_v40  ;;  %v3296_v9 = vshra.s32 %v3294_v4, 16  ;;  %v3295_v35 = vand.u32 65535, %v3294_v4 }
0x1249   :  { %3811 = vrcp.f32 %v836_v55 }
0x124a   :  { %v3298_v26 = vcvt.s32.f32 %v3296_v9  ;;  %v3297_v33 = vcvt.s32.f32 %v3295_v35 }
0x124b   :  { %v2033_v3 = vpop.xlane.xlu0 %2032 }
0x124c   :  { %3813 = vrcp.f32 %v2033_v3  ;;  %3299 = vmin.xlane.f32.xlu1 %v3298_v26 }
0x1255   :  { %v4722_v39 = vpop.eup %3809 }
0x1256   :  { %v3812_v8 = vpop.eup %3811  ;;  %3223 = vadd.xlane.f32.xlu1 %v4722_v39 }
0x1257   :  { %v838_v27 = vmul.f32 %v3812_v8, %v3806_v30 }
0x1259   :  { %v3814_v21 = vpop.eup %3813  ;;  %v840_v50 = vcombine.high %v838_v27, %v838_v27  ;;  %v847_v45 = vrot.slane %v838_v27, %v4271_v12 }
0x125a   :  { %v2035_v44 = vmul.f32 %v3814_v21, %v3808_v57  ;;  %v4727_v52 = vsel %vm3309_vm2, %v3812_v8, %v3814_v21 }
0x125b   :  { %v854_v58 = vrot.slane %v840_v50, %v4271_v12  ;;  %v855_v1 = vcombine.high %v847_v45, %v847_v45  ;;  %v863_v11 = vrot.slane %v847_v45, %v4271_v12  ;;  %3357 = vst.sshfl [vmem:[%s4848_s12] sm:$0x1 pattern:$0x73625140] %v847_v45 }
0x125c   :  { %v2037_v0 = vcombine.high %v2035_v44, %v2035_v44  ;;  %v2044_v7 = vrot.slane %v2035_v44, %v4271_v12 }
0x125d   :  { %v856_v18 = vcombine.high %v854_v58, %v854_v58  ;;  %v870_v19 = vrot.slane %v854_v58, %v4271_v12  ;;  %v877_v38 = vrot.slane %v855_v1, %v4271_v12  ;;  %v885_v63 = vcombine.high %v863_v11, %v863_v11  ;;  %3358 = vst.sshfl [vmem:[%s4848_s12 + $0x4] sm:$0x1 pattern:$0x73625140] %v855_v1 }
0x125e   :  { %3359 = vst.sshfl [vmem:[%s4848_s12 + $0x10] sm:$0x1 pattern:$0x73625140] %v854_v58  ;;  %v2051_v32 = vrot.slane %v2037_v0, %v4271_v12  ;;  %v2052_v56 = vcombine.high %v2044_v7, %v2044_v7  ;;  %v2060_v49 = vrot.slane %v2044_v7, %v4271_v12 }
0x125f   :  { %3369 = vst.sshfl [vmem:[%s4848_s12 + $0x1] sm:$0x1 pattern:$0x73625140] %v2044_v7  ;;  %v884_v15 = vrot.slane %v856_v18, %v4271_v12  ;;  %v886_v53 = vcombine.high %v870_v19, %v870_v19  ;;  %v887_v6 = vcombine.high %v877_v38, %v877_v38  ;;  %899 = vst [vmem:[%s4848_s12 + $0x8] sm:$0x1] %v885_v63 }
0x1260   :  { %3360 = vst.sshfl [vmem:[%s4848_s12 + $0x14] sm:$0x1 pattern:$0x73625140] %v856_v18  ;;  %v2053_v10 = vcombine.high %v2051_v32, %v2051_v32  ;;  %v2067_v2 = vrot.slane %v2051_v32, %v4271_v12  ;;  %v2074_v14 = vrot.slane %v2052_v56, %v4271_v12  ;;  %v2082_v41 = vcombine.high %v2060_v49, %v2060_v49 }
0x1261   :  { %3370 = vst.sshfl [vmem:[%s4848_s12 + $0x5] sm:$0x1 pattern:$0x73625140] %v2052_v56  ;;  %v888_v16 = vcombine.high %v884_v15, %v884_v15  ;;  %900 = vst [vmem:[%s4848_s12 + $0xc] sm:$0x1] %v887_v6 }
0x1262   :  { %3371 = vst.sshfl [vmem:[%s4848_s12 + $0x11] sm:$0x1 pattern:$0x73625140] %v2051_v32  ;;  %903 = vst [vmem:[%s4848_s12 + $0x18] sm:$0x1] %v886_v53  ;;  %v2081_v13 = vrot.slane %v2053_v10, %v4271_v12  ;;  %v2083_v47 = vcombine.high %v2067_v2, %v2067_v2  ;;  %v2084_v29 = vcombine.high %v2074_v14, %v2074_v14 }
0x1263   :  { %2096 = vst [vmem:[%s4848_s12 + $0x9] sm:$0x1] %v2082_v41  ;;  %3372 = vst.sshfl [vmem:[%s4848_s12 + $0x15] sm:$0x1 pattern:$0x73625140] %v2053_v10 }
0x1264   :  { %904 = vst [vmem:[%s4848_s12 + $0x1c] sm:$0x1] %v888_v16  ;;  %v2085_v51 = vcombine.high %v2081_v13, %v2081_v13  ;;  %2097 = vst [vmem:[%s4848_s12 + $0xd] sm:$0x1] %v2084_v29 }
0x1265   :  { %2100 = vst [vmem:[%s4848_s12 + $0x19] sm:$0x1] %v2083_v47 }
0x1266   :  { %2101 = vst [vmem:[%s4848_s12 + $0x1d] sm:$0x1] %v2085_v51 }
0x12d5   :  { %v3300_v43 = vpop.xlane.xlu1 %3299 }
0x12d6   :  { %vm3301_vm3 = vcmp.eq.f32.partialorder %v3298_v26, %v3300_v43 }
0x12d7   :  { %v3302_v60 = vsel %vm3301_vm3, %v3297_v33, inf }
0x12d8   :  { %3303 = vmin.xlane.f32.xlu0 %v3302_v60 }
0x12df   :  { %v3224_v5 = vpop.xlane.xlu1 %3223 }
0x12e0   :  { %3815 = vrcp.f32 %v3224_v5 }
0x12e1   :  { %3950 = shalt.err (!%p3947_p6)
}
0x12e2   :  { %3335 = dma.vmem_to_hbm [thread:$0]  %s3333_s20, 128, %s4851_s15, [#allocation4]   ;;  %vm3311_vm4 = vcmask 15360   ;;  %vm3313_vm5 = vcmask 23552   ;;  %v4857_v4 = vld [vmem:[#allocation19_spill] sm:$0xff] }
0x12e3   :  { %v3315_v55 = vsel %vm3309_vm2, %v4857_v4, %v4523_v46 }
0x12ed   :  { %v3816_v59 = vpop.eup %3815 }
0x12ee   :  { %v3226_v20 = vmul.f32 %v3816_v59, %v4722_v39  ;;  %v3312_v25 = vsel %vm3311_vm4, %v4727_v52, %v3816_v59 }
0x12ef   :  { %3314 = vst.msk [vmem:[%s4849_s13] sm:$0xff] %vm3313_vm5, %v3312_v25 }
0x12f0   :  { %v3228_v48 = vcombine.high %v3226_v20, %v3226_v20  ;;  %v3235_v22 = vrot.slane %v3226_v20, %v4271_v12 }
0x12f2   :  { %v3242_v37 = vrot.slane %v3228_v48, %v4271_v12  ;;  %v3243_v31 = vcombine.high %v3235_v22, %v3235_v22  ;;  %v3251_v24 = vrot.slane %v3235_v22, %v4271_v12  ;;  %3381 = vst.sshfl [vmem:[%s4848_s12 + $0x2] sm:$0x1 pattern:$0x73625140] %v3235_v22 }
0x12f4   :  { %v3244_v42 = vcombine.high %v3242_v37, %v3242_v37  ;;  %v3258_v61 = vrot.slane %v3242_v37, %v4271_v12  ;;  %v3265_v54 = vrot.slane %v3243_v31, %v4271_v12  ;;  %v3273_v62 = vcombine.high %v3251_v24, %v3251_v24  ;;  %3382 = vst.sshfl [vmem:[%s4848_s12 + $0x6] sm:$0x1 pattern:$0x73625140] %v3243_v31 }
0x12f5   :  { %3383 = vst.sshfl [vmem:[%s4848_s12 + $0x12] sm:$0x1 pattern:$0x73625140] %v3242_v37 }
0x12f6   :  { %v3272_v17 = vrot.slane %v3244_v42, %v4271_v12  ;;  %v3274_v34 = vcombine.high %v3258_v61, %v3258_v61  ;;  %v3275_v36 = vcombine.high %v3265_v54, %v3265_v54  ;;  %3287 = vst [vmem:[%s4848_s12 + $0xa] sm:$0x1] %v3273_v62  ;;  %3384 = vst.sshfl [vmem:[%s4848_s12 + $0x16] sm:$0x1 pattern:$0x73625140] %v3244_v42  ;;  %v3306_v12 = vcvt.f32.s32 %v3300_v43 }
0x12f8   :  { %v3276_v30 = vcombine.high %v3272_v17, %v3272_v17  ;;  %3288 = vst [vmem:[%s4848_s12 + $0xe] sm:$0x1] %v3275_v36  ;;  %3291 = vst [vmem:[%s4848_s12 + $0x1a] sm:$0x1] %v3274_v34  ;;  %v3307_v28 = vshll.u32 %v3306_v12, 16 }
0x12fa   :  { %3292 = vst [vmem:[%s4848_s12 + $0x1e] sm:$0x1] %v3276_v30 }
0x1361   :  { %v3304_v57 = vpop.xlane.xlu0 %3303 }
0x1362   :  { %v3305_v23 = vcvt.f32.s32 %v3304_v57 }
0x1364   :  { %v3308_v40 = vadd.s32 %v3307_v28, %v3305_v23 }
0x1366   :  { %v3316_v9 = vsel %vm3311_vm4, %v3315_v55, %v3308_v40 }
0x1367   :  { %3317 = vst.msk [vmem:[%s4850_s14] sm:$0xff] %vm3313_vm5, %v3316_v9 }
0x1368   :  { %3967 = dma.done.wait [#allocation4], 128  }
0x1369   :  { %3968 = vsyncadd [#allocation4], 4294967168 }
0x136a   :  { %3345 = vsyncpa [#allocation3], 1 }
0x136b   :  { %3346 = vsyncpa [#allocation6], 1 }
0x136c   :  { %3347 = vsyncpa [#allocation9], 1 }
0x136d   :  { %3348 = vsyncpa [#allocation12], 1 }
0x136e   :  { %3349 = vsyncpa [#allocation4], 1 }

</bundles_post_ra>
